<compile_context>
chip_gen: v5e
topology: v5e:2x2
jax: 0.10.0
libtpu: 0.0.40
codegen_flags: <defaults>
</compile_context>

<pallas_src>
import jax
import jax.numpy as jnp
from jax.experimental import pallas as pl
from jax.experimental.pallas import tpu as pltpu


def _round_up(v, m):
    return (v + m - 1) // m * m


def _im2col_3x3(pad_ref, H, W, C):
    """(H+2, W+2, C) zero-padded VMEM ref -> (H*W, 9*C) im2col matrix (tap-major, channel-minor)."""
    cols = [pad_ref[dy:dy + H, dx:dx + W, :] for dy in range(3) for dx in range(3)]
    return jnp.concatenate(cols, axis=-1).reshape(H * W, 9 * C)


def _lula_block_kernel(x_ref, w1_ref, s1_ref, b1_ref, w2_ref, s2_ref, b2_ref,
                       out_ref, xpad_ref, hpad_ref):
    _, H, W, Cin = x_ref.shape
    Cinp = xpad_ref.shape[-1]            # lane-padded input channels (== padded Cout)
    C1p = hpad_ref.shape[-1]             # lane-padded conv1 output channels (Cout + m_lula)
    HW = H * W

    # Zero-padded input staged in VMEM (replaces a host-side jnp.pad HBM pass).
    xpad_ref[...] = jnp.zeros_like(xpad_ref)
    xpad_ref[1:H + 1, 1:W + 1, 0:Cin] = x_ref[0].astype(jnp.float32)

    # conv1 as a single im2col matmul, fused BN1 + ReLU; result stays in VMEM.
    im1 = _im2col_3x3(xpad_ref, H, W, Cinp)                             # (HW, 9*Cinp)
    h1 = jnp.dot(im1, w1_ref[...], preferred_element_type=jnp.float32)  # (HW, C1p)
    h1 = jnp.maximum(h1 * s1_ref[0] + b1_ref[0], 0.0)

    # Zero-padded conv1 activation staged in VMEM (provides conv2's padding, no HBM round-trip).
    hpad_ref[...] = jnp.zeros_like(hpad_ref)
    hpad_ref[1:H + 1, 1:W + 1, :] = h1.reshape(H, W, C1p)

    # conv2 as a single im2col matmul, fused BN2 + residual add + ReLU.
    im2 = _im2col_3x3(hpad_ref, H, W, C1p)                              # (HW, 9*C1p)
    y = jnp.dot(im2, w2_ref[...], preferred_element_type=jnp.float32)   # (HW, C2p)
    y = y * s2_ref[0] + b2_ref[0]

    # Identity residual: re-read the (already channel-padded) interior of xpad.
    # Valid because n_in == n_out for this block, so Cinp == C2p.
    xr = xpad_ref[1:H + 1, 1:W + 1, :].reshape(HW, Cinp)
    out_ref[0] = jnp.maximum(y + xr, 0.0).astype(out_ref.dtype)          # lane-dense store


def lula_basic_block_forward_nhwc(x_nhwc, params):
    N, H, W, Cin = x_nhwc.shape
    w1, w2 = params["w1"], params["w2"]              # PyTorch OIHW layouts
    C1 = w1.shape[0]                                  # n_out + m_lula
    Cout = w2.shape[0]                                # n_out
    assert Cin == Cout, "identity residual requires n_in == n_out (no downsample in layer4[1])"

    Cinp = _round_up(Cin, 128)
    C1p = _round_up(C1, 128)
    C2p = _round_up(Cout, 128)                        # == Cinp

    # OIHW -> HWIO, zero-pad channels to lane multiples, flatten to im2col weight matrices.
    w1m = jnp.transpose(w1, (2, 3, 1, 0)).astype(jnp.float32)           # (3,3,Cin,C1)
    w1m = jnp.pad(w1m, ((0, 0), (0, 0), (0, Cinp - Cin), (0, C1p - C1)))
    w1m = w1m.reshape(9 * Cinp, C1p)
    w2m = jnp.transpose(w2, (2, 3, 1, 0)).astype(jnp.float32)           # (3,3,C1,Cout)
    w2m = jnp.pad(w2m, ((0, 0), (0, 0), (0, C1p - C1), (0, C2p - Cout)))
    w2m = w2m.reshape(9 * C1p, C2p)

    s1 = jnp.pad(params["scale1"].astype(jnp.float32), (0, C1p - C1)).reshape(1, C1p)
    b1 = jnp.pad(params["shift1"].astype(jnp.float32), (0, C1p - C1)).reshape(1, C1p)
    s2 = jnp.pad(params["scale2"].astype(jnp.float32), (0, C2p - Cout)).reshape(1, C2p)
    b2 = jnp.pad(params["shift2"].astype(jnp.float32), (0, C2p - Cout)).reshape(1, C2p)

    out = pl.pallas_call(
        _lula_block_kernel,
        out_shape=jax.ShapeDtypeStruct((N, H * W, C2p), x_nhwc.dtype),
        grid=(N,),
        in_specs=[
            pl.BlockSpec((1, H, W, Cin), lambda n: (n, 0, 0, 0)),
            pl.BlockSpec((9 * Cinp, C1p), lambda n: (0, 0)),   # constant block index: fetched once
            pl.BlockSpec((1, C1p), lambda n: (0, 0)),
            pl.BlockSpec((1, C1p), lambda n: (0, 0)),
            pl.BlockSpec((9 * C1p, C2p), lambda n: (0, 0)),
            pl.BlockSpec((1, C2p), lambda n: (0, 0)),
            pl.BlockSpec((1, C2p), lambda n: (0, 0)),
        ],
        out_specs=pl.BlockSpec((1, H * W, C2p), lambda n: (n, 0, 0)),
        scratch_shapes=[
            pltpu.VMEM((H + 2, W + 2, Cinp), jnp.float32),     # zero-padded input
            pltpu.VMEM((H + 2, W + 2, C1p), jnp.float32),      # zero-padded conv1 activation
        ],
        compiler_params=pltpu.CompilerParams(
            dimension_semantics=("parallel",),
            vmem_limit_bytes=64 * 1024 * 1024,
        ),
    )(x_nhwc, w1m, s1, b1, w2m, s2, b2)

    return out.reshape(N, H, W, C2p)[..., :Cout]


@jax.jit
def lula_basic_block_forward(x_nchw, params):
    # Boundary layout adaptation only (PyTorch NCHW <-> TPU-friendly NHWC); tiny vs. the block.
    x = jnp.transpose(x_nchw, (0, 2, 3, 1))
    out = lula_basic_block_forward_nhwc(x, params)
    return jnp.transpose(out, (0, 3, 1, 2))


# ---------------------------------------------------------------------------
# Deterministic parameter construction mirroring MaskedConv2d / LULA_BasicBlock __init__
# ---------------------------------------------------------------------------
def make_lula_params(key, n_channels, m_lula):
    n_in = n_out = n_channels
    k = jax.random.split(key, 4)
    # MaskedConv2d(conv1, m_in=0, m_out=m): W in R^{(n_out+m) x n_in x 3 x 3}
    w1 = jax.random.normal(k[0], (n_out + m_lula, n_in, 3, 3), jnp.float32) * 0.1
    # MaskedConv2d(conv2, m_in=m, m_out=0): base rows have zeroed LULA-input columns
    w2 = jax.random.normal(k[1], (n_out, n_in + m_lula, 3, 3), jnp.float32) * 0.1
    w2 = w2.at[:n_out, n_in:, :, :].set(0.0)
    # Fresh BatchNorm2d (default init), folded for inference: scale=g/sqrt(var+eps), shift=b-mean*scale
    eps = 1e-5
    scale1 = jnp.ones((n_out + m_lula,), jnp.float32) / jnp.sqrt(1.0 + eps)
    shift1 = jnp.zeros((n_out + m_lula,), jnp.float32)
    scale2 = jnp.ones((n_out,), jnp.float32) / jnp.sqrt(1.0 + eps)
    shift2 = jnp.zeros((n_out,), jnp.float32)
    return dict(w1=w1, w2=w2, scale1=scale1, shift1=shift1, scale2=scale2, shift2=shift2)


# ---------------------------------------------------------------------------
# Pure-JAX reference (NCHW, lax conv) for correctness check
# ---------------------------------------------------------------------------
def ref_forward(x_nchw, params):
    def conv(x, w):
        return jax.lax.conv_general_dilated(
            x, w, window_strides=(1, 1), padding=((1, 1), (1, 1)),
            dimension_numbers=("NCHW", "OIHW", "NCHW"))
    out = conv(x_nchw, params["w1"])
    out = out * params["scale1"][None, :, None, None] + params["shift1"][None, :, None, None]
    out = jnp.maximum(out, 0.0)
    out = conv(out, params["w2"])
    out = out * params["scale2"][None, :, None, None] + params["shift2"][None, :, None, None]
    out = out + x_nchw
    return jnp.maximum(out, 0.0)


if __name__ == "__main__":
    key = jax.random.PRNGKey(0)
    kx, kp = jax.random.split(key)

    N, C, H, W = 2, 4, 16, 16    # layer4[1] style block: channels in == channels out
    M_LULA = 4                   # n_lula_units = [4] -> conv1 gains 4 output / conv2 gains 4 input ch

    x = jax.random.normal(kx, (N, C, H, W), jnp.float32)      # PyTorch-style NCHW input
    params = make_lula_params(kp, C, M_LULA)

    out = lula_basic_block_forward(x, params)
    out = jax.block_until_ready(out)

    ref = ref_forward(x, params)
    assert out.shape == (N, C, H, W)
    assert jnp.allclose(out, ref, atol=1e-4, rtol=1e-4), "Pallas output mismatch vs reference"

    print("KERNEL_OK")
</pallas_src>

<mosaic_0001>
module attributes {stable_mosaic.version = 11 : i64} {
  func.func @_lula_block_kernel(%arg0: i32, %arg1: memref<1x16x16x4xf32, #tpu.memory_space<vmem>>, %arg2: memref<1152x128xf32, #tpu.memory_space<vmem>>, %arg3: memref<1x128xf32, #tpu.memory_space<vmem>>, %arg4: memref<1x128xf32, #tpu.memory_space<vmem>>, %arg5: memref<1152x128xf32, #tpu.memory_space<vmem>>, %arg6: memref<1x128xf32, #tpu.memory_space<vmem>>, %arg7: memref<1x128xf32, #tpu.memory_space<vmem>>, %arg8: memref<1x256x128xf32, #tpu.memory_space<vmem>>, %arg9: memref<18x18x128xf32, #tpu.memory_space<vmem>>, %arg10: memref<18x18x128xf32, #tpu.memory_space<vmem>>) attributes {dimension_semantics = [#tpu.dimension_semantics<parallel>], iteration_bounds = array<i64: 2>, scalar_prefetch = 0 : i64, scratch_operands = 2 : i64, tpu.core_type = #tpu.core_type<tc>, window_params = [{transform_indices = @transform_0, window_bounds = array<i64: 1, 16, 16, 4>}, {pipeline_mode = #tpu.pipeline_mode<synchronous>, transform_indices = @transform_1, window_bounds = array<i64: 1152, 128>}, {pipeline_mode = #tpu.pipeline_mode<synchronous>, transform_indices = @transform_2, window_bounds = array<i64: 1, 128>}, {pipeline_mode = #tpu.pipeline_mode<synchronous>, transform_indices = @transform_3, window_bounds = array<i64: 1, 128>}, {pipeline_mode = #tpu.pipeline_mode<synchronous>, transform_indices = @transform_4, window_bounds = array<i64: 1152, 128>}, {pipeline_mode = #tpu.pipeline_mode<synchronous>, transform_indices = @transform_5, window_bounds = array<i64: 1, 128>}, {pipeline_mode = #tpu.pipeline_mode<synchronous>, transform_indices = @transform_6, window_bounds = array<i64: 1, 128>}, {transform_indices = @transform_7, window_bounds = array<i64: 1, 256, 128>}]} {
    %cst = arith.constant 0.000000e+00 : f32
    %0 = vector.broadcast %cst : f32 to vector<18x18x128xf32>
    %c0 = arith.constant 0 : index
    %c0_0 = arith.constant 0 : index
    %c0_1 = arith.constant 0 : index
    %1 = vector.load %arg9[%c0, %c0_0, %c0_1] : memref<18x18x128xf32, #tpu.memory_space<vmem>>, vector<18x18x128xf32>
    tpu.vector_store %arg9[%c0, %c0_0, %c0_1], %0 {strides = array<i32>} : memref<18x18x128xf32, #tpu.memory_space<vmem>>, vector<18x18x128xf32>,
    %c0_2 = arith.constant 0 : index
    %c0_3 = arith.constant 0 : index
    %c0_4 = arith.constant 0 : index
    %c0_5 = arith.constant 0 : index
    %2 = vector.load %arg1[%c0_2, %c0_3, %c0_4, %c0_5] : memref<1x16x16x4xf32, #tpu.memory_space<vmem>>, vector<1x16x16x4xf32>
    %3 = vector.shape_cast %2 : vector<1x16x16x4xf32> to vector<16x16x4xf32>
    %c1 = arith.constant 1 : index
    %c1_6 = arith.constant 1 : index
    %c0_7 = arith.constant 0 : index
    %4 = vector.load %arg9[%c1, %c1_6, %c0_7] : memref<18x18x128xf32, #tpu.memory_space<vmem>>, vector<16x16x4xf32>
    tpu.vector_store %arg9[%c1, %c1_6, %c0_7], %3 {strides = array<i32>} : memref<18x18x128xf32, #tpu.memory_space<vmem>>, vector<16x16x4xf32>,
    %c0_8 = arith.constant 0 : index
    %c0_9 = arith.constant 0 : index
    %c0_10 = arith.constant 0 : index
    %5 = vector.load %arg9[%c0_8, %c0_9, %c0_10] : memref<18x18x128xf32, #tpu.memory_space<vmem>>, vector<16x16x128xf32>
    %c0_11 = arith.constant 0 : index
    %c1_12 = arith.constant 1 : index
    %c0_13 = arith.constant 0 : index
    %6 = vector.load %arg9[%c0_11, %c1_12, %c0_13] : memref<18x18x128xf32, #tpu.memory_space<vmem>>, vector<16x16x128xf32>
    %c0_14 = arith.constant 0 : index
    %c2 = arith.constant 2 : index
    %c0_15 = arith.constant 0 : index
    %7 = vector.load %arg9[%c0_14, %c2, %c0_15] : memref<18x18x128xf32, #tpu.memory_space<vmem>>, vector<16x16x128xf32>
    %c1_16 = arith.constant 1 : index
    %c0_17 = arith.constant 0 : index
    %c0_18 = arith.constant 0 : index
    %8 = vector.load %arg9[%c1_16, %c0_17, %c0_18] : memref<18x18x128xf32, #tpu.memory_space<vmem>>, vector<16x16x128xf32>
    %c1_19 = arith.constant 1 : index
    %c1_20 = arith.constant 1 : index
    %c0_21 = arith.constant 0 : index
    %9 = vector.load %arg9[%c1_19, %c1_20, %c0_21] : memref<18x18x128xf32, #tpu.memory_space<vmem>>, vector<16x16x128xf32>
    %c1_22 = arith.constant 1 : index
    %c2_23 = arith.constant 2 : index
    %c0_24 = arith.constant 0 : index
    %10 = vector.load %arg9[%c1_22, %c2_23, %c0_24] : memref<18x18x128xf32, #tpu.memory_space<vmem>>, vector<16x16x128xf32>
    %c2_25 = arith.constant 2 : index
    %c0_26 = arith.constant 0 : index
    %c0_27 = arith.constant 0 : index
    %11 = vector.load %arg9[%c2_25, %c0_26, %c0_27] : memref<18x18x128xf32, #tpu.memory_space<vmem>>, vector<16x16x128xf32>
    %c2_28 = arith.constant 2 : index
    %c1_29 = arith.constant 1 : index
    %c0_30 = arith.constant 0 : index
    %12 = vector.load %arg9[%c2_28, %c1_29, %c0_30] : memref<18x18x128xf32, #tpu.memory_space<vmem>>, vector<16x16x128xf32>
    %c2_31 = arith.constant 2 : index
    %c2_32 = arith.constant 2 : index
    %c0_33 = arith.constant 0 : index
    %13 = vector.load %arg9[%c2_31, %c2_32, %c0_33] : memref<18x18x128xf32, #tpu.memory_space<vmem>>, vector<16x16x128xf32>
    %14 = tpu.concatenate %5, %6, %7, %8, %9, %10, %11, %12, %13 in 2 : vector<16x16x128xf32>, vector<16x16x128xf32>, vector<16x16x128xf32>, vector<16x16x128xf32>, vector<16x16x128xf32>, vector<16x16x128xf32>, vector<16x16x128xf32>, vector<16x16x128xf32>, vector<16x16x128xf32> -> vector<16x16x1152xf32>
    %15 = vector.shape_cast %14 : vector<16x16x1152xf32> to vector<256x1152xf32>
    %c0_34 = arith.constant 0 : index
    %c0_35 = arith.constant 0 : index
    %16 = vector.load %arg2[%c0_34, %c0_35] : memref<1152x128xf32, #tpu.memory_space<vmem>>, vector<1152x128xf32>
    %cst_36 = arith.constant dense<0.000000e+00> : vector<256x128xf32>
    %17 = tpu.matmul %15, %16, %cst_36 {dimension_numbers = #tpu.dot_dimension_numbers<[1], [0], [0], [1], [0, 0, 1, 1], [], []>} : vector<256x1152xf32>, vector<1152x128xf32>, vector<256x128xf32> -> vector<256x128xf32>
    %c0_37 = arith.constant 0 : index
    %c0_38 = arith.constant 0 : index
    %18 = vector.load %arg3[%c0_37, %c0_38] : memref<1x128xf32, #tpu.memory_space<vmem>>, vector<1x128xf32>
    %19 = vector.shape_cast %18 : vector<1x128xf32> to vector<128xf32>
    %20 = vector.shape_cast %19 : vector<128xf32> to vector<1x128xf32>
    %21 = vector.broadcast %20 : vector<1x128xf32> to vector<256x128xf32>
    %22 = arith.mulf %17, %21 : vector<256x128xf32>
    %c0_39 = arith.constant 0 : index
    %c0_40 = arith.constant 0 : index
    %23 = vector.load %arg4[%c0_39, %c0_40] : memref<1x128xf32, #tpu.memory_space<vmem>>, vector<1x128xf32>
    %24 = vector.shape_cast %23 : vector<1x128xf32> to vector<128xf32>
    %25 = vector.shape_cast %24 : vector<128xf32> to vector<1x128xf32>
    %26 = vector.broadcast %25 : vector<1x128xf32> to vector<256x128xf32>
    %27 = arith.addf %22, %26 : vector<256x128xf32>
    %cst_41 = arith.constant 0.000000e+00 : f32
    %28 = vector.broadcast %cst_41 : f32 to vector<256x128xf32>
    %29 = arith.maximumf %27, %28 : vector<256x128xf32>
    %cst_42 = arith.constant 0.000000e+00 : f32
    %30 = vector.broadcast %cst_42 : f32 to vector<18x18x128xf32>
    %c0_43 = arith.constant 0 : index
    %c0_44 = arith.constant 0 : index
    %c0_45 = arith.constant 0 : index
    %31 = vector.load %arg10[%c0_43, %c0_44, %c0_45] : memref<18x18x128xf32, #tpu.memory_space<vmem>>, vector<18x18x128xf32>
    tpu.vector_store %arg10[%c0_43, %c0_44, %c0_45], %30 {strides = array<i32>} : memref<18x18x128xf32, #tpu.memory_space<vmem>>, vector<18x18x128xf32>,
    %32 = vector.shape_cast %29 : vector<256x128xf32> to vector<16x16x128xf32>
    %c1_46 = arith.constant 1 : index
    %c1_47 = arith.constant 1 : index
    %c0_48 = arith.constant 0 : index
    %33 = vector.load %arg10[%c1_46, %c1_47, %c0_48] : memref<18x18x128xf32, #tpu.memory_space<vmem>>, vector<16x16x128xf32>
    tpu.vector_store %arg10[%c1_46, %c1_47, %c0_48], %32 {strides = array<i32>} : memref<18x18x128xf32, #tpu.memory_space<vmem>>, vector<16x16x128xf32>,
    %c0_49 = arith.constant 0 : index
    %c0_50 = arith.constant 0 : index
    %c0_51 = arith.constant 0 : index
    %34 = vector.load %arg10[%c0_49, %c0_50, %c0_51] : memref<18x18x128xf32, #tpu.memory_space<vmem>>, vector<16x16x128xf32>
    %c0_52 = arith.constant 0 : index
    %c1_53 = arith.constant 1 : index
    %c0_54 = arith.constant 0 : index
    %35 = vector.load %arg10[%c0_52, %c1_53, %c0_54] : memref<18x18x128xf32, #tpu.memory_space<vmem>>, vector<16x16x128xf32>
    %c0_55 = arith.constant 0 : index
    %c2_56 = arith.constant 2 : index
    %c0_57 = arith.constant 0 : index
    %36 = vector.load %arg10[%c0_55, %c2_56, %c0_57] : memref<18x18x128xf32, #tpu.memory_space<vmem>>, vector<16x16x128xf32>
    %c1_58 = arith.constant 1 : index
    %c0_59 = arith.constant 0 : index
    %c0_60 = arith.constant 0 : index
    %37 = vector.load %arg10[%c1_58, %c0_59, %c0_60] : memref<18x18x128xf32, #tpu.memory_space<vmem>>, vector<16x16x128xf32>
    %c1_61 = arith.constant 1 : index
    %c1_62 = arith.constant 1 : index
    %c0_63 = arith.constant 0 : index
    %38 = vector.load %arg10[%c1_61, %c1_62, %c0_63] : memref<18x18x128xf32, #tpu.memory_space<vmem>>, vector<16x16x128xf32>
    %c1_64 = arith.constant 1 : index
    %c2_65 = arith.constant 2 : index
    %c0_66 = arith.constant 0 : index
    %39 = vector.load %arg10[%c1_64, %c2_65, %c0_66] : memref<18x18x128xf32, #tpu.memory_space<vmem>>, vector<16x16x128xf32>
    %c2_67 = arith.constant 2 : index
    %c0_68 = arith.constant 0 : index
    %c0_69 = arith.constant 0 : index
    %40 = vector.load %arg10[%c2_67, %c0_68, %c0_69] : memref<18x18x128xf32, #tpu.memory_space<vmem>>, vector<16x16x128xf32>
    %c2_70 = arith.constant 2 : index
    %c1_71 = arith.constant 1 : index
    %c0_72 = arith.constant 0 : index
    %41 = vector.load %arg10[%c2_70, %c1_71, %c0_72] : memref<18x18x128xf32, #tpu.memory_space<vmem>>, vector<16x16x128xf32>
    %c2_73 = arith.constant 2 : index
    %c2_74 = arith.constant 2 : index
    %c0_75 = arith.constant 0 : index
    %42 = vector.load %arg10[%c2_73, %c2_74, %c0_75] : memref<18x18x128xf32, #tpu.memory_space<vmem>>, vector<16x16x128xf32>
    %43 = tpu.concatenate %34, %35, %36, %37, %38, %39, %40, %41, %42 in 2 : vector<16x16x128xf32>, vector<16x16x128xf32>, vector<16x16x128xf32>, vector<16x16x128xf32>, vector<16x16x128xf32>, vector<16x16x128xf32>, vector<16x16x128xf32>, vector<16x16x128xf32>, vector<16x16x128xf32> -> vector<16x16x1152xf32>
    %44 = vector.shape_cast %43 : vector<16x16x1152xf32> to vector<256x1152xf32>
    %c0_76 = arith.constant 0 : index
    %c0_77 = arith.constant 0 : index
    %45 = vector.load %arg5[%c0_76, %c0_77] : memref<1152x128xf32, #tpu.memory_space<vmem>>, vector<1152x128xf32>
    %cst_78 = arith.constant dense<0.000000e+00> : vector<256x128xf32>
    %46 = tpu.matmul %44, %45, %cst_78 {dimension_numbers = #tpu.dot_dimension_numbers<[1], [0], [0], [1], [0, 0, 1, 1], [], []>} : vector<256x1152xf32>, vector<1152x128xf32>, vector<256x128xf32> -> vector<256x128xf32>
    %c0_79 = arith.constant 0 : index
    %c0_80 = arith.constant 0 : index
    %47 = vector.load %arg6[%c0_79, %c0_80] : memref<1x128xf32, #tpu.memory_space<vmem>>, vector<1x128xf32>
    %48 = vector.shape_cast %47 : vector<1x128xf32> to vector<128xf32>
    %49 = vector.shape_cast %48 : vector<128xf32> to vector<1x128xf32>
    %50 = vector.broadcast %49 : vector<1x128xf32> to vector<256x128xf32>
    %51 = arith.mulf %46, %50 : vector<256x128xf32>
    %c0_81 = arith.constant 0 : index
    %c0_82 = arith.constant 0 : index
    %52 = vector.load %arg7[%c0_81, %c0_82] : memref<1x128xf32, #tpu.memory_space<vmem>>, vector<1x128xf32>
    %53 = vector.shape_cast %52 : vector<1x128xf32> to vector<128xf32>
    %54 = vector.shape_cast %53 : vector<128xf32> to vector<1x128xf32>
    %55 = vector.broadcast %54 : vector<1x128xf32> to vector<256x128xf32>
    %56 = arith.addf %51, %55 : vector<256x128xf32>
    %c1_83 = arith.constant 1 : index
    %c1_84 = arith.constant 1 : index
    %c0_85 = arith.constant 0 : index
    %57 = vector.load %arg9[%c1_83, %c1_84, %c0_85] : memref<18x18x128xf32, #tpu.memory_space<vmem>>, vector<16x16x128xf32>
    %58 = vector.shape_cast %57 : vector<16x16x128xf32> to vector<256x128xf32>
    %59 = arith.addf %56, %58 : vector<256x128xf32>
    %cst_86 = arith.constant 0.000000e+00 : f32
    %60 = vector.broadcast %cst_86 : f32 to vector<256x128xf32>
    %61 = arith.maximumf %59, %60 : vector<256x128xf32>
    %c0_87 = arith.constant 0 : index
    %c0_88 = arith.constant 0 : index
    %c0_89 = arith.constant 0 : index
    %62 = vector.load %arg8[%c0_87, %c0_88, %c0_89] : memref<1x256x128xf32, #tpu.memory_space<vmem>>, vector<1x256x128xf32>
    %63 = vector.shape_cast %62 : vector<1x256x128xf32> to vector<256x128xf32>
    %64 = vector.shape_cast %61 : vector<256x128xf32> to vector<1x256x128xf32>
    tpu.vector_store %arg8[%c0_87, %c0_88, %c0_89], %64 {strides = array<i32>} : memref<1x256x128xf32, #tpu.memory_space<vmem>>, vector<1x256x128xf32>,
    return
  }
  func.func @transform_0(%arg0: i32) -> (i32, i32, i32, i32) {
    %c0_i32 = arith.constant 0 : i32
    %c0_i32_0 = arith.constant 0 : i32
    %c0_i32_1 = arith.constant 0 : i32
    %c0_i32_2 = arith.constant 0 : i32
    return %arg0, %c0_i32, %c0_i32_0, %c0_i32_1 : i32, i32, i32, i32
  }
  func.func @transform_1(%arg0: i32) -> (i32, i32) {
    %c0_i32 = arith.constant 0 : i32
    %c0_i32_0 = arith.constant 0 : i32
    %c0_i32_1 = arith.constant 0 : i32
    return %c0_i32, %c0_i32_0 : i32, i32
  }
  func.func @transform_2(%arg0: i32) -> (i32, i32) {
    %c0_i32 = arith.constant 0 : i32
    %c0_i32_0 = arith.constant 0 : i32
    %c0_i32_1 = arith.constant 0 : i32
    return %c0_i32, %c0_i32_0 : i32, i32
  }
  func.func @transform_3(%arg0: i32) -> (i32, i32) {
    %c0_i32 = arith.constant 0 : i32
    %c0_i32_0 = arith.constant 0 : i32
    %c0_i32_1 = arith.constant 0 : i32
    return %c0_i32, %c0_i32_0 : i32, i32
  }
  func.func @transform_4(%arg0: i32) -> (i32, i32) {
    %c0_i32 = arith.constant 0 : i32
    %c0_i32_0 = arith.constant 0 : i32
    %c0_i32_1 = arith.constant 0 : i32
    return %c0_i32, %c0_i32_0 : i32, i32
  }
  func.func @transform_5(%arg0: i32) -> (i32, i32) {
    %c0_i32 = arith.constant 0 : i32
    %c0_i32_0 = arith.constant 0 : i32
    %c0_i32_1 = arith.constant 0 : i32
    return %c0_i32, %c0_i32_0 : i32, i32
  }
  func.func @transform_6(%arg0: i32) -> (i32, i32) {
    %c0_i32 = arith.constant 0 : i32
    %c0_i32_0 = arith.constant 0 : i32
    %c0_i32_1 = arith.constant 0 : i32
    return %c0_i32, %c0_i32_0 : i32, i32
  }
  func.func @transform_7(%arg0: i32) -> (i32, i32, i32) {
    %c0_i32 = arith.constant 0 : i32
    %c0_i32_0 = arith.constant 0 : i32
    %c0_i32_1 = arith.constant 0 : i32
    return %arg0, %c0_i32, %c0_i32_0 : i32, i32, i32
  }
}

</mosaic_0001>

<bundles_post_ra>
// kernel: lula_basic_block_forward.1
= control target key start
LH: loop header
LB: loop body
LE: loop exit
PB: predicated region body
PF: predicated region fallthrough
CT: control target
= control target key end

     0   :  { %s3856_s24 = smov 0   ;;  %s6677_s0 = inlined_call_operand.vmem [shape: f32[2,16,16,4], index: 0, kind: input, shape index: {}]   ;;  %s6678_s1 = inlined_call_operand.vmem [shape: f32[1152,128], index: 1, kind: input, shape index: {}]   ;;  %s6679_s2 = inlined_call_operand.vmem [shape: f32[1,128], index: 2, kind: input, shape index: {}]   ;;  %s6680_s3 = inlined_call_operand.vmem [shape: f32[1,128], index: 3, kind: input, shape index: {}]   ;;  %s6681_s4 = inlined_call_operand.vmem [shape: f32[1152,128], index: 4, kind: input, shape index: {}]   ;;  %s6682_s5 = inlined_call_operand.vmem [shape: f32[1,128], index: 5, kind: input, shape index: {}]   ;;  %s6683_s6 = inlined_call_operand.vmem [shape: f32[1,128], index: 6, kind: input, shape index: {}]   ;;  %s6684_s7 = inlined_call_operand.vmem [shape: f32[2,256,128], index: 7, kind: output, shape index: {}]  }
   0x1 LB: > { %s3745_s25 = sadd.s32 4294967295, %s3813_s24   ;;  %p3749_p0 = scmp.ge.s32.totalorder %s3813_s24, 1  ;;  %s3813_s24 = sphi %s3856_s24, %s17_s24  }
   0x2   : > { %p237_p1 = scmp.lt.s32.totalorder %s3813_s24, 3 }
   0x4   : > { %p238_p2 = pnand %p3749_p0, %p237_p1 }
   0x6   : > { %241 = sbr.rel (%p238_p2) target bundleno = 1545 (0x609), region = 48 }
   0xb   : > { %v703_v0 = vld [vmem:[%s6678_s1 + $0x78] sm:$0xff]  ;;  %v702_v2 = vld [vmem:[%s6678_s1 + $0x70] sm:$0xff]  ;;  %v3815_v4 = vmov 0.0   ;;  %v701_v5 = vld [vmem:[%s6678_s1 + $0x68] sm:$0xff]  ;;  %p269_p3 = scmp.lt.s32.totalorder %s3745_s25, 1  ;;  %vm366_vm0 = vcmask 31744  }
   0xc   : > { %v719_v1 = vld [vmem:[%s6678_s1 + $0xf8] sm:$0xff]  ;;  %832 = vmatpush.msra.mxu0 %v703_v0  ;;  %3758 = vmatpush.msra.mxu2 %v703_v0  ;;  %v718_v3 = vld [vmem:[%s6678_s1 + $0xf0] sm:$0xff]  ;;  %279 = vst [vmem:[#allocation2] sm:$0xff] %v3815_v4  ;;  %v717_v6 = vld [vmem:[%s6678_s1 + $0xe8] sm:$0xff] }
   0xd   : > { %3774 = vmatpush.msra.mxu3 %v719_v1  ;;  %945 = vmatpush.msra.mxu1 %v719_v1  ;;  %280 = vst [vmem:[#allocation2 + $0x8] sm:$0xff] %v3815_v4  ;;  %v700_v7 = vld [vmem:[%s6678_s1 + $0x60] sm:$0xff]  ;;  %v699_v9 = vld [vmem:[%s6678_s1 + $0x58] sm:$0xff]  ;;  %v698_v11 = vld [vmem:[%s6678_s1 + $0x50] sm:$0xff]  ;;  %s6838_s25 = smov (!%p269_p3, %s3745_s25), 1 }
   0xe   : > { %833 = vmatpush.msra.mxu0 %v702_v2  ;;  %3759 = vmatpush.msra.mxu2 %v702_v2  ;;  %281 = vst [vmem:[#allocation2 + $0x10] sm:$0x3] %v3815_v4  ;;  %v716_v8 = vld [vmem:[%s6678_s1 + $0xe0] sm:$0xff]  ;;  %v715_v10 = vld [vmem:[%s6678_s1 + $0xd8] sm:$0xff]  ;;  %v714_v12 = vld [vmem:[%s6678_s1 + $0xd0] sm:$0xff]  ;;  %s3756_s14 = sshll.u32 %s6838_s25, 8 }
   0xf   : > { %3775 = vmatpush.msra.mxu3 %v718_v3  ;;  %946 = vmatpush.msra.mxu1 %v718_v3  ;;  %282 = vst [vmem:[#allocation2 + $0x18] sm:$0xff] %v3815_v4  ;;  %v697_v13 = vld [vmem:[%s6678_s1 + $0x48] sm:$0xff]  ;;  %v696_v15 = vld [vmem:[%s6678_s1 + $0x40] sm:$0xff]  ;;  %v695_v17 = vld [vmem:[%s6678_s1 + $0x38] sm:$0xff]  ;;  %s4101_s23 = scalar_lea.vmem %s6677_s0, %s3756_s14  ;;  %s6434_s27 = scalar_lea.vmem %s6684_s7, %s3756_s14 }
  0x10   : > { %834 = vmatpush.msra.mxu0 %v701_v5  ;;  %3760 = vmatpush.msra.mxu2 %v701_v5  ;;  %283 = vst [vmem:[#allocation2 + $0x20] sm:$0xff] %v3815_v4  ;;  %v713_v14 = vld [vmem:[%s6678_s1 + $0xc8] sm:$0xff]  ;;  %v712_v16 = vld [vmem:[%s6678_s1 + $0xc0] sm:$0xff]  ;;  %v711_v18 = vld [vmem:[%s6678_s1 + $0xb8] sm:$0xff] }
  0x11   : > { %3776 = vmatpush.msra.mxu3 %v717_v6  ;;  %947 = vmatpush.msra.mxu1 %v717_v6  ;;  %284 = vst [vmem:[#allocation2 + $0x28] sm:$0x3] %v3815_v4  ;;  %v694_v19 = vld [vmem:[%s6678_s1 + $0x30] sm:$0xff]  ;;  %v693_v21 = vld [vmem:[%s6678_s1 + $0x28] sm:$0xff]  ;;  %v692_v23 = vld [vmem:[%s6678_s1 + $0x20] sm:$0xff] }
  0x12   : > { %835 = vmatpush.msra.mxu0 %v700_v7  ;;  %3761 = vmatpush.msra.mxu2 %v700_v7  ;;  %285 = vst [vmem:[#allocation2 + $0x30] sm:$0xff] %v3815_v4  ;;  %v710_v20 = vld [vmem:[%s6678_s1 + $0xb0] sm:$0xff]  ;;  %v709_v22 = vld [vmem:[%s6678_s1 + $0xa8] sm:$0xff]  ;;  %v708_v24 = vld [vmem:[%s6678_s1 + $0xa0] sm:$0xff] }
  0x13   : > { %3777 = vmatpush.msra.mxu3 %v716_v8  ;;  %948 = vmatpush.msra.mxu1 %v716_v8  ;;  %286 = vst [vmem:[#allocation2 + $0x38] sm:$0xff] %v3815_v4  ;;  %v691_v25 = vld [vmem:[%s6678_s1 + $0x18] sm:$0xff]  ;;  %v690_v27 = vld [vmem:[%s6678_s1 + $0x10] sm:$0xff]  ;;  %v689_v29 = vld [vmem:[%s6678_s1 + $0x8] sm:$0xff] }
  0x14   : > { %836 = vmatpush.msra.mxu0 %v699_v9  ;;  %3762 = vmatpush.msra.mxu2 %v699_v9  ;;  %287 = vst [vmem:[#allocation2 + $0x40] sm:$0x3] %v3815_v4  ;;  %v707_v26 = vld [vmem:[%s6678_s1 + $0x98] sm:$0xff]  ;;  %v706_v28 = vld [vmem:[%s6678_s1 + $0x90] sm:$0xff]  ;;  %v705_v30 = vld [vmem:[%s6678_s1 + $0x88] sm:$0xff] }
  0x15   : > { %3778 = vmatpush.msra.mxu3 %v715_v10  ;;  %949 = vmatpush.msra.mxu1 %v715_v10  ;;  %288 = vst [vmem:[#allocation2 + $0x48] sm:$0xff] %v3815_v4  ;;  %v688_v31 = vld [vmem:[%s6678_s1] sm:$0xff]  ;;  %v735_v33 = vld [vmem:[%s6678_s1 + $0x178] sm:$0xff]  ;;  %v734_v35 = vld [vmem:[%s6678_s1 + $0x170] sm:$0xff] }
  0x16   : > { %837 = vmatpush.msra.mxu0 %v698_v11  ;;  %3763 = vmatpush.msra.mxu2 %v698_v11  ;;  %289 = vst [vmem:[#allocation2 + $0x50] sm:$0xff] %v3815_v4  ;;  %v704_v32 = vld [vmem:[%s6678_s1 + $0x80] sm:$0xff]  ;;  %v751_v34 = vld [vmem:[%s6678_s1 + $0x1f8] sm:$0xff]  ;;  %v750_v37 = vld [vmem:[%s6678_s1 + $0x1f0] sm:$0xff] }
  0x17   : > { %3779 = vmatpush.msra.mxu3 %v714_v12  ;;  %950 = vmatpush.msra.mxu1 %v714_v12  ;;  %290 = vst [vmem:[#allocation2 + $0x58] sm:$0x3] %v3815_v4  ;;  %v431_v36 = vld [vmem:[#allocation2 + $0x1] sm:$0xff]  ;;  %v767_v38 = vld [vmem:[%s6678_s1 + $0x278] sm:$0xff]  ;;  %v432_v40 = vld [vmem:[#allocation2 + $0x9] sm:$0xff] }
  0x18   : > { %838 = vmatpush.msra.mxu0 %v697_v13  ;;  %3764 = vmatpush.msra.mxu2 %v697_v13  ;;  %291 = vst [vmem:[#allocation2 + $0x60] sm:$0xff] %v3815_v4  ;;  %v733_v39 = vld [vmem:[%s6678_s1 + $0x168] sm:$0xff]  ;;  %v766_v42 = vld [vmem:[%s6678_s1 + $0x270] sm:$0xff]  ;;  %v348_v44 = vld [vmem:[%s4101_s23 + $0x78] sm:$0xff] }
  0x19   : > { %3780 = vmatpush.msra.mxu3 %v713_v14  ;;  %951 = vmatpush.msra.mxu1 %v713_v14  ;;  %292 = vst [vmem:[#allocation2 + $0x68] sm:$0xff] %v3815_v4  ;;  %v749_v41 = vld [vmem:[%s6678_s1 + $0x1e8] sm:$0xff]  ;;  %v347_v43 = vld [vmem:[%s4101_s23 + $0x70] sm:$0xff]  ;;  %v333_v45 = vld [vmem:[%s4101_s23] sm:$0xff] }
  0x1a   : > { %839 = vmatpush.msra.mxu0 %v696_v15  ;;  %3765 = vmatpush.msra.mxu2 %v696_v15  ;;  %293 = vst [vmem:[#allocation2 + $0x70] sm:$0x3] %v3815_v4  ;;  %v349_v46 = vld [vmem:[%s4101_s23 + $0x80] sm:$0xff]  ;;  %v765_v49 = vld [vmem:[%s6678_s1 + $0x268] sm:$0xff]  ;;  %v335_v52 = vld [vmem:[%s4101_s23 + $0x10] sm:$0xff] }
  0x1b   : > { %3781 = vmatpush.msra.mxu3 %v712_v16  ;;  %952 = vmatpush.msra.mxu1 %v712_v16  ;;  %294 = vst [vmem:[#allocation2 + $0x78] sm:$0xff] %v3815_v4  ;;  %v732_v47 = vld [vmem:[%s6678_s1 + $0x160] sm:$0xff]  ;;  %v334_v50 = vld [vmem:[%s4101_s23 + $0x8] sm:$0xff]  ;;  %v351_v53 = vld [vmem:[%s4101_s23 + $0x90] sm:$0xff] }
  0x1c   : > { %840 = vmatpush.msra.mxu0 %v695_v17  ;;  %3766 = vmatpush.msra.mxu2 %v695_v17  ;;  %295 = vst [vmem:[#allocation2 + $0x80] sm:$0xff] %v3815_v4  ;;  %v748_v48 = vld [vmem:[%s6678_s1 + $0x1e0] sm:$0xff]  ;;  %v350_v51 = vld [vmem:[%s4101_s23 + $0x88] sm:$0xff]  ;;  %v336_v56 = vld [vmem:[%s4101_s23 + $0x18] sm:$0xff] }
  0x1d   : > { %3782 = vmatpush.msra.mxu3 %v711_v18  ;;  %953 = vmatpush.msra.mxu1 %v711_v18  ;;  %296 = vst [vmem:[#allocation2 + $0x88] sm:$0x3] %v3815_v4  ;;  %v731_v57 = vld [vmem:[%s6678_s1 + $0x158] sm:$0xff]  ;;  %v764_v61 = vld [vmem:[%s6678_s1 + $0x260] sm:$0xff]  ;;  %v730_v5 = vld [vmem:[%s6678_s1 + $0x150] sm:$0xff] }
  0x1e   : > { %841 = vmatpush.msra.mxu0 %v694_v19  ;;  %3767 = vmatpush.msra.mxu2 %v694_v19  ;;  %297 = vst [vmem:[#allocation2 + $0x90] sm:$0xff] %v3815_v4  ;;  %v747_v60 = vld [vmem:[%s6678_s1 + $0x1d8] sm:$0xff]  ;;  %v337_v3 = vld [vmem:[%s4101_s23 + $0x20] sm:$0xff]  ;;  %v746_v6 = vld [vmem:[%s6678_s1 + $0x1d0] sm:$0xff] }
  0x1f   : > { %3783 = vmatpush.msra.mxu3 %v710_v20  ;;  %954 = vmatpush.msra.mxu1 %v710_v20  ;;  %298 = vst [vmem:[#allocation2 + $0x98] sm:$0xff] %v3815_v4  ;;  %v352_v62 = vld [vmem:[%s4101_s23 + $0x98] sm:$0xff]  ;;  %v338_v12 = vld [vmem:[%s4101_s23 + $0x28] sm:$0xff]  ;;  %v762_v16 = vld [vmem:[%s6678_s1 + $0x250] sm:$0xff] }
  0x20   : > { %842 = vmatpush.msra.mxu0 %v693_v21  ;;  %3768 = vmatpush.msra.mxu2 %v693_v21  ;;  %299 = vst [vmem:[#allocation2 + $0xa0] sm:$0x3] %v3815_v4  ;;  %v763_v7 = vld [vmem:[%s6678_s1 + $0x258] sm:$0xff]  ;;  %v354_v13 = vld [vmem:[%s4101_s23 + $0xa8] sm:$0xff]  ;;  %v339_v21 = vld [vmem:[%s4101_s23 + $0x30] sm:$0xff] }
  0x21   : > { %3784 = vmatpush.msra.mxu3 %v709_v22  ;;  %955 = vmatpush.msra.mxu1 %v709_v22  ;;  %300 = vst [vmem:[#allocation2 + $0xa8] sm:$0xff] %v3815_v4  ;;  %v729_v14 = vld [vmem:[%s6678_s1 + $0x148] sm:$0xff]  ;;  %v355_v22 = vld [vmem:[%s4101_s23 + $0xb0] sm:$0xff] }
  0x22   : > { %843 = vmatpush.msra.mxu0 %v692_v23  ;;  %3769 = vmatpush.msra.mxu2 %v692_v23  ;;  %301 = vst [vmem:[#allocation2 + $0xb0] sm:$0xff] %v3815_v4  ;;  %v745_v15 = vld [vmem:[%s6678_s1 + $0x1c8] sm:$0xff]  ;;  %v728_v23 = vld [vmem:[%s6678_s1 + $0x140] sm:$0xff] }
  0x23   : > { %3785 = vmatpush.msra.mxu3 %v708_v24  ;;  %302 = vst [vmem:[#allocation2 + $0xb8] sm:$0x3] %v3815_v4  ;;  %956 = vmatpush.msra.mxu1 %v708_v24  ;;  %v744_v24 = vld [vmem:[%s6678_s1 + $0x1c0] sm:$0xff] }
  0x24   : > { %844 = vmatpush.msra.mxu0 %v691_v25  ;;  %3770 = vmatpush.msra.mxu2 %v691_v25  ;;  %303 = vst [vmem:[#allocation2 + $0xc0] sm:$0xff] %v3815_v4  ;;  %v761_v25 = vld [vmem:[%s6678_s1 + $0x248] sm:$0xff] }
  0x25   : > { %3786 = vmatpush.msra.mxu3 %v707_v26  ;;  %304 = vst [vmem:[#allocation2 + $0xc8] sm:$0xff] %v3815_v4  ;;  %957 = vmatpush.msra.mxu1 %v707_v26 }
  0x26   : > { %845 = vmatpush.msra.mxu0 %v690_v27  ;;  %3771 = vmatpush.msra.mxu2 %v690_v27  ;;  %305 = vst [vmem:[#allocation2 + $0xd0] sm:$0x3] %v3815_v4 }
  0x27   : > { %3787 = vmatpush.msra.mxu3 %v706_v28  ;;  %306 = vst [vmem:[#allocation2 + $0xd8] sm:$0xff] %v3815_v4  ;;  %958 = vmatpush.msra.mxu1 %v706_v28 }
  0x28   : > { %846 = vmatpush.msra.mxu0 %v689_v29  ;;  %3772 = vmatpush.msra.mxu2 %v689_v29  ;;  %307 = vst [vmem:[#allocation2 + $0xe0] sm:$0xff] %v3815_v4 }
  0x29   : > { %3788 = vmatpush.msra.mxu3 %v705_v30  ;;  %308 = vst [vmem:[#allocation2 + $0xe8] sm:$0x3] %v3815_v4  ;;  %959 = vmatpush.msra.mxu1 %v705_v30  ;;  %v340_v30 = vld [vmem:[%s4101_s23 + $0x38] sm:$0xff] }
  0x2a   : > { %847 = vmatpush.msra.mxu0 %v688_v31  ;;  %3773 = vmatpush.msra.mxu2 %v688_v31  ;;  %309 = vst [vmem:[#allocation2 + $0xf0] sm:$0xff] %v3815_v4  ;;  %v356_v31 = vld [vmem:[%s4101_s23 + $0xb8] sm:$0xff] }
  0x2b   : > { %3789 = vmatpush.msra.mxu3 %v704_v32  ;;  %848 = vmatmul.f32.vlgmr.msra.gmra.mxu0 %v3815_v4  ;;  %310 = vst [vmem:[#allocation2 + $0xf8] sm:$0xff] %v3815_v4 }
  0x2c   : > { %311 = vst [vmem:[#allocation2 + $0x100] sm:$0x3] %v3815_v4  ;;  %960 = vmatpush.msra.mxu1 %v704_v32  ;;  %1058 = vmatpush.msrb.mxu2 %v735_v33  ;;  %v727_v32 = vld [vmem:[%s6678_s1 + $0x138] sm:$0xff] }
  0x2d   : > { %312 = vst [vmem:[#allocation2 + $0x108] sm:$0xff] %v3815_v4  ;;  %1171 = vmatpush.msrb.mxu3 %v751_v34  ;;  %961 = vmatmul.f32.vlgmr.msra.gmra.mxu1 %v431_v36  ;;  %v743_v33 = vld [vmem:[%s6678_s1 + $0x1b8] sm:$0xff]  ;;  %v760_v34 = vld [vmem:[%s6678_s1 + $0x240] sm:$0xff] }
  0x2e   : > { %313 = vst [vmem:[#allocation2 + $0x110] sm:$0xff] %v3815_v4  ;;  %1059 = vmatpush.msrb.mxu2 %v734_v35  ;;  %1284 = vmatpush.msrb.mxu0 %v767_v38 }
  0x2f   : > { %314 = vst [vmem:[#allocation2 + $0x118] sm:$0x3] %v3815_v4  ;;  %1172 = vmatpush.msrb.mxu3 %v750_v37 }
  0x30   : > { %315 = vst [vmem:[#allocation2 + $0x120] sm:$0xff] %v3815_v4  ;;  %1060 = vmatpush.msrb.mxu2 %v733_v39  ;;  %1285 = vmatpush.msrb.mxu0 %v766_v42  ;;  %v341_v39 = vld [vmem:[%s4101_s23 + $0x40] sm:$0xff]  ;;  %v742_v42 = vld [vmem:[%s6678_s1 + $0x1b0] sm:$0xff] }
  0x31   : > { %316 = vst [vmem:[#allocation2 + $0x128] sm:$0xff] %v3815_v4  ;;  %1173 = vmatpush.msrb.mxu3 %v749_v41  ;;  %v726_v41 = vld [vmem:[%s6678_s1 + $0x130] sm:$0xff] }
  0x32   : > { %317 = vst [vmem:[#allocation2 + $0x130] sm:$0x3] %v3815_v4  ;;  %1061 = vmatpush.msrb.mxu2 %v732_v47  ;;  %1286 = vmatpush.msrb.mxu0 %v765_v49  ;;  %v358_v49 = vld [vmem:[%s4101_s23 + $0xc8] sm:$0xff] }
  0x33   : > { %318 = vst [vmem:[#allocation2 + $0x138] sm:$0xff] %v3815_v4  ;;  %851 = vmatmul.f32.gmra.mxu0 %v3815_v4  ;;  %1174 = vmatpush.msrb.mxu3 %v748_v48  ;;  %v342_v48 = vld [vmem:[%s4101_s23 + $0x48] sm:$0xff] }
  0x34   : > { %319 = vst [vmem:[#allocation2 + $0x140] sm:$0xff] %v3815_v4  ;;  %1062 = vmatpush.msrb.mxu2 %v731_v57  ;;  %1287 = vmatpush.msrb.mxu0 %v764_v61  ;;  %v343_v57 = vld [vmem:[%s4101_s23 + $0x50] sm:$0xff]  ;;  %v724_v61 = vld [vmem:[%s6678_s1 + $0x120] sm:$0xff] }
  0x35   : > { %320 = vst [vmem:[#allocation2 + $0x148] sm:$0x3] %v3815_v4  ;;  %964 = vmatmul.f32.gmra.mxu1 %v432_v40  ;;  %1175 = vmatpush.msrb.mxu3 %v747_v60  ;;  %v357_v40 = vld [vmem:[%s4101_s23 + $0xc0] sm:$0xff]  ;;  %v359_v60 = vld [vmem:[%s4101_s23 + $0xd0] sm:$0xff] }
  0x36   : > { %321 = vst [vmem:[#allocation2 + $0x150] sm:$0xff] %v3815_v4  ;;  %1063 = vmatpush.msrb.mxu2 %v730_v5  ;;  %1288 = vmatpush.msrb.mxu0 %v763_v7  ;;  %v360_v7 = vld [vmem:[%s4101_s23 + $0xd8] sm:$0xff] }
  0x37   : > { %322 = vst [vmem:[#allocation2 + $0x158] sm:$0xff] %v3815_v4  ;;  %1176 = vmatpush.msrb.mxu3 %v746_v6  ;;  %v344_v6 = vld [vmem:[%s4101_s23 + $0x58] sm:$0xff] }
  0x38   : > { %323 = vst [vmem:[#allocation2 + $0x160] sm:$0x3] %v3815_v4  ;;  %1064 = vmatpush.msrb.mxu2 %v729_v14  ;;  %1289 = vmatpush.msrb.mxu0 %v762_v16 }
  0x39   : > { %324 = vst [vmem:[#allocation2 + $0x168] sm:$0xff] %v3815_v4  ;;  %1177 = vmatpush.msrb.mxu3 %v745_v15 }
  0x3a   : > { %325 = vst [vmem:[#allocation2 + $0x170] sm:$0xff] %v3815_v4  ;;  %1065 = vmatpush.msrb.mxu2 %v728_v23  ;;  %1290 = vmatpush.msrb.mxu0 %v761_v25  ;;  %v755_v23 = vld [vmem:[%s6678_s1 + $0x218] sm:$0xff]  ;;  %v782_v25 = vld [vmem:[%s6678_s1 + $0x2f0] sm:$0xff] }
  0x3b   : > { %326 = vst [vmem:[#allocation2 + $0x178] sm:$0x3] %v3815_v4  ;;  %1178 = vmatpush.msrb.mxu3 %v744_v24  ;;  %v783_v24 = vld [vmem:[%s6678_s1 + $0x2f8] sm:$0xff] }
  0x3c   : > { %327 = vst [vmem:[#allocation2 + $0x180] sm:$0xff] %v3815_v4  ;;  %1066 = vmatpush.msrb.mxu2 %v727_v32  ;;  %1291 = vmatpush.msrb.mxu0 %v760_v34  ;;  %v346_v32 = vld [vmem:[%s4101_s23 + $0x68] sm:$0xff] }
  0x3d   : > { %328 = vst [vmem:[#allocation2 + $0x188] sm:$0xff] %v3815_v4  ;;  %1179 = vmatpush.msrb.mxu3 %v743_v33  ;;  %1397 = vmatpush.msrb.mxu1 %v783_v24  ;;  %v362_v33 = vld [vmem:[%s4101_s23 + $0xe8] sm:$0xff] }
  0x3e   : > { %329 = vst [vmem:[#allocation2 + $0x190] sm:$0x3] %v3815_v4  ;;  %1067 = vmatpush.msrb.mxu2 %v726_v41  ;;  %v721_v34 = vld [vmem:[%s6678_s1 + $0x108] sm:$0xff]  ;;  %v779_v41 = vld [vmem:[%s6678_s1 + $0x2d8] sm:$0xff] }
  0x3f   : > { %330 = vst [vmem:[#allocation2 + $0x198] sm:$0xff] %v3815_v4  ;;  %1180 = vmatpush.msrb.mxu3 %v742_v42  ;;  %1398 = vmatpush.msrb.mxu1 %v782_v25 }
  0x40   : > { %331 = vst [vmem:[#allocation2 + $0x1a0] sm:$0xff] %v3815_v4 }
  0x41   : > { %332 = vst [vmem:[#allocation2 + $0x1a8] sm:$0x3] %v3815_v4 }
  0x42   : > { %1953 = vst [vmem:[#allocation3] sm:$0xff] %v3815_v4 }
  0x43   : > { %1954 = vst [vmem:[#allocation3 + $0x8] sm:$0xff] %v3815_v4 }
  0x44   : > { %1955 = vst [vmem:[#allocation3 + $0x10] sm:$0x3] %v3815_v4 }
  0x45   : > { %1956 = vst [vmem:[#allocation3 + $0x18] sm:$0xff] %v3815_v4 }
  0x46   : > { %1957 = vst [vmem:[#allocation3 + $0x20] sm:$0xff] %v3815_v4 }
  0x47   : > { %1958 = vst [vmem:[#allocation3 + $0x28] sm:$0x3] %v3815_v4 }
  0x48   : > { %1959 = vst [vmem:[#allocation3 + $0x30] sm:$0xff] %v3815_v4 }
  0x49   : > { %1960 = vst [vmem:[#allocation3 + $0x38] sm:$0xff] %v3815_v4 }
  0x4a   : > { %1961 = vst [vmem:[#allocation3 + $0x40] sm:$0x3] %v3815_v4 }
  0x4b   : > { %1962 = vst [vmem:[#allocation3 + $0x48] sm:$0xff] %v3815_v4 }
  0x4c   : > { %1963 = vst [vmem:[#allocation3 + $0x50] sm:$0xff] %v3815_v4 }
  0x4d   : > { %1964 = vst [vmem:[#allocation3 + $0x58] sm:$0x3] %v3815_v4 }
  0x4e   : > { %1965 = vst [vmem:[#allocation3 + $0x60] sm:$0xff] %v3815_v4 }
  0x4f   : > { %1966 = vst [vmem:[#allocation3 + $0x68] sm:$0xff] %v3815_v4 }
  0x50   : > { %1967 = vst [vmem:[#allocation3 + $0x70] sm:$0x3] %v3815_v4 }
  0x51   : > { %1968 = vst [vmem:[#allocation3 + $0x78] sm:$0xff] %v3815_v4 }
  0x52   : > { %1969 = vst [vmem:[#allocation3 + $0x80] sm:$0xff] %v3815_v4 }
  0x53   : > { %1970 = vst [vmem:[#allocation3 + $0x88] sm:$0x3] %v3815_v4 }
  0x54   : > { %1971 = vst [vmem:[#allocation3 + $0x90] sm:$0xff] %v3815_v4 }
  0x55   : > { %1972 = vst [vmem:[#allocation3 + $0x98] sm:$0xff] %v3815_v4 }
  0x56   : > { %1973 = vst [vmem:[#allocation3 + $0xa0] sm:$0x3] %v3815_v4 }
  0x57   : > { %1974 = vst [vmem:[#allocation3 + $0xa8] sm:$0xff] %v3815_v4 }
  0x58   : > { %1975 = vst [vmem:[#allocation3 + $0xb0] sm:$0xff] %v3815_v4 }
  0x59   : > { %1976 = vst [vmem:[#allocation3 + $0xb8] sm:$0x3] %v3815_v4 }
  0x5a   : > { %1977 = vst [vmem:[#allocation3 + $0xc0] sm:$0xff] %v3815_v4 }
  0x5b   : > { %1978 = vst [vmem:[#allocation3 + $0xc8] sm:$0xff] %v3815_v4 }
  0x5c   : > { %1979 = vst [vmem:[#allocation3 + $0xd0] sm:$0x3] %v3815_v4 }
  0x5d   : > { %1980 = vst [vmem:[#allocation3 + $0xd8] sm:$0xff] %v3815_v4 }
  0x5e   : > { %1981 = vst [vmem:[#allocation3 + $0xe0] sm:$0xff] %v3815_v4 }
  0x5f   : > { %1982 = vst [vmem:[#allocation3 + $0xe8] sm:$0x3] %v3815_v4 }
  0x60   : > { %1983 = vst [vmem:[#allocation3 + $0xf0] sm:$0xff] %v3815_v4 }
  0x61   : > { %1984 = vst [vmem:[#allocation3 + $0xf8] sm:$0xff] %v3815_v4 }
  0x62   : > { %1985 = vst [vmem:[#allocation3 + $0x100] sm:$0x3] %v3815_v4 }
  0x63   : > { %1986 = vst [vmem:[#allocation3 + $0x108] sm:$0xff] %v3815_v4 }
  0x64   : > { %1987 = vst [vmem:[#allocation3 + $0x110] sm:$0xff] %v3815_v4 }
  0x65   : > { %1988 = vst [vmem:[#allocation3 + $0x118] sm:$0x3] %v3815_v4 }
  0x66   : > { %1989 = vst [vmem:[#allocation3 + $0x120] sm:$0xff] %v3815_v4 }
  0x67   : > { %1990 = vst [vmem:[#allocation3 + $0x128] sm:$0xff] %v3815_v4 }
  0x68   : > { %1991 = vst [vmem:[#allocation3 + $0x130] sm:$0x3] %v3815_v4 }
  0x69   : > { %1992 = vst [vmem:[#allocation3 + $0x138] sm:$0xff] %v3815_v4 }
  0x6a   : > { %1993 = vst [vmem:[#allocation3 + $0x140] sm:$0xff] %v3815_v4 }
  0x6b   : > { %1994 = vst [vmem:[#allocation3 + $0x148] sm:$0x3] %v3815_v4 }
  0x6c   : > { %1995 = vst [vmem:[#allocation3 + $0x150] sm:$0xff] %v3815_v4 }
  0x6d   : > { %1996 = vst [vmem:[#allocation3 + $0x158] sm:$0xff] %v3815_v4 }
  0x6e   : > { %1997 = vst [vmem:[#allocation3 + $0x160] sm:$0x3] %v3815_v4 }
  0x6f   : > { %1998 = vst [vmem:[#allocation3 + $0x168] sm:$0xff] %v3815_v4 }
  0x70   : > { %1999 = vst [vmem:[#allocation3 + $0x170] sm:$0xff] %v3815_v4 }
  0x71   : > { %2000 = vst [vmem:[#allocation3 + $0x178] sm:$0x3] %v3815_v4 }
  0x72   : > { %2001 = vst [vmem:[#allocation3 + $0x180] sm:$0xff] %v3815_v4 }
  0x73   : > { %2002 = vst [vmem:[#allocation3 + $0x188] sm:$0xff] %v3815_v4 }
  0x74   : > { %2003 = vst [vmem:[#allocation3 + $0x190] sm:$0x3] %v3815_v4 }
  0x75   : > { %2004 = vst [vmem:[#allocation3 + $0x198] sm:$0xff] %v3815_v4 }
  0x76   : > { %2005 = vst [vmem:[#allocation3 + $0x1a0] sm:$0xff] %v3815_v4 }
  0x77   : > { %2006 = vst [vmem:[#allocation3 + $0x1a8] sm:$0x3] %v3815_v4  ;;  %v353_v4 = vld [vmem:[%s4101_s23 + $0xa0] sm:$0xff] }
  0x78   : > { %381 = vst.msk [vmem:[#allocation2 + $0xc1] sm:$0xff] %vm366_vm0, %v347_v43  ;;  %v759_v43 = vld [vmem:[%s6678_s1 + $0x238] sm:$0xff] }
  0x79   : > { %382 = vst.msk [vmem:[#allocation2 + $0xc9] sm:$0xff] %vm366_vm0, %v348_v44  ;;  %1292 = vmatpush.msrb.mxu0 %v759_v43 }
  0x7a   : > { %367 = vst.msk [vmem:[#allocation2 + $0x19] sm:$0xff] %vm366_vm0, %v333_v45 }
  0x7b   : > { %383 = vst.msk [vmem:[#allocation2 + $0xd9] sm:$0xff] %vm366_vm0, %v349_v46 }
  0x7c   : > { %368 = vst.msk [vmem:[#allocation2 + $0x21] sm:$0xff] %vm366_vm0, %v334_v50  ;;  %v725_v50 = vld [vmem:[%s6678_s1 + $0x128] sm:$0xff] }
  0x7d   : > { %384 = vst.msk [vmem:[#allocation2 + $0xe1] sm:$0xff] %vm366_vm0, %v350_v51  ;;  %1068 = vmatpush.msrb.mxu2 %v725_v50  ;;  %v741_v51 = vld [vmem:[%s6678_s1 + $0x1a8] sm:$0xff] }
  0x7e   : > { %369 = vst.msk [vmem:[#allocation2 + $0x31] sm:$0xff] %vm366_vm0, %v335_v52  ;;  %v758_v52 = vld [vmem:[%s6678_s1 + $0x230] sm:$0xff]  ;;  %1181 = vmatpush.msrb.mxu3 %v741_v51  ;;  %v777_v50 = vld [vmem:[%s6678_s1 + $0x2c8] sm:$0xff]  ;;  %v736_v51 = vld [vmem:[%s6678_s1 + $0x180] sm:$0xff] }
  0x7f   : > { %v415_v54 = vld [vmem:[#allocation2 + $0xc0] sm:$0xff]  ;;  %385 = vst.msk [vmem:[#allocation2 + $0xf1] sm:$0xff] %vm366_vm0, %v351_v53  ;;  %1293 = vmatpush.msrb.mxu0 %v758_v52  ;;  %1069 = vmatpush.msrb.mxu2 %v724_v61  ;;  %v753_v52 = vld [vmem:[%s6678_s1 + $0x208] sm:$0xff] }
  0x80   : > { %v447_v55 = vld [vmem:[#allocation2 + $0xc1] sm:$0xff]  ;;  %896 = vmatmul.f32.vlgmr.msra.gmra.mxu2 %v415_v54  ;;  %370 = vst.msk [vmem:[#allocation2 + $0x39] sm:$0xff] %vm366_vm0, %v336_v56  ;;  %v448_v0 = vld [vmem:[#allocation2 + $0xc9] sm:$0xff] }
  0x81   : > { %1009 = vmatmul.f32.vlgmr.msra.gmra.mxu3 %v447_v55  ;;  %v4138_v58 = vld [vmem:[#allocation2 + $0x18] sm:$0xff]  ;;  %386 = vst.msk [vmem:[#allocation2 + $0xf9] sm:$0xff] %vm366_vm0, %v352_v62  ;;  %v416_v63 = vld [vmem:[#allocation2 + $0xc8] sm:$0xff]  ;;  %v740_v62 = vld [vmem:[%s6678_s1 + $0x1a0] sm:$0xff] }
  0x82   : > { %v4140_v59 = vld [vmem:[#allocation2 + $0x19] sm:$0xff]  ;;  %854 = vmatmul.f32.gmra.mxu0 %v4138_v58  ;;  %371 = vst.msk [vmem:[#allocation2 + $0x49] sm:$0xff] %vm366_vm0, %v337_v3  ;;  %1182 = vmatpush.msrb.mxu3 %v740_v62  ;;  %v774_v62 = vld [vmem:[%s6678_s1 + $0x2b0] sm:$0xff] }
  0x83   : > { %967 = vmatmul.f32.gmra.mxu1 %v4140_v59  ;;  %v4152_v1 = vld [vmem:[#allocation2 + $0x20] sm:$0xff]  ;;  %387 = vst.msk [vmem:[#allocation2 + $0x109] sm:$0xff] %vm366_vm0, %v353_v4  ;;  %v417_v8 = vld [vmem:[#allocation2 + $0xd8] sm:$0xff] }
  0x84   : > { %v4154_v2 = vld [vmem:[#allocation2 + $0x21] sm:$0xff]  ;;  %v449_v9 = vld [vmem:[#allocation2 + $0xd9] sm:$0xff]  ;;  %372 = vst.msk [vmem:[#allocation2 + $0x51] sm:$0xff] %vm366_vm0, %v338_v12 }
  0x85   : > { %v4171_v10 = vld [vmem:[#allocation2 + $0x30] sm:$0xff]  ;;  %388 = vst.msk [vmem:[#allocation2 + $0x111] sm:$0xff] %vm366_vm0, %v354_v13  ;;  %v418_v17 = vld [vmem:[#allocation2 + $0xe0] sm:$0xff] }
  0x86   : > { %v4173_v11 = vld [vmem:[#allocation2 + $0x31] sm:$0xff]  ;;  %v450_v18 = vld [vmem:[#allocation2 + $0xe1] sm:$0xff]  ;;  %373 = vst.msk [vmem:[#allocation2 + $0x61] sm:$0xff] %vm366_vm0, %v339_v21 }
  0x87   : > { %v4190_v19 = vld [vmem:[#allocation2 + $0x38] sm:$0xff]  ;;  %389 = vst.msk [vmem:[#allocation2 + $0x121] sm:$0xff] %vm366_vm0, %v355_v22  ;;  %v419_v26 = vld [vmem:[#allocation2 + $0xf0] sm:$0xff]  ;;  %v756_v12 = vld [vmem:[%s6678_s1 + $0x220] sm:$0xff] }
  0x88   : > { %899 = vmatmul.f32.gmra.mxu2 %v416_v63  ;;  %v4192_v20 = vld [vmem:[#allocation2 + $0x39] sm:$0xff]  ;;  %v451_v27 = vld [vmem:[#allocation2 + $0xf1] sm:$0xff]  ;;  %374 = vst.msk [vmem:[#allocation2 + $0x69] sm:$0xff] %vm366_vm0, %v340_v30  ;;  %v757_v63 = vld [vmem:[%s6678_s1 + $0x228] sm:$0xff] }
  0x89   : > { %1012 = vmatmul.f32.gmra.mxu3 %v448_v0  ;;  %v4209_v28 = vld [vmem:[#allocation2 + $0x48] sm:$0xff]  ;;  %390 = vst.msk [vmem:[#allocation2 + $0x129] sm:$0xff] %vm366_vm0, %v356_v31  ;;  %v420_v35 = vld [vmem:[#allocation2 + $0xf8] sm:$0xff]  ;;  %1294 = vmatpush.msrb.mxu0 %v757_v63  ;;  %v722_v21 = vld [vmem:[%s6678_s1 + $0x110] sm:$0xff] }
  0x8a   : > { %857 = vmatmul.f32.gmra.mxu0 %v4152_v1  ;;  %v4211_v29 = vld [vmem:[#allocation2 + $0x49] sm:$0xff]  ;;  %v452_v36 = vld [vmem:[#allocation2 + $0xf9] sm:$0xff]  ;;  %375 = vst.msk [vmem:[#allocation2 + $0x79] sm:$0xff] %vm366_vm0, %v341_v39 }
  0x8b   : > { %970 = vmatmul.f32.gmra.mxu1 %v4154_v2  ;;  %v4228_v37 = vld [vmem:[#allocation2 + $0x50] sm:$0xff]  ;;  %391 = vst.msk [vmem:[#allocation2 + $0x139] sm:$0xff] %vm366_vm0, %v357_v40  ;;  %v421_v44 = vld [vmem:[#allocation2 + $0x108] sm:$0xff]  ;;  %1295 = vmatpush.msrb.mxu0 %v756_v12  ;;  %v780_v40 = vld [vmem:[%s6678_s1 + $0x2e0] sm:$0xff] }
  0x8c   : > { %v4230_v38 = vld [vmem:[#allocation2 + $0x51] sm:$0xff]  ;;  %v453_v45 = vld [vmem:[#allocation2 + $0x109] sm:$0xff]  ;;  %376 = vst.msk [vmem:[#allocation2 + $0x81] sm:$0xff] %vm366_vm0, %v342_v48 }
  0x8d   : > { %v4247_v46 = vld [vmem:[#allocation2 + $0x60] sm:$0xff]  ;;  %392 = vst.msk [vmem:[#allocation2 + $0x141] sm:$0xff] %vm366_vm0, %v358_v49  ;;  %v422_v53 = vld [vmem:[#allocation2 + $0x110] sm:$0xff]  ;;  %1296 = vmatpush.msrb.mxu0 %v755_v23 }
  0x8e   : > { %v4249_v47 = vld [vmem:[#allocation2 + $0x61] sm:$0xff]  ;;  %v454_v54 = vld [vmem:[#allocation2 + $0x111] sm:$0xff]  ;;  %377 = vst.msk [vmem:[#allocation2 + $0x91] sm:$0xff] %vm366_vm0, %v343_v57 }
  0x8f   : > { %v4266_v55 = vld [vmem:[#allocation2 + $0x68] sm:$0xff]  ;;  %393 = vst.msk [vmem:[#allocation2 + $0x151] sm:$0xff] %vm366_vm0, %v359_v60  ;;  %v423_v0 = vld [vmem:[#allocation2 + $0x120] sm:$0xff]  ;;  %v738_v22 = vld [vmem:[%s6678_s1 + $0x190] sm:$0xff] }
  0x90   : > { %902 = vmatmul.f32.gmra.mxu2 %v417_v8  ;;  %v4268_v56 = vld [vmem:[#allocation2 + $0x69] sm:$0xff]  ;;  %v455_v3 = vld [vmem:[#allocation2 + $0x121] sm:$0xff]  ;;  %v723_v8 = vld [vmem:[%s6678_s1 + $0x118] sm:$0xff]  ;;  %378 = vst.msk [vmem:[#allocation2 + $0x99] sm:$0xff] %vm366_vm0, %v344_v6 }
  0x91   : > { %1015 = vmatmul.f32.gmra.mxu3 %v449_v9  ;;  %v4285_v4 = vld [vmem:[#allocation2 + $0x78] sm:$0xff]  ;;  %1070 = vmatpush.msrb.mxu2 %v723_v8  ;;  %394 = vst.msk [vmem:[#allocation2 + $0x159] sm:$0xff] %vm366_vm0, %v360_v7  ;;  %v424_v13 = vld [vmem:[#allocation2 + $0x128] sm:$0xff]  ;;  %v754_v39 = vld [vmem:[%s6678_s1 + $0x210] sm:$0xff] }
  0x92   : > { %860 = vmatmul.f32.gmra.mxu0 %v4171_v10  ;;  %v4287_v5 = vld [vmem:[#allocation2 + $0x79] sm:$0xff]  ;;  %v456_v14 = vld [vmem:[#allocation2 + $0x129] sm:$0xff]  ;;  %380 = vst.msk [vmem:[#allocation2 + $0xb1] sm:$0xff] %vm366_vm0, %v346_v32 }
  0x93   : > { %973 = vmatmul.f32.gmra.mxu1 %v4173_v11  ;;  %v739_v9 = vld [vmem:[%s6678_s1 + $0x198] sm:$0xff]  ;;  %v4304_v15 = vld [vmem:[#allocation2 + $0x80] sm:$0xff]  ;;  %1071 = vmatpush.msrb.mxu2 %v722_v21  ;;  %396 = vst.msk [vmem:[#allocation2 + $0x171] sm:$0xff] %vm366_vm0, %v362_v33  ;;  %v773_v6 = vld [vmem:[%s6678_s1 + $0x2a8] sm:$0xff] }
  0x94   : > { %1183 = vmatpush.msrb.mxu3 %v739_v9  ;;  %v4306_v16 = vld [vmem:[#allocation2 + $0x81] sm:$0xff]  ;;  %1297 = vmatpush.msrb.mxu0 %v754_v39  ;;  %v775_v57 = vld [vmem:[%s6678_s1 + $0x2b8] sm:$0xff]  ;;  %v798_v33 = vld [vmem:[%s6678_s1 + $0x370] sm:$0xff] }
  0x95   : > { %v4329_v30 = vld [vmem:[#allocation2 + $0x90] sm:$0xff]  ;;  %1072 = vmatpush.msrb.mxu2 %v721_v34  ;;  %v426_v42 = vld [vmem:[#allocation2 + $0x140] sm:$0xff]  ;;  %v815_v7 = vld [vmem:[%s6678_s1 + $0x3f8] sm:$0xff] }
  0x96   : > { %1184 = vmatpush.msrb.mxu3 %v738_v22  ;;  %v4331_v31 = vld [vmem:[#allocation2 + $0x91] sm:$0xff]  ;;  %v458_v43 = vld [vmem:[#allocation2 + $0x141] sm:$0xff]  ;;  %1298 = vmatpush.msrb.mxu0 %v753_v52 }
  0x97   : > { %v4362_v48 = vld [vmem:[#allocation2 + $0x99] sm:$0xff]  ;;  %v427_v60 = vld [vmem:[#allocation2 + $0x150] sm:$0xff]  ;;  %v769_v21 = vld [vmem:[%s6678_s1 + $0x288] sm:$0xff] }
  0x98   : > { %905 = vmatmul.f32.gmra.mxu2 %v418_v17  ;;  %v345_v17 = vld [vmem:[%s4101_s23 + $0x60] sm:$0xff]  ;;  %v459_v61 = vld [vmem:[#allocation2 + $0x151] sm:$0xff] }
  0x99   : > { %1018 = vmatmul.f32.gmra.mxu3 %v450_v18  ;;  %v361_v18 = vld [vmem:[%s4101_s23 + $0xe0] sm:$0xff]  ;;  %379 = vst.msk [vmem:[#allocation2 + $0xa9] sm:$0xff] %vm366_vm0, %v345_v17  ;;  %v771_v9 = vld [vmem:[%s6678_s1 + $0x298] sm:$0xff]  ;;  %v814_v34 = vld [vmem:[%s6678_s1 + $0x3f0] sm:$0xff] }
  0x9a   : > { %863 = vmatmul.f32.gmra.mxu0 %v4190_v19  ;;  %395 = vst.msk [vmem:[#allocation2 + $0x169] sm:$0xff] %vm366_vm0, %v361_v18  ;;  %v720_v49 = vld [vmem:[%s6678_s1 + $0x100] sm:$0xff]  ;;  %v428_v12 = vld [vmem:[#allocation2 + $0x158] sm:$0xff] }
  0x9b   : > { %976 = vmatmul.f32.gmra.mxu1 %v4192_v20  ;;  %1073 = vmatpush.msrb.mxu2 %v720_v49  ;;  %v772_v8 = vld [vmem:[%s6678_s1 + $0x2a0] sm:$0xff]  ;;  %v4416_v18 = vld [vmem:[#allocation2 + $0xb1] sm:$0xff] }
  0x9c   : > { %v831_v22 = vld [vmem:[%s6678_s1 + $0x478] sm:$0xff]  ;;  %v768_v23 = vld [vmem:[%s6678_s1 + $0x280] sm:$0xff] }
  0x9d   : > { %v559_v32 = vld [vmem:[#allocation2 + $0x1a] sm:$0xff]  ;;  %v561_v49 = vld [vmem:[#allocation2 + $0x32] sm:$0xff] }
  0xa0   : > { %908 = vmatmul.f32.gmra.mxu2 %v419_v26  ;;  %v425_v26 = vld [vmem:[#allocation2 + $0x138] sm:$0xff]  ;;  %v4390_v63 = vld [vmem:[#allocation2 + $0xa8] sm:$0xff]  ;;  %v4414_v17 = vld [vmem:[#allocation2 + $0xb0] sm:$0xff] }
  0xa1   : > { %1021 = vmatmul.f32.gmra.mxu3 %v451_v27  ;;  %v457_v27 = vld [vmem:[#allocation2 + $0x139] sm:$0xff] }
  0xa2   : > { %866 = vmatmul.f32.gmra.mxu0 %v4209_v28 }
  0xa3   : > { %979 = vmatmul.f32.gmra.mxu1 %v4211_v29 }
  0xa8   : > { %911 = vmatmul.f32.gmra.mxu2 %v420_v35  ;;  %v781_v35 = vld [vmem:[%s6678_s1 + $0x2e8] sm:$0xff]  ;;  %v4429_v24 = vpop.f32.mrf.mxu0 }
  0xa9   : > { %1024 = vmatmul.f32.gmra.mxu3 %v452_v36  ;;  %v737_v36 = vld [vmem:[%s6678_s1 + $0x188] sm:$0xff]  ;;  %1399 = vmatpush.msrb.mxu1 %v781_v35  ;;  %v430_v35 = vld [vmem:[#allocation2 + $0x170] sm:$0xff] }
  0xaa   : > { %869 = vmatmul.f32.gmra.mxu0 %v4228_v37  ;;  %1185 = vmatpush.msrb.mxu3 %v737_v36  ;;  %v4431_v25 = vpop.f32.mrf.mxu1  ;;  %v462_v36 = vld [vmem:[#allocation2 + $0x171] sm:$0xff] }
  0xab   : > { %982 = vmatmul.f32.gmra.mxu1 %v4230_v38 }
  0xac   : > { %1400 = vmatpush.msrb.mxu1 %v780_v40  ;;  %1186 = vmatpush.msrb.mxu3 %v736_v51  ;;  %v813_v51 = vld [vmem:[%s6678_s1 + $0x3e8] sm:$0xff] }
  0xae   : > { %1401 = vmatpush.msrb.mxu1 %v779_v41  ;;  %1623 = vmatpush.msra.mxu3 %v815_v7  ;;  %v560_v41 = vld [vmem:[#allocation2 + $0x22] sm:$0xff] }
  0xb0   : > { %914 = vmatmul.f32.gmra.mxu2 %v421_v44  ;;  %v778_v44 = vld [vmem:[%s6678_s1 + $0x2d0] sm:$0xff]  ;;  %1624 = vmatpush.msra.mxu3 %v814_v34  ;;  %v4440_v39 = vpop.f32.mrf.mxu0 }
  0xb1   : > { %1027 = vmatmul.f32.gmra.mxu3 %v453_v45  ;;  %v4360_v45 = vld [vmem:[#allocation2 + $0x98] sm:$0xff]  ;;  %1402 = vmatpush.msrb.mxu1 %v778_v44 }
  0xb2   : > { %872 = vmatmul.f32.gmra.mxu0 %v4247_v46  ;;  %v4442_v40 = vpop.f32.mrf.mxu1  ;;  %1625 = vmatpush.msra.mxu3 %v813_v51 }
  0xb3   : > { %985 = vmatmul.f32.gmra.mxu1 %v4249_v47 }
  0xb4   : > { %1403 = vmatpush.msrb.mxu1 %v777_v50  ;;  %v797_v50 = vld [vmem:[%s6678_s1 + $0x368] sm:$0xff] }
  0xb8   : > { %917 = vmatmul.f32.gmra.mxu2 %v422_v53  ;;  %v776_v53 = vld [vmem:[%s6678_s1 + $0x2c0] sm:$0xff] }
  0xb9   : > { %1030 = vmatmul.f32.gmra.mxu3 %v454_v54  ;;  %v752_v54 = vld [vmem:[%s6678_s1 + $0x200] sm:$0xff]  ;;  %1404 = vmatpush.msrb.mxu1 %v776_v53 }
  0xba   : > { %875 = vmatmul.f32.gmra.mxu0 %v4266_v55 }
  0xbb   : > { %988 = vmatmul.f32.gmra.mxu1 %v4268_v56  ;;  %1299 = vmatpush.msrb.mxu0 %v752_v54  ;;  %v464_v54 = vld [vmem:[#allocation2 + $0xa] sm:$0xff] }
  0xbc   : > { %1405 = vmatpush.msrb.mxu1 %v775_v57 }
  0xbd   : > { %1736 = vmatpush.msra.mxu0 %v831_v22  ;;  %v828_v22 = vld [vmem:[%s6678_s1 + $0x460] sm:$0xff] }
  0xbe   : > { %1406 = vmatpush.msrb.mxu1 %v774_v62 }
  0xc0   : > { %920 = vmatmul.f32.gmra.mxu2 %v423_v0  ;;  %v4392_v0 = vld [vmem:[#allocation2 + $0xa9] sm:$0xff]  ;;  %1407 = vmatpush.msrb.mxu1 %v773_v6 }
  0xc1   : > { %1033 = vmatmul.f32.gmra.mxu3 %v455_v3  ;;  %v799_v3 = vld [vmem:[%s6678_s1 + $0x378] sm:$0xff] }
  0xc2   : > { %878 = vmatmul.f32.gmra.mxu0 %v4285_v4  ;;  %1510 = vmatpush.msra.mxu2 %v799_v3 }
  0xc3   : > { %991 = vmatmul.f32.gmra.mxu1 %v4287_v5 }
  0xc4   : > { %1408 = vmatpush.msrb.mxu1 %v772_v8  ;;  %1511 = vmatpush.msra.mxu2 %v798_v33  ;;  %v563_v8 = vld [vmem:[#allocation2 + $0x4a] sm:$0xff]  ;;  %v565_v33 = vld [vmem:[#allocation2 + $0x62] sm:$0xff] }
  0xc6   : > { %1409 = vmatpush.msrb.mxu1 %v771_v9  ;;  %1512 = vmatpush.msra.mxu2 %v797_v50 }
  0xc8   : > { %923 = vmatmul.f32.gmra.mxu2 %v424_v13  ;;  %v460_v13 = vld [vmem:[#allocation2 + $0x159] sm:$0xff] }
  0xc9   : > { %1036 = vmatmul.f32.gmra.mxu3 %v456_v14  ;;  %v770_v14 = vld [vmem:[%s6678_s1 + $0x290] sm:$0xff] }
  0xca   : > { %881 = vmatmul.f32.gmra.mxu0 %v4304_v15  ;;  %1410 = vmatpush.msrb.mxu1 %v770_v14 }
  0xcb   : > { %994 = vmatmul.f32.gmra.mxu1 %v4306_v16 }
  0xcc   : > { %1411 = vmatpush.msrb.mxu1 %v769_v21  ;;  %v564_v21 = vld [vmem:[#allocation2 + $0x52] sm:$0xff] }
  0xce   : > { %1412 = vmatpush.msrb.mxu1 %v768_v23 }
  0xd0   : > { %926 = vmatmul.f32.gmra.mxu2 %v425_v26  ;;  %v429_v26 = vld [vmem:[#allocation2 + $0x168] sm:$0xff] }
  0xd1   : > { %1039 = vmatmul.f32.gmra.mxu3 %v457_v27  ;;  %v461_v27 = vld [vmem:[#allocation2 + $0x169] sm:$0xff] }
  0xd2   : > { %884 = vmatmul.f32.gmra.mxu0 %v4329_v30 }
  0xd3   : > { %997 = vmatmul.f32.gmra.mxu1 %v4331_v31 }
  0xd8   : > { %929 = vmatmul.f32.gmra.mxu2 %v426_v42  ;;  %v830_v42 = vld [vmem:[%s6678_s1 + $0x470] sm:$0xff] }
  0xd9   : > { %1042 = vmatmul.f32.gmra.mxu3 %v458_v43  ;;  %1737 = vmatpush.msra.mxu0 %v830_v42  ;;  %v463_v43 = vld [vmem:[#allocation2 + $0x2] sm:$0xff]  ;;  %v566_v42 = vld [vmem:[#allocation2 + $0x6a] sm:$0xff] }
  0xda   : > { %887 = vmatmul.f32.gmra.mxu0 %v4360_v45 }
  0xdb   : > { %1000 = vmatmul.f32.gmra.mxu1 %v4362_v48 }
  0xe0   : > { %932 = vmatmul.f32.gmra.mxu2 %v427_v60  ;;  %v562_v60 = vld [vmem:[#allocation2 + $0x3a] sm:$0xff] }
  0xe1   : > { %1045 = vmatmul.f32.gmra.mxu3 %v459_v61  ;;  %v829_v61 = vld [vmem:[%s6678_s1 + $0x468] sm:$0xff] }
  0xe2   : > { %890 = vmatmul.f32.gmra.mxu0 %v4390_v63 }
  0xe3   : > { %1003 = vmatmul.f32.gmra.mxu1 %v4392_v0  ;;  %1738 = vmatpush.msra.mxu0 %v829_v61 }
  0xe5   : > { %1739 = vmatpush.msra.mxu0 %v828_v22  ;;  %v569_v22 = vld [vmem:[#allocation2 + $0x92] sm:$0xff] }
  0xe8   : > { %935 = vmatmul.f32.gmra.mxu2 %v428_v12 }
  0xe9   : > { %1048 = vmatmul.f32.gmra.mxu3 %v460_v13 }
  0xea   : > { %893 = vmatmul.f32.gmra.mxu0 %v4414_v17 }
  0xeb   : > { %1006 = vmatmul.f32.gmra.mxu1 %v4416_v18 }
  0xf0   : > { %938 = vmatmul.f32.gmra.mxu2 %v429_v26 }
  0xf1   : > { %1051 = vmatmul.f32.gmra.mxu3 %v461_v27 }
  0xf2   : > { %1300 = vmatmul.f32.vlgmr.msrb.gmra.mxu0 %v4140_v59 }
  0xf3   : > { %1413 = vmatmul.f32.vlgmr.msrb.gmra.mxu1 %v559_v32 }
  0xf8   : > { %941 = vmatmul.f32.gmra.mxu2 %v430_v35 }
  0xf9   : > { %1054 = vmatmul.f32.gmra.mxu3 %v462_v36 }
  0xfa   : > { %1303 = vmatmul.f32.gmra.mxu0 %v4154_v2 }
  0xfb   : > { %1416 = vmatmul.f32.gmra.mxu1 %v560_v41 }
  0xff   : > { %v4448_v59 = vpop.f32.mrf.mxu0 }
 0x100   : > { %v4450_v44 = vpop.f32.mrf.mxu1  ;;  %1074 = vmatmul.f32.vlgmr.msrb.gmra.mxu2 %v463_v43  ;;  %v827_v43 = vld [vmem:[%s6678_s1 + $0x458] sm:$0xff] }
 0x101   : > { %1187 = vmatmul.f32.vlgmr.msrb.gmra.mxu3 %v4138_v58  ;;  %1740 = vmatpush.msra.mxu0 %v827_v43 }
 0x102   : > { %1306 = vmatmul.f32.gmra.mxu0 %v4173_v11 }
 0x103   : > { %1419 = vmatmul.f32.gmra.mxu1 %v561_v49  ;;  %v897_v2 = vpop.f32.mrf.mxu2 }
 0x104   : > { %v1010_v52 = vpop.f32.mrf.mxu3 }
 0x105   : > { %v4460_v53 = vadd.f32 %v1010_v52, %v897_v2  ;;  %v567_v52 = vld [vmem:[#allocation2 + $0x7a] sm:$0xff] }
 0x107   : > { %v4462_v57 = vpop.f32.mrf.mxu0 }
 0x108   : > { %v4464_v58 = vpop.f32.mrf.mxu1  ;;  %1077 = vmatmul.f32.gmra.mxu2 %v464_v54 }
 0x109   : > { %1190 = vmatmul.f32.gmra.mxu3 %v4152_v1  ;;  %v796_v1 = vld [vmem:[%s6678_s1 + $0x360] sm:$0xff] }
 0x10a   : > { %1309 = vmatmul.f32.gmra.mxu0 %v4192_v20  ;;  %v812_v20 = vld [vmem:[%s6678_s1 + $0x3e0] sm:$0xff]  ;;  %1513 = vmatpush.msra.mxu2 %v796_v1 }
 0x10b   : > { %1422 = vmatmul.f32.gmra.mxu1 %v562_v60  ;;  %v900_v11 = vpop.f32.mrf.mxu2  ;;  %1626 = vmatpush.msra.mxu3 %v812_v20 }
 0x10c   : > { %v1013_v62 = vpop.f32.mrf.mxu3 }
 0x10d   : > { %v4471_v3 = vadd.f32 %v1013_v62, %v900_v11  ;;  %v568_v62 = vld [vmem:[#allocation2 + $0x82] sm:$0xff] }
 0x10f   : > { %v4473_v6 = vpop.f32.mrf.mxu0 }
 0x110   : > { %v4475_v7 = vpop.f32.mrf.mxu1  ;;  %1080 = vmatmul.f32.gmra.mxu2 %v559_v32 }
 0x111   : > { %1193 = vmatmul.f32.gmra.mxu3 %v4171_v10 }
 0x112   : > { %1312 = vmatmul.f32.gmra.mxu0 %v4211_v29 }
 0x113   : > { %1425 = vmatmul.f32.gmra.mxu1 %v563_v8  ;;  %v903_v9 = vpop.f32.mrf.mxu2 }
 0x114   : > { %v1016_v12 = vpop.f32.mrf.mxu3 }
 0x115   : > { %v4485_v13 = vadd.f32 %v1016_v12, %v903_v9 }
 0x117   : > { %v4487_v14 = vpop.f32.mrf.mxu0 }
 0x118   : > { %v4489_v10 = vpop.f32.mrf.mxu1  ;;  %1083 = vmatmul.f32.gmra.mxu2 %v560_v41 }
 0x119   : > { %1196 = vmatmul.f32.gmra.mxu3 %v4190_v19  ;;  %v795_v19 = vld [vmem:[%s6678_s1 + $0x358] sm:$0xff] }
 0x11a   : > { %1315 = vmatmul.f32.gmra.mxu0 %v4230_v38  ;;  %v811_v38 = vld [vmem:[%s6678_s1 + $0x3d8] sm:$0xff]  ;;  %1514 = vmatpush.msra.mxu2 %v795_v19 }
 0x11b   : > { %1428 = vmatmul.f32.gmra.mxu1 %v564_v21  ;;  %v906_v29 = vpop.f32.mrf.mxu2  ;;  %1627 = vmatpush.msra.mxu3 %v811_v38  ;;  %v825_v38 = vld [vmem:[%s6678_s1 + $0x448] sm:$0xff] }
 0x11c   : > { %v1019_v23 = vpop.f32.mrf.mxu3 }
 0x11d   : > { %v4496_v26 = vadd.f32 %v1019_v23, %v906_v29 }
 0x11f   : > { %v4498_v27 = vpop.f32.mrf.mxu0 }
 0x120   : > { %v4500_v32 = vpop.f32.mrf.mxu1  ;;  %1086 = vmatmul.f32.gmra.mxu2 %v561_v49 }
 0x121   : > { %1199 = vmatmul.f32.gmra.mxu3 %v4209_v28 }
 0x122   : > { %1318 = vmatmul.f32.gmra.mxu0 %v4249_v47 }
 0x123   : > { %1431 = vmatmul.f32.gmra.mxu1 %v565_v33  ;;  %v909_v34 = vpop.f32.mrf.mxu2 }
 0x124   : > { %v1022_v35 = vpop.f32.mrf.mxu3 }
 0x125   : > { %v4510_v36 = vadd.f32 %v1022_v35, %v909_v34 }
 0x127   : > { %v4512_v41 = vpop.f32.mrf.mxu0 }
 0x128   : > { %v4514_v28 = vpop.f32.mrf.mxu1  ;;  %1089 = vmatmul.f32.gmra.mxu2 %v562_v60 }
 0x129   : > { %1202 = vmatmul.f32.gmra.mxu3 %v4228_v37  ;;  %v794_v37 = vld [vmem:[%s6678_s1 + $0x350] sm:$0xff] }
 0x12a   : > { %1321 = vmatmul.f32.gmra.mxu0 %v4268_v56  ;;  %v810_v56 = vld [vmem:[%s6678_s1 + $0x3d0] sm:$0xff]  ;;  %1515 = vmatpush.msra.mxu2 %v794_v37 }
 0x12b   : > { %1434 = vmatmul.f32.gmra.mxu1 %v566_v42  ;;  %v912_v47 = vpop.f32.mrf.mxu2  ;;  %1628 = vmatpush.msra.mxu3 %v810_v56  ;;  %v4589_v56 = vld [vmem:[#allocation2 + $0xb2] sm:$0xff] }
 0x12c   : > { %v1025_v49 = vpop.f32.mrf.mxu3 }
 0x12d   : > { %v4521_v50 = vadd.f32 %v1025_v49, %v912_v47  ;;  %v571_v47 = vld [vmem:[#allocation2 + $0xaa] sm:$0xff] }
 0x12f   : > { %v4523_v51 = vpop.f32.mrf.mxu0 }
 0x130   : > { %v4525_v2 = vpop.f32.mrf.mxu1  ;;  %1092 = vmatmul.f32.gmra.mxu2 %v563_v8  ;;  %v826_v8 = vld [vmem:[%s6678_s1 + $0x450] sm:$0xff] }
 0x131   : > { %1205 = vmatmul.f32.gmra.mxu3 %v4247_v46  ;;  %1741 = vmatpush.msra.mxu0 %v826_v8 }
 0x132   : > { %1324 = vmatmul.f32.gmra.mxu0 %v4287_v5 }
 0x133   : > { %1437 = vmatmul.f32.gmra.mxu1 %v567_v52  ;;  %v915_v54 = vpop.f32.mrf.mxu2  ;;  %1742 = vmatpush.msra.mxu0 %v825_v38  ;;  %v542_v38 = vld [vmem:[#allocation2 + $0xc9] sm:$0xff] }
 0x134   : > { %v1028_v60 = vpop.f32.mrf.mxu3 }
 0x135   : > { %v4535_v61 = vadd.f32 %v1028_v60, %v915_v54  ;;  %v824_v54 = vld [vmem:[%s6678_s1 + $0x440] sm:$0xff] }
 0x136   : > { %1743 = vmatpush.msra.mxu0 %v824_v54 }
 0x137   : > { %v4537_v11 = vpop.f32.mrf.mxu0 }
 0x138   : > { %v4539_v46 = vpop.f32.mrf.mxu1  ;;  %1095 = vmatmul.f32.gmra.mxu2 %v564_v21 }
 0x139   : > { %1208 = vmatmul.f32.gmra.mxu3 %v4266_v55  ;;  %v793_v55 = vld [vmem:[%s6678_s1 + $0x348] sm:$0xff] }
 0x13a   : > { %1327 = vmatmul.f32.gmra.mxu0 %v4306_v16  ;;  %v809_v16 = vld [vmem:[%s6678_s1 + $0x3c8] sm:$0xff]  ;;  %1516 = vmatpush.msra.mxu2 %v793_v55 }
 0x13b   : > { %1440 = vmatmul.f32.gmra.mxu1 %v568_v62  ;;  %v918_v5 = vpop.f32.mrf.mxu2  ;;  %1629 = vmatpush.msra.mxu3 %v809_v16  ;;  %v4603_v55 = vld [vmem:[#allocation2 + $0xc2] sm:$0xff] }
 0x13c   : > { %v1031_v1 = vpop.f32.mrf.mxu3 }
 0x13d   : > { %v4546_v20 = vadd.f32 %v1031_v1, %v918_v5 }
 0x13f   : > { %v4548_v9 = vpop.f32.mrf.mxu0 }
 0x140   : > { %v4550_v12 = vpop.f32.mrf.mxu1  ;;  %1098 = vmatmul.f32.gmra.mxu2 %v565_v33 }
 0x141   : > { %1211 = vmatmul.f32.gmra.mxu3 %v4285_v4  ;;  %v570_v4 = vld [vmem:[#allocation2 + $0x9a] sm:$0xff] }
 0x142   : > { %1330 = vmatmul.f32.gmra.mxu0 %v4331_v31 }
 0x143   : > { %1443 = vmatmul.f32.gmra.mxu1 %v569_v22  ;;  %v921_v21 = vpop.f32.mrf.mxu2 }
 0x144   : > { %v1034_v29 = vpop.f32.mrf.mxu3 }
 0x145   : > { %v4560_v23 = vadd.f32 %v1034_v29, %v921_v21 }
 0x147   : > { %v4562_v33 = vpop.f32.mrf.mxu0 }
 0x148   : > { %1101 = vmatmul.f32.gmra.mxu2 %v566_v42  ;;  %v4565_v19 = vpop.f32.mrf.mxu1  ;;  %v808_v42 = vld [vmem:[%s6678_s1 + $0x3c0] sm:$0xff] }
 0x149   : > { %1214 = vmatmul.f32.gmra.mxu3 %v4304_v15  ;;  %v792_v15 = vld [vmem:[%s6678_s1 + $0x340] sm:$0xff] }
 0x14a   : > { %1333 = vmatmul.f32.gmra.mxu0 %v4362_v48  ;;  %1517 = vmatpush.msra.mxu2 %v792_v15  ;;  %v823_v15 = vld [vmem:[%s6678_s1 + $0x438] sm:$0xff] }
 0x14b   : > { %1446 = vmatmul.f32.gmra.mxu1 %v570_v4  ;;  %v924_v31 = vpop.f32.mrf.mxu2  ;;  %1630 = vmatpush.msra.mxu3 %v808_v42 }
 0x14c   : > { %v1037_v34 = vpop.f32.mrf.mxu3  ;;  %1744 = vmatpush.msra.mxu0 %v823_v15  ;;  %v4644_v15 = vld [vmem:[#allocation2 + $0xe2] sm:$0xff] }
 0x14d   : > { %v4571_v35 = vadd.f32 %v1037_v34, %v924_v31  ;;  %v4619_v31 = vld [vmem:[#allocation2 + $0xca] sm:$0xff]  ;;  %v2344_v34 = vld [vmem:[%s6681_s4 + $0x78] sm:$0xff] }
 0x14e   : > { %6719 = vst [vmem:[#allocation7_spill] sm:$0xff] %v4619_v31  ;;  %2473 = vmatpush.msra.mxu1 %v2344_v34  ;;  %v544_v34 = vld [vmem:[#allocation2 + $0xe1] sm:$0xff] }
 0x14f   : > { %v4573_v43 = vpop.f32.mrf.mxu0 }
 0x150   : > { %1104 = vmatmul.f32.gmra.mxu2 %v567_v52  ;;  %v4583_v48 = vpop.f32.mrf.mxu1 }
 0x151   : > { %1217 = vmatmul.f32.gmra.mxu3 %v4329_v30 }
 0x152   : > { %1336 = vmatmul.f32.gmra.mxu0 %v4392_v0 }
 0x153   : > { %1449 = vmatmul.f32.gmra.mxu1 %v571_v47  ;;  %v927_v49 = vpop.f32.mrf.mxu2 }
 0x154   : > { %v1040_v37 = vpop.f32.mrf.mxu3 }
 0x155   : > { %v4585_v52 = vadd.f32 %v1040_v37, %v927_v49 }
 0x157   : > { %6716 = vst [vmem:[#allocation4_spill] sm:$0xff] %v4585_v52  ;;  %v4587_v30 = vpop.f32.mrf.mxu0  ;;  %v4672_v52 = vld [vmem:[#allocation2 + $0xfa] sm:$0xff] }
 0x158   : > { %1107 = vmatmul.f32.gmra.mxu2 %v568_v62  ;;  %v4599_v5 = vpop.f32.mrf.mxu1  ;;  %v541_v62 = vld [vmem:[#allocation2 + $0xc1] sm:$0xff] }
 0x159   : > { %1220 = vmatmul.f32.gmra.mxu3 %v4360_v45  ;;  %v791_v45 = vld [vmem:[%s6678_s1 + $0x338] sm:$0xff] }
 0x15a   : > { %1339 = vmatmul.f32.gmra.mxu0 %v4416_v18  ;;  %v807_v18 = vld [vmem:[%s6678_s1 + $0x3b8] sm:$0xff]  ;;  %1518 = vmatpush.msra.mxu2 %v791_v45  ;;  %v806_v45 = vld [vmem:[%s6678_s1 + $0x3b0] sm:$0xff] }
 0x15b   : > { %1452 = vmatmul.f32.gmra.mxu1 %v4589_v56  ;;  %v930_v0 = vpop.f32.mrf.mxu2  ;;  %1631 = vmatpush.msra.mxu3 %v807_v18 }
 0x15c   : > { %v1043_v60 = vpop.f32.mrf.mxu3 }
 0x15d   : > { %v4597_v8 = vadd.f32 %v1043_v60, %v930_v0  ;;  %v4631_v0 = vld [vmem:[#allocation2 + $0xda] sm:$0xff]  ;;  %1632 = vmatpush.msra.mxu3 %v806_v45 }
 0x15f   : > { %6717 = vst [vmem:[#allocation5_spill] sm:$0xff] %v4597_v8  ;;  %v4601_v1 = vpop.f32.mrf.mxu0 }
 0x160   : > { %1110 = vmatmul.f32.gmra.mxu2 %v569_v22  ;;  %v4615_v22 = vpop.f32.mrf.mxu1 }
 0x161   : > { %1223 = vmatmul.f32.gmra.mxu3 %v4390_v63 }
 0x162   : > { %1342 = vmatmul.f32.gmra.mxu0 %v541_v62  ;;  %v790_v62 = vld [vmem:[%s6678_s1 + $0x330] sm:$0xff] }
 0x163   : > { %1455 = vmatmul.f32.gmra.mxu1 %v4603_v55  ;;  %v933_v16 = vpop.f32.mrf.mxu2  ;;  %1519 = vmatpush.msra.mxu2 %v790_v62 }
 0x164   : > { %v1046_v21 = vpop.f32.mrf.mxu3 }
 0x165   : > { %v4613_v29 = vadd.f32 %v1046_v21, %v933_v16 }
 0x167   : > { %6718 = vst [vmem:[#allocation6_spill] sm:$0xff] %v4613_v29  ;;  %v4617_v63 = vpop.f32.mrf.mxu0 }
 0x168   : > { %1113 = vmatmul.f32.gmra.mxu2 %v570_v4  ;;  %v509_v4 = vld [vmem:[#allocation2 + $0xc0] sm:$0xff]  ;;  %v4633_v60 = vpop.f32.mrf.mxu1 }
 0x169   : > { %1226 = vmatmul.f32.gmra.mxu3 %v4414_v17  ;;  %v543_v17 = vld [vmem:[#allocation2 + $0xd9] sm:$0xff] }
 0x16a   : > { %1345 = vmatmul.f32.gmra.mxu0 %v542_v38 }
 0x16b   : > { %1458 = vmatmul.f32.gmra.mxu1 %v4619_v31  ;;  %v936_v42 = vpop.f32.mrf.mxu2 }
 0x16c   : > { %v1049_v49 = vpop.f32.mrf.mxu3 }
 0x16d   : > { %v4629_v37 = vadd.f32 %v1049_v49, %v936_v42  ;;  %v2343_v49 = vld [vmem:[%s6681_s4 + $0x70] sm:$0xff] }
 0x16e   : > { %2474 = vmatpush.msra.mxu1 %v2343_v49  ;;  %v963_v49 = vadd.f32 %v4431_v25, %v4429_v24  ;;  %v2342_v25 = vld [vmem:[%s6681_s4 + $0x68] sm:$0xff] }
 0x16f   : > { %6720 = vst [vmem:[#allocation8_spill] sm:$0xff] %v4629_v37  ;;  %v1301_v54 = vpop.f32.mrf.mxu0  ;;  %v512_v37 = vld [vmem:[#allocation2 + $0xe0] sm:$0xff] }
 0x170   : > { %1116 = vmatmul.f32.gmra.mxu2 %v571_v47  ;;  %v510_v47 = vld [vmem:[#allocation2 + $0xc8] sm:$0xff]  ;;  %v1414_v42 = vpop.f32.mrf.mxu1  ;;  %2475 = vmatpush.msra.mxu1 %v2342_v25 }
 0x171   : > { %1229 = vmatmul.f32.gmra.mxu3 %v509_v4  ;;  %v822_v4 = vld [vmem:[%s6678_s1 + $0x430] sm:$0xff] }
 0x172   : > { %1348 = vmatmul.f32.gmra.mxu0 %v543_v17 }
 0x173   : > { %1461 = vmatmul.f32.gmra.mxu1 %v4631_v0  ;;  %v939_v18 = vpop.f32.mrf.mxu2  ;;  %1745 = vmatpush.msra.mxu0 %v822_v4 }
 0x174   : > { %v1052_v16 = vpop.f32.mrf.mxu3 }
 0x175   : > { %v4642_v21 = vadd.f32 %v1052_v16, %v939_v18  ;;  %v511_v18 = vld [vmem:[#allocation2 + $0xd8] sm:$0xff] }
 0x177   : > { %6721 = vst [vmem:[#allocation9_spill] sm:$0xff] %v4642_v21  ;;  %v1304_v38 = vpop.f32.mrf.mxu0  ;;  %v4658_v21 = vld [vmem:[#allocation2 + $0xf2] sm:$0xff] }
 0x178   : > { %1119 = vmatmul.f32.gmra.mxu2 %v4589_v56  ;;  %v1417_v4 = vpop.f32.mrf.mxu1 }
 0x179   : > { %1232 = vmatmul.f32.gmra.mxu3 %v510_v47  ;;  %v545_v47 = vld [vmem:[#allocation2 + $0xf1] sm:$0xff] }
 0x17a   : > { %1351 = vmatmul.f32.gmra.mxu0 %v544_v34  ;;  %v789_v34 = vld [vmem:[%s6678_s1 + $0x328] sm:$0xff] }
 0x17b   : > { %1464 = vmatmul.f32.gmra.mxu1 %v4644_v15  ;;  %v942_v17 = vpop.f32.mrf.mxu2  ;;  %1520 = vmatpush.msra.mxu2 %v789_v34  ;;  %v546_v34 = vld [vmem:[#allocation2 + $0xf9] sm:$0xff] }
 0x17c   : > { %v1055_v62 = vpop.f32.mrf.mxu3 }
 0x17d   : > { %v4654_v45 = vadd.f32 %v1055_v62, %v942_v17  ;;  %v805_v17 = vld [vmem:[%s6678_s1 + $0x3a8] sm:$0xff] }
 0x17e   : > { %1633 = vmatpush.msra.mxu3 %v805_v17 }
 0x17f   : > { %6722 = vst [vmem:[#allocation10_spill] sm:$0xff] %v4654_v45  ;;  %v4656_v16 = vpop.f32.mrf.mxu0 }
 0x180   : > { %1122 = vmatmul.f32.gmra.mxu2 %v4603_v55 }
 0x181   : > { %1235 = vmatmul.f32.gmra.mxu3 %v511_v18 }
 0x182   : > { %1354 = vmatmul.f32.gmra.mxu0 %v545_v47  ;;  %v966_v47 = vadd.f32 %v4442_v40, %v4440_v39  ;;  %v4688_v39 = vld [vmem:[#allocation2 + $0x10a] sm:$0xff] }
 0x183   : > { %1467 = vmatmul.f32.gmra.mxu1 %v4658_v21  ;;  %v1075_v62 = vpop.f32.mrf.mxu2 }
 0x184   : > { %v1188_v45 = vpop.f32.mrf.mxu3  ;;  %v1076_v18 = vadd.f32 %v1075_v62, %v963_v49  ;;  %v513_v62 = vld [vmem:[#allocation2 + $0xf0] sm:$0xff] }
 0x186   : > { %v1189_v29 = vadd.f32 %v1188_v45, %v1076_v18  ;;  %v821_v45 = vld [vmem:[%s6678_s1 + $0x428] sm:$0xff] }
 0x187   : > { %v4670_v8 = vpop.f32.mrf.mxu0  ;;  %1746 = vmatpush.msra.mxu0 %v821_v45 }
 0x188   : > { %1125 = vmatmul.f32.gmra.mxu2 %v4619_v31  ;;  %v1302_v24 = vadd.f32 %v1301_v54, %v1189_v29  ;;  %v1420_v54 = vpop.f32.mrf.mxu1  ;;  %v547_v31 = vld [vmem:[#allocation2 + $0x109] sm:$0xff] }
 0x189   : > { %1238 = vmatmul.f32.gmra.mxu3 %v512_v37 }
 0x18a   : > { %v4680_v49 = vadd.f32 %v1414_v42, %v1302_v24  ;;  %1357 = vmatmul.f32.gmra.mxu0 %v546_v34  ;;  %v788_v42 = vld [vmem:[%s6678_s1 + $0x320] sm:$0xff]  ;;  %v969_v34 = vadd.f32 %v4450_v44, %v4448_v59  ;;  %v4704_v59 = vld [vmem:[#allocation2 + $0x112] sm:$0xff] }
 0x18b   : > { %1470 = vmatmul.f32.gmra.mxu1 %v4672_v52  ;;  %v1078_v17 = vpop.f32.mrf.mxu2  ;;  %1521 = vmatpush.msra.mxu2 %v788_v42  ;;  %v548_v42 = vld [vmem:[#allocation2 + $0x111] sm:$0xff] }
 0x18c   : > { %v1191_v37 = vpop.f32.mrf.mxu3  ;;  %v1079_v29 = vadd.f32 %v1078_v17, %v966_v47  ;;  %v804_v47 = vld [vmem:[%s6678_s1 + $0x3a0] sm:$0xff] }
 0x18d   : > { %1634 = vmatpush.msra.mxu3 %v804_v47 }
 0x18e   : > { %v1192_v18 = vadd.f32 %v1191_v37, %v1079_v29  ;;  %v514_v37 = vld [vmem:[#allocation2 + $0xf8] sm:$0xff] }
 0x18f   : > { %v4686_v25 = vpop.f32.mrf.mxu0 }
 0x190   : > { %1128 = vmatmul.f32.gmra.mxu2 %v4631_v0  ;;  %v1305_v40 = vadd.f32 %v1304_v38, %v1192_v18 }
 0x191   : > { %1241 = vmatmul.f32.gmra.mxu3 %v513_v62  ;;  %v1423_v62 = vpop.f32.mrf.mxu1 }
 0x192   : > { %v4696_v24 = vadd.f32 %v1417_v4, %v1305_v40  ;;  %1360 = vmatmul.f32.gmra.mxu0 %v547_v31  ;;  %v2341_v31 = vld [vmem:[%s6681_s4 + $0x60] sm:$0xff]  ;;  %v972_v4 = vadd.f32 %v4464_v58, %v4462_v57 }
 0x193   : > { %1473 = vmatmul.f32.gmra.mxu1 %v4688_v39  ;;  %v1081_v45 = vpop.f32.mrf.mxu2 }
 0x194   : > { %v1194_v17 = vpop.f32.mrf.mxu3  ;;  %v1082_v38 = vadd.f32 %v1081_v45, %v969_v34  ;;  %2476 = vmatpush.msra.mxu1 %v2341_v31  ;;  %v820_v34 = vld [vmem:[%s6678_s1 + $0x420] sm:$0xff] }
 0x195   : > { %1747 = vmatpush.msra.mxu0 %v820_v34  ;;  %v4721_v31 = vld [vmem:[#allocation2 + $0x122] sm:$0xff] }
 0x196   : > { %v1195_v29 = vadd.f32 %v1194_v17, %v1082_v38  ;;  %v515_v17 = vld [vmem:[#allocation2 + $0x108] sm:$0xff] }
 0x197   : > { %v4702_v18 = vpop.f32.mrf.mxu0 }
 0x198   : > { %1131 = vmatmul.f32.gmra.mxu2 %v4644_v15  ;;  %v1308_v44 = vadd.f32 %v4656_v16, %v1195_v29  ;;  %v549_v29 = vld [vmem:[#allocation2 + $0x121] sm:$0xff] }
 0x199   : > { %1244 = vmatmul.f32.gmra.mxu3 %v514_v37  ;;  %v1426_v58 = vpop.f32.mrf.mxu1 }
 0x19a   : > { %v4713_v40 = vadd.f32 %v1420_v54, %v1308_v44  ;;  %1363 = vmatmul.f32.gmra.mxu0 %v548_v42  ;;  %v787_v54 = vld [vmem:[%s6678_s1 + $0x318] sm:$0xff]  ;;  %v975_v42 = vadd.f32 %v4475_v7, %v4473_v6 }
 0x19b   : > { %1476 = vmatmul.f32.gmra.mxu1 %v4704_v59  ;;  %v1084_v47 = vpop.f32.mrf.mxu2  ;;  %1522 = vmatpush.msra.mxu2 %v787_v54  ;;  %v4738_v54 = vld [vmem:[#allocation2 + $0x12a] sm:$0xff]  ;;  %v2340_v7 = vld [vmem:[%s6681_s4 + $0x58] sm:$0xff] }
 0x19c   : > { %v1197_v45 = vpop.f32.mrf.mxu3  ;;  %v1085_v16 = vadd.f32 %v1084_v47, %v972_v4  ;;  %v803_v4 = vld [vmem:[%s6678_s1 + $0x398] sm:$0xff]  ;;  %2477 = vmatpush.msra.mxu1 %v2340_v7  ;;  %v802_v7 = vld [vmem:[%s6678_s1 + $0x390] sm:$0xff] }
 0x19d   : > { %1635 = vmatpush.msra.mxu3 %v803_v4 }
 0x19e   : > { %v1198_v38 = vadd.f32 %v1197_v45, %v1085_v16  ;;  %v516_v45 = vld [vmem:[#allocation2 + $0x110] sm:$0xff] }
 0x19f   : > { %v4719_v37 = vpop.f32.mrf.mxu0  ;;  %1636 = vmatpush.msra.mxu3 %v802_v7 }
 0x1a0   : > { %1134 = vmatmul.f32.gmra.mxu2 %v4658_v21  ;;  %v1311_v57 = vadd.f32 %v4670_v8, %v1198_v38  ;;  %v550_v38 = vld [vmem:[#allocation2 + $0x129] sm:$0xff] }
 0x1a1   : > { %1247 = vmatmul.f32.gmra.mxu3 %v515_v17 }
 0x1a2   : > { %v4730_v44 = vadd.f32 %v1423_v62, %v1311_v57  ;;  %1366 = vmatmul.f32.gmra.mxu0 %v549_v29  ;;  %v978_v62 = vadd.f32 %v4489_v10, %v4487_v14  ;;  %v1429_v57 = vpop.f32.mrf.mxu1  ;;  %v4755_v14 = vld [vmem:[#allocation2 + $0x13a] sm:$0xff] }
 0x1a3   : > { %1479 = vmatmul.f32.gmra.mxu1 %v4721_v31  ;;  %v1087_v34 = vpop.f32.mrf.mxu2 }
 0x1a4   : > { %v1200_v8 = vpop.f32.mrf.mxu3  ;;  %v1088_v47 = vadd.f32 %v1087_v34, %v975_v42  ;;  %v819_v42 = vld [vmem:[%s6678_s1 + $0x418] sm:$0xff] }
 0x1a5   : > { %1748 = vmatpush.msra.mxu0 %v819_v42 }
 0x1a6   : > { %v1201_v16 = vadd.f32 %v1200_v8, %v1088_v47  ;;  %v517_v8 = vld [vmem:[#allocation2 + $0x120] sm:$0xff] }
 0x1a7   : > { %v4736_v17 = vpop.f32.mrf.mxu0 }
 0x1a8   : > { %1137 = vmatmul.f32.gmra.mxu2 %v4672_v52  ;;  %v1314_v6 = vadd.f32 %v4686_v25, %v1201_v16  ;;  %v551_v16 = vld [vmem:[#allocation2 + $0x139] sm:$0xff] }
 0x1a9   : > { %1250 = vmatmul.f32.gmra.mxu3 %v516_v45 }
 0x1aa   : > { %v4747_v29 = vadd.f32 %v1426_v58, %v1314_v6  ;;  %1369 = vmatmul.f32.gmra.mxu0 %v550_v38  ;;  %v786_v58 = vld [vmem:[%s6678_s1 + $0x310] sm:$0xff]  ;;  %v981_v38 = vadd.f32 %v4500_v32, %v4498_v27  ;;  %v4772_v27 = vld [vmem:[#allocation2 + $0x142] sm:$0xff] }
 0x1ab   : > { %1482 = vmatmul.f32.gmra.mxu1 %v4738_v54  ;;  %v1090_v4 = vpop.f32.mrf.mxu2  ;;  %1523 = vmatpush.msra.mxu2 %v786_v58  ;;  %v818_v58 = vld [vmem:[%s6678_s1 + $0x410] sm:$0xff] }
 0x1ac   : > { %v1203_v25 = vpop.f32.mrf.mxu3  ;;  %v1091_v34 = vadd.f32 %v1090_v4, %v978_v62  ;;  %v518_v4 = vld [vmem:[#allocation2 + $0x128] sm:$0xff]  ;;  %1749 = vmatpush.msra.mxu0 %v818_v58 }
 0x1ae   : > { %v1204_v47 = vadd.f32 %v1203_v25, %v1091_v34  ;;  %v1432_v25 = vpop.f32.mrf.mxu1 }
 0x1af   : > { %v4753_v45 = vpop.f32.mrf.mxu0 }
 0x1b0   : > { %1140 = vmatmul.f32.gmra.mxu2 %v4688_v39  ;;  %v1317_v10 = vadd.f32 %v4702_v18, %v1204_v47  ;;  %v552_v47 = vld [vmem:[#allocation2 + $0x141] sm:$0xff] }
 0x1b1   : > { %1253 = vmatmul.f32.gmra.mxu3 %v517_v8 }
 0x1b2   : > { %v4764_v6 = vadd.f32 %v1429_v57, %v1317_v10  ;;  %1372 = vmatmul.f32.gmra.mxu0 %v551_v16  ;;  %v2339_v57 = vld [vmem:[%s6681_s4 + $0x50] sm:$0xff]  ;;  %v984_v16 = vadd.f32 %v4514_v28, %v4512_v41 }
 0x1b3   : > { %1485 = vmatmul.f32.gmra.mxu1 %v4755_v14  ;;  %v1093_v62 = vpop.f32.mrf.mxu2  ;;  %v4789_v41 = vld [vmem:[#allocation2 + $0x152] sm:$0xff] }
 0x1b4   : > { %v1206_v42 = vpop.f32.mrf.mxu3  ;;  %v1094_v18 = vadd.f32 %v1093_v62, %v981_v38  ;;  %2478 = vmatpush.msra.mxu1 %v2339_v57  ;;  %v519_v62 = vld [vmem:[#allocation2 + $0x138] sm:$0xff]  ;;  %v801_v57 = vld [vmem:[%s6678_s1 + $0x388] sm:$0xff] }
 0x1b5   : > { %1637 = vmatpush.msra.mxu3 %v801_v57  ;;  %v521_v57 = vld [vmem:[#allocation2 + $0x150] sm:$0xff] }
 0x1b6   : > { %v1207_v34 = vadd.f32 %v1206_v42, %v1094_v18  ;;  %v1435_v18 = vpop.f32.mrf.mxu1 }
 0x1b7   : > { %v4770_v8 = vpop.f32.mrf.mxu0 }
 0x1b8   : > { %1143 = vmatmul.f32.gmra.mxu2 %v4704_v59  ;;  %v1320_v32 = vadd.f32 %v4719_v37, %v1207_v34  ;;  %v553_v34 = vld [vmem:[#allocation2 + $0x151] sm:$0xff] }
 0x1b9   : > { %1256 = vmatmul.f32.gmra.mxu3 %v518_v4 }
 0x1ba   : > { %v4781_v10 = vadd.f32 %v1432_v25, %v1320_v32  ;;  %1375 = vmatmul.f32.gmra.mxu0 %v552_v47  ;;  %v785_v25 = vld [vmem:[%s6678_s1 + $0x308] sm:$0xff]  ;;  %v987_v47 = vadd.f32 %v4525_v2, %v4523_v51  ;;  %v363_v51 = vld [vmem:[%s4101_s23 + $0xf0] sm:$0xff] }
 0x1bb   : > { %1488 = vmatmul.f32.gmra.mxu1 %v4772_v27  ;;  %v1096_v38 = vpop.f32.mrf.mxu2  ;;  %1524 = vmatpush.msra.mxu2 %v785_v25  ;;  %397 = vst.msk [vmem:[#allocation2 + $0x181] sm:$0xff] %vm366_vm0, %v363_v51 }
 0x1bc   : > { %v1209_v7 = vpop.f32.mrf.mxu3  ;;  %v1097_v37 = vadd.f32 %v1096_v38, %v984_v16  ;;  %v520_v38 = vld [vmem:[#allocation2 + $0x140] sm:$0xff] }
 0x1be   : > { %v1210_v42 = vadd.f32 %v1209_v7, %v1097_v37 }
 0x1bf   : > { %v4787_v4 = vpop.f32.mrf.mxu0 }
 0x1c0   : > { %1146 = vmatmul.f32.gmra.mxu2 %v4721_v31  ;;  %v1323_v28 = vadd.f32 %v4736_v17, %v1210_v42  ;;  %v4806_v42 = vld [vmem:[#allocation2 + $0x15a] sm:$0xff] }
 0x1c1   : > { %1259 = vmatmul.f32.gmra.mxu3 %v519_v62  ;;  %v554_v62 = vld [vmem:[#allocation2 + $0x159] sm:$0xff] }
 0x1c2   : > { %v4798_v32 = vadd.f32 %v1435_v18, %v1323_v28  ;;  %1378 = vmatmul.f32.gmra.mxu0 %v553_v34  ;;  %v2338_v18 = vld [vmem:[%s6681_s4 + $0x48] sm:$0xff]  ;;  %v990_v34 = vadd.f32 %v4539_v46, %v4537_v11  ;;  %v784_v46 = vld [vmem:[%s6678_s1 + $0x300] sm:$0xff] }
 0x1c3   : > { %1491 = vmatmul.f32.gmra.mxu1 %v4789_v41  ;;  %v1099_v16 = vpop.f32.mrf.mxu2  ;;  %v817_v28 = vld [vmem:[%s6678_s1 + $0x408] sm:$0xff]  ;;  %1525 = vmatpush.msra.mxu2 %v784_v46 }
 0x1c4   : > { %v1212_v17 = vpop.f32.mrf.mxu3  ;;  %v1100_v58 = vadd.f32 %v1099_v16, %v987_v47  ;;  %2479 = vmatpush.msra.mxu1 %v2338_v18  ;;  %1750 = vmatpush.msra.mxu0 %v817_v28 }
 0x1c6   : > { %v1213_v7 = vadd.f32 %v1212_v17, %v1100_v58  ;;  %v555_v58 = vld [vmem:[#allocation2 + $0x169] sm:$0xff] }
 0x1c7   : > { %v4804_v37 = vpop.f32.mrf.mxu0 }
 0x1c8   : > { %1149 = vmatmul.f32.gmra.mxu2 %v4738_v54  ;;  %v4811_v2 = vadd.f32 %v4753_v45, %v1213_v7  ;;  %v364_v7 = vld [vmem:[%s4101_s23 + $0xf8] sm:$0xff] }
 0x1c9   : > { %1262 = vmatmul.f32.gmra.mxu3 %v520_v38  ;;  %v4823_v38 = vld [vmem:[#allocation2 + $0x16a] sm:$0xff]  ;;  %398 = vst.msk [vmem:[#allocation2 + $0x189] sm:$0xff] %vm366_vm0, %v364_v7 }
 0x1ca   : > { %1381 = vmatmul.f32.gmra.mxu0 %v554_v62  ;;  %v993_v62 = vadd.f32 %v4550_v12, %v4548_v9  ;;  %v2337_v12 = vld [vmem:[%s6681_s4 + $0x40] sm:$0xff] }
 0x1cb   : > { %1494 = vmatmul.f32.gmra.mxu1 %v4806_v42  ;;  %v1102_v45 = vpop.f32.mrf.mxu2 }
 0x1cc   : > { %v1215_v25 = vpop.f32.mrf.mxu3  ;;  %v1103_v47 = vadd.f32 %v1102_v45, %v990_v34  ;;  %v522_v34 = vld [vmem:[#allocation2 + $0x158] sm:$0xff]  ;;  %2480 = vmatpush.msra.mxu1 %v2337_v12 }
 0x1ce   : > { %v1216_v16 = vadd.f32 %v1215_v25, %v1103_v47  ;;  %v556_v25 = vld [vmem:[#allocation2 + $0x171] sm:$0xff] }
 0x1cf   : > { %v1337_v17 = vpop.f32.mrf.mxu0  ;;  %v588_v47 = vld [vmem:[#allocation2 + $0x172] sm:$0xff] }
 0x1d0   : > { %1152 = vmatmul.f32.gmra.mxu2 %v4755_v14  ;;  %v4828_v11 = vadd.f32 %v4770_v8, %v1216_v16  ;;  %v800_v14 = vld [vmem:[%s6678_s1 + $0x380] sm:$0xff] }
 0x1d1   : > { %1265 = vmatmul.f32.gmra.mxu3 %v521_v57  ;;  %v996_v57 = vadd.f32 %v4565_v19, %v4562_v33  ;;  %v816_v16 = vld [vmem:[%s6678_s1 + $0x400] sm:$0xff]  ;;  %v999_v19 = vadd.f32 %v4583_v48, %v4573_v43  ;;  %v1002_v43 = vadd.f32 %v4599_v5, %v4587_v30 }
 0x1d2   : > { %1384 = vmatmul.f32.gmra.mxu0 %v555_v58  ;;  %1638 = vmatpush.msra.mxu3 %v800_v14  ;;  %v557_v14 = vld [vmem:[#allocation2 + $0x181] sm:$0xff] }
 0x1d3   : > { %1497 = vmatmul.f32.gmra.mxu1 %v4823_v38  ;;  %v1105_v51 = vpop.f32.mrf.mxu2  ;;  %1751 = vmatpush.msra.mxu0 %v816_v16  ;;  %v590_v16 = vld [vmem:[#allocation2 + $0x18a] sm:$0xff] }
 0x1d4   : > { %v1218_v8 = vpop.f32.mrf.mxu3  ;;  %v1106_v18 = vadd.f32 %v1105_v51, %v993_v62  ;;  %v589_v51 = vld [vmem:[#allocation2 + $0x182] sm:$0xff] }
 0x1d6   : > { %v1219_v28 = vadd.f32 %v1218_v8, %v1106_v18 }
 0x1d7   : > { %v1340_v45 = vpop.f32.mrf.mxu0 }
 0x1d8   : > { %1155 = vmatmul.f32.gmra.mxu2 %v4772_v27  ;;  %v4842_v9 = vadd.f32 %v4787_v4, %v1219_v28  ;;  %v523_v4 = vld [vmem:[#allocation2 + $0x168] sm:$0xff]  ;;  %v524_v28 = vld [vmem:[#allocation2 + $0x170] sm:$0xff] }
 0x1d9   : > { %1268 = vmatmul.f32.gmra.mxu3 %v522_v34 }
 0x1da   : > { %1387 = vmatmul.f32.gmra.mxu0 %v556_v25 }
 0x1db   : > { %1500 = vmatmul.f32.gmra.mxu1 %v588_v47  ;;  %v1108_v58 = vpop.f32.mrf.mxu2 }
 0x1dc   : > { %v1221_v27 = vpop.f32.mrf.mxu3  ;;  %v1109_v7 = vadd.f32 %v1108_v58, %v996_v57  ;;  %v558_v57 = vld [vmem:[#allocation2 + $0x189] sm:$0xff] }
 0x1de   : > { %v1222_v46 = vadd.f32 %v1221_v27, %v1109_v7  ;;  %v525_v7 = vld [vmem:[#allocation2 + $0x180] sm:$0xff] }
 0x1df   : > { %v1343_v62 = vpop.f32.mrf.mxu0 }
 0x1e0   : > { %1158 = vmatmul.f32.gmra.mxu2 %v4789_v41  ;;  %v4854_v33 = vadd.f32 %v4804_v37, %v1222_v46  ;;  %v2336_v37 = vld [vmem:[%s6681_s4 + $0x38] sm:$0xff] }
 0x1e1   : > { %1271 = vmatmul.f32.gmra.mxu3 %v523_v4  ;;  %2481 = vmatpush.msra.mxu1 %v2336_v37 }
 0x1e2   : > { %1390 = vmatmul.f32.gmra.mxu0 %v557_v14  ;;  %v1005_v14 = vadd.f32 %v4615_v22, %v4601_v1  ;;  %v1008_v1 = vadd.f32 %v4633_v60, %v4617_v63  ;;  %v625_v63 = vld [vmem:[#allocation2 + $0x39] sm:$0xff] }
 0x1e3   : > { %1503 = vmatmul.f32.gmra.mxu1 %v589_v51  ;;  %v1111_v8 = vpop.f32.mrf.mxu2 }
 0x1e4   : > { %v1224_v18 = vpop.f32.mrf.mxu3  ;;  %v1112_v34 = vadd.f32 %v1111_v8, %v999_v19  ;;  %v526_v19 = vld [vmem:[#allocation2 + $0x188] sm:$0xff] }
 0x1e6   : > { %v1225_v25 = vadd.f32 %v1224_v18, %v1112_v34  ;;  %v657_v34 = vld [vmem:[#allocation2 + $0x3a] sm:$0xff] }
 0x1e7   : > { %v1346_v12 = vpop.f32.mrf.mxu0 }
 0x1e8   : > { %1161 = vmatmul.f32.gmra.mxu2 %v4806_v42  ;;  %v4859_v41 = vadd.f32 %v1337_v17, %v1225_v25  ;;  %v656_v42 = vld [vmem:[#allocation2 + $0x32] sm:$0xff] }
 0x1e9   : > { %1274 = vmatmul.f32.gmra.mxu3 %v524_v28 }
 0x1ea   : > { %1393 = vmatmul.f32.gmra.mxu0 %v558_v57  ;;  %v592_v57 = vld [vmem:[#allocation2 + $0x30] sm:$0xff] }
 0x1eb   : > { %1506 = vmatmul.f32.gmra.mxu1 %v590_v16  ;;  %v1114_v48 = vpop.f32.mrf.mxu2  ;;  %v624_v16 = vld [vmem:[#allocation2 + $0x31] sm:$0xff] }
 0x1ec   : > { %v1227_v58 = vpop.f32.mrf.mxu3  ;;  %v1115_v27 = vadd.f32 %v1114_v48, %v1002_v43 }
 0x1ee   : > { %v1228_v4 = vadd.f32 %v1227_v58, %v1115_v27 }
 0x1ef   : > { %v1349_v46 = vpop.f32.mrf.mxu0 }
 0x1f0   : > { %1164 = vmatmul.f32.gmra.mxu2 %v4823_v38  ;;  %v4867_v17 = vadd.f32 %v1340_v45, %v1228_v4  ;;  %v2335_v38 = vld [vmem:[%s6681_s4 + $0x30] sm:$0xff] }
 0x1f1   : > { %1277 = vmatmul.f32.gmra.mxu3 %v525_v7  ;;  %2482 = vmatpush.msra.mxu1 %v2335_v38  ;;  %v593_v7 = vld [vmem:[#allocation2 + $0x38] sm:$0xff]  ;;  %v660_v38 = vld [vmem:[#allocation2 + $0x62] sm:$0xff] }
 0x1f2   : > { %1752 = vmatmul.f32.vlgmr.msra.gmra.mxu0 %v656_v42  ;;  %v659_v42 = vld [vmem:[#allocation2 + $0x52] sm:$0xff] }
 0x1f3   : > { %v1117_v51 = vpop.f32.mrf.mxu2 }
 0x1f4   : > { %v1230_v30 = vpop.f32.mrf.mxu3  ;;  %v1118_v5 = vadd.f32 %v1117_v51, %v1005_v14  ;;  %v2334_v51 = vld [vmem:[%s6681_s4 + $0x28] sm:$0xff] }
 0x1f5   : > { %2483 = vmatpush.msra.mxu1 %v2334_v51 }
 0x1f6   : > { %v1231_v8 = vadd.f32 %v1230_v30, %v1118_v5 }
 0x1f7   : > { %v1352_v18 = vpop.f32.mrf.mxu0 }
 0x1f8   : > { %1167 = vmatmul.f32.gmra.mxu2 %v588_v47  ;;  %v4871_v28 = vadd.f32 %v1343_v62, %v1231_v8  ;;  %v658_v47 = vld [vmem:[#allocation2 + $0x4a] sm:$0xff] }
 0x1f9   : > { %1280 = vmatmul.f32.gmra.mxu3 %v526_v19  ;;  %v626_v19 = vld [vmem:[#allocation2 + $0x49] sm:$0xff] }
 0x1fa   : > { %1755 = vmatmul.f32.gmra.mxu0 %v657_v34 }
 0x1fb   : > { %v1120_v22 = vpop.f32.mrf.mxu2 }
 0x1fc   : > { %v1233_v45 = vpop.f32.mrf.mxu3  ;;  %v1121_v25 = vadd.f32 %v1120_v22, %v1008_v1 }
 0x1fe   : > { %v1234_v37 = vadd.f32 %v1233_v45, %v1121_v25  ;;  %v4889_v45 = vpop.f32.mrf.mxu1 }
 0x1ff   : > { %v1355_v43 = vpop.f32.mrf.mxu0 }
 0x200   : > { %1526 = vmatmul.f32.vlgmr.msra.gmra.mxu2 %v592_v57  ;;  %v4878_v62 = vadd.f32 %v1346_v12, %v1234_v37  ;;  %v595_v57 = vld [vmem:[#allocation2 + $0x50] sm:$0xff] }
 0x201   : > { %1639 = vmatmul.f32.vlgmr.msra.gmra.mxu3 %v624_v16  ;;  %v627_v16 = vld [vmem:[#allocation2 + $0x51] sm:$0xff] }
 0x202   : > { %1758 = vmatmul.f32.gmra.mxu0 %v658_v47  ;;  %v661_v47 = vld [vmem:[#allocation2 + $0x6a] sm:$0xff] }
 0x203   : > { %v1123_v48 = vpop.f32.mrf.mxu2 }
 0x204   : > { %v1236_v58 = vpop.f32.mrf.mxu3  ;;  %v1124_v27 = vadd.f32 %v1123_v48, %v4460_v53  ;;  %v594_v53 = vld [vmem:[#allocation2 + $0x48] sm:$0xff] }
 0x206   : > { %v1237_v60 = vadd.f32 %v1236_v58, %v1124_v27 }
 0x207   : > { %v1358_v4 = vpop.f32.mrf.mxu0 }
 0x208   : > { %1529 = vmatmul.f32.gmra.mxu2 %v593_v7  ;;  %v4881_v14 = vadd.f32 %v1349_v46, %v1237_v60  ;;  %v4898_v60 = vpop.f32.mrf.mxu1 }
 0x209   : > { %1642 = vmatmul.f32.gmra.mxu3 %v625_v63  ;;  %v628_v63 = vld [vmem:[#allocation2 + $0x61] sm:$0xff] }
 0x20a   : > { %1761 = vmatmul.f32.gmra.mxu0 %v659_v42 }
 0x20b   : > { %v1126_v12 = vpop.f32.mrf.mxu2 }
 0x20c   : > { %v1239_v30 = vpop.f32.mrf.mxu3  ;;  %v1127_v5 = vadd.f32 %v1126_v12, %v4471_v3  ;;  %v662_v12 = vld [vmem:[#allocation2 + $0x7a] sm:$0xff] }
 0x20e   : > { %v1240_v8 = vadd.f32 %v1239_v30, %v1127_v5 }
 0x20f   : > { %v1361_v34 = vpop.f32.mrf.mxu0 }
 0x210   : > { %1532 = vmatmul.f32.gmra.mxu2 %v594_v53  ;;  %v4887_v1 = vadd.f32 %v1352_v18, %v1240_v8  ;;  %v2333_v18 = vld [vmem:[%s6681_s4 + $0x20] sm:$0xff]  ;;  %v629_v8 = vld [vmem:[#allocation2 + $0x69] sm:$0xff] }
 0x211   : > { %1645 = vmatmul.f32.gmra.mxu3 %v626_v19  ;;  %2484 = vmatpush.msra.mxu1 %v2333_v18  ;;  %v597_v19 = vld [vmem:[#allocation2 + $0x68] sm:$0xff] }
 0x212   : > { %1764 = vmatmul.f32.gmra.mxu0 %v660_v38 }
 0x213   : > { %v1129_v46 = vpop.f32.mrf.mxu2 }
 0x214   : > { %v1242_v22 = vpop.f32.mrf.mxu3  ;;  %v1130_v25 = vadd.f32 %v1129_v46, %v4485_v13  ;;  %v596_v13 = vld [vmem:[#allocation2 + $0x60] sm:$0xff] }
 0x215   : > { %v663_v46 = vld [vmem:[#allocation2 + $0x82] sm:$0xff] }
 0x216   : > { %v1243_v37 = vadd.f32 %v1242_v22, %v1130_v25  ;;  %v4903_v22 = vpop.f32.mrf.mxu1 }
 0x217   : > { %v1364_v3 = vpop.f32.mrf.mxu0 }
 0x218   : > { %1535 = vmatmul.f32.gmra.mxu2 %v595_v57  ;;  %v4892_v48 = vadd.f32 %v1355_v43, %v1243_v37  ;;  %v598_v37 = vld [vmem:[#allocation2 + $0x78] sm:$0xff] }
 0x219   : > { %1648 = vmatmul.f32.gmra.mxu3 %v627_v16 }
 0x21a   : > { %1767 = vmatmul.f32.gmra.mxu0 %v661_v47  ;;  %v630_v47 = vld [vmem:[#allocation2 + $0x79] sm:$0xff] }
 0x21b   : > { %v1132_v58 = vpop.f32.mrf.mxu2 }
 0x21c   : > { %v1245_v27 = vpop.f32.mrf.mxu3  ;;  %v1133_v7 = vadd.f32 %v1132_v58, %v4496_v26 }
 0x21e   : > { %v1246_v42 = vadd.f32 %v1245_v27, %v1133_v7  ;;  %v664_v27 = vld [vmem:[#allocation2 + $0x92] sm:$0xff] }
 0x21f   : > { %v1367_v51 = vpop.f32.mrf.mxu0 }
 0x220   : > { %1538 = vmatmul.f32.gmra.mxu2 %v596_v13  ;;  %v4900_v43 = vadd.f32 %v1358_v4, %v1246_v42  ;;  %v2332_v4 = vld [vmem:[%s6681_s4 + $0x18] sm:$0xff] }
 0x221   : > { %1651 = vmatmul.f32.gmra.mxu3 %v628_v63  ;;  %2485 = vmatpush.msra.mxu1 %v2332_v4  ;;  %v600_v4 = vld [vmem:[#allocation2 + $0x90] sm:$0xff] }
 0x222   : > { %1770 = vmatmul.f32.gmra.mxu0 %v662_v12  ;;  %v599_v12 = vld [vmem:[#allocation2 + $0x80] sm:$0xff] }
 0x223   : > { %v1135_v30 = vpop.f32.mrf.mxu2 }
 0x224   : > { %v1248_v5 = vpop.f32.mrf.mxu3  ;;  %v1136_v53 = vadd.f32 %v1135_v30, %v4510_v36  ;;  %v631_v30 = vld [vmem:[#allocation2 + $0x81] sm:$0xff] }
 0x226   : > { %v1249_v38 = vadd.f32 %v1248_v5, %v1136_v53  ;;  %v665_v53 = vld [vmem:[#allocation2 + $0x9a] sm:$0xff] }
 0x227   : > { %v1370_v26 = vpop.f32.mrf.mxu0 }
 0x228   : > { %1541 = vmatmul.f32.gmra.mxu2 %v597_v19  ;;  %v4905_v25 = vadd.f32 %v1361_v34, %v1249_v38  ;;  %v4913_v34 = vpop.f32.mrf.mxu1 }
 0x229   : > { %1654 = vmatmul.f32.gmra.mxu3 %v629_v8 }
 0x22a   : > { %1773 = vmatmul.f32.gmra.mxu0 %v663_v46 }
 0x22b   : > { %v1138_v57 = vpop.f32.mrf.mxu2 }
 0x22c   : > { %v1251_v16 = vpop.f32.mrf.mxu3  ;;  %v1139_v36 = vadd.f32 %v1138_v57, %v4521_v50  ;;  %v632_v57 = vld [vmem:[#allocation2 + $0x91] sm:$0xff] }
 0x22e   : > { %v1252_v18 = vadd.f32 %v1251_v16, %v1139_v36 }
 0x22f   : > { %v1373_v58 = vpop.f32.mrf.mxu0 }
 0x230   : > { %1544 = vmatmul.f32.gmra.mxu2 %v598_v37  ;;  %v4911_v7 = vadd.f32 %v1364_v3, %v1252_v18  ;;  %v2331_v3 = vld [vmem:[%s6681_s4 + $0x10] sm:$0xff]  ;;  %v4921_v46 = vpop.f32.mrf.mxu1 }
 0x231   : > { %1657 = vmatmul.f32.gmra.mxu3 %v630_v47  ;;  %2486 = vmatpush.msra.mxu1 %v2331_v3  ;;  %v666_v37 = vld [vmem:[#allocation2 + $0xaa] sm:$0xff] }
 0x232   : > { %1776 = vmatmul.f32.gmra.mxu0 %v664_v27  ;;  %v602_v3 = vld [vmem:[#allocation2 + $0xa8] sm:$0xff] }
 0x233   : > { %v1141_v13 = vpop.f32.mrf.mxu2 }
 0x234   : > { %v1254_v63 = vpop.f32.mrf.mxu3  ;;  %v1142_v42 = vadd.f32 %v1141_v13, %v4535_v61  ;;  %v601_v13 = vld [vmem:[#allocation2 + $0x98] sm:$0xff] }
 0x236   : > { %v1255_v5 = vadd.f32 %v1254_v63, %v1142_v42  ;;  %v633_v63 = vld [vmem:[#allocation2 + $0x99] sm:$0xff] }
 0x237   : > { %v1376_v50 = vpop.f32.mrf.mxu0 }
 0x238   : > { %1547 = vmatmul.f32.gmra.mxu2 %v599_v12  ;;  %v4916_v19 = vadd.f32 %v1367_v51, %v1255_v5  ;;  %v4927_v42 = vpop.f32.mrf.mxu1 }
 0x239   : > { %1660 = vmatmul.f32.gmra.mxu3 %v631_v30 }
 0x23a   : > { %1779 = vmatmul.f32.gmra.mxu0 %v665_v53 }
 0x23b   : > { %v1144_v8 = vpop.f32.mrf.mxu2 }
 0x23c   : > { %v1257_v38 = vpop.f32.mrf.mxu3  ;;  %v1145_v61 = vadd.f32 %v1144_v8, %v4546_v20  ;;  %v634_v8 = vld [vmem:[#allocation2 + $0xa9] sm:$0xff] }
 0x23e   : > { %v1258_v16 = vadd.f32 %v1257_v38, %v1145_v61 }
 0x23f   : > { %v1379_v36 = vpop.f32.mrf.mxu0 }
 0x240   : > { %1550 = vmatmul.f32.gmra.mxu2 %v600_v4  ;;  %v4924_v51 = vadd.f32 %v1370_v26, %v1258_v16  ;;  %v2330_v26 = vld [vmem:[%s6681_s4 + $0x8] sm:$0xff]  ;;  %v4936_v4 = vpop.f32.mrf.mxu1 }
 0x241   : > { %1663 = vmatmul.f32.gmra.mxu3 %v632_v57  ;;  %2487 = vmatpush.msra.mxu1 %v2330_v26 }
 0x242   : > { %1782 = vmatmul.f32.gmra.mxu0 %v666_v37  ;;  %v6725_v37 = vld [vmem:[#allocation4_spill] sm:$0xff] }
 0x243   : > { %v1147_v47 = vpop.f32.mrf.mxu2 }
 0x244   : > { %v1260_v18 = vpop.f32.mrf.mxu3  ;;  %v1148_v27 = vadd.f32 %v1147_v47, %v4560_v23  ;;  %v603_v47 = vld [vmem:[#allocation2 + $0xb0] sm:$0xff] }
 0x246   : > { %v1261_v12 = vadd.f32 %v1260_v18, %v1148_v27  ;;  %v635_v18 = vld [vmem:[#allocation2 + $0xb1] sm:$0xff] }
 0x247   : > { %v1382_v20 = vpop.f32.mrf.mxu0 }
 0x248   : > { %1553 = vmatmul.f32.gmra.mxu2 %v601_v13  ;;  %v4929_v30 = vadd.f32 %v1373_v58, %v1261_v12  ;;  %v4950_v12 = vld [vmem:[#allocation2] sm:$0xff] }
 0x249   : > { %1666 = vmatmul.f32.gmra.mxu3 %v633_v63  ;;  %v2329_v63 = vld [vmem:[%s6681_s4] sm:$0xff] }
 0x24a   : > { %6723 = vst [vmem:[#allocation11_spill] sm:$0xff] %v4929_v30  ;;  %1785 = vmatmul.f32.gmra.mxu0 %v4589_v56  ;;  %2488 = vmatpush.msra.mxu1 %v2329_v63 }
 0x24b   : > { %v1150_v5 = vpop.f32.mrf.mxu2  ;;  %2489 = vmatmul.f32.vlgmr.msra.gmra.mxu1 %v4950_v12 }
 0x24c   : > { %v1263_v53 = vpop.f32.mrf.mxu3  ;;  %v1151_v23 = vadd.f32 %v1150_v5, %v4571_v35 }
 0x24e   : > { %v1264_v38 = vadd.f32 %v1263_v53, %v1151_v23  ;;  %v6728_v53 = vld [vmem:[#allocation5_spill] sm:$0xff] }
 0x24f   : > { %v1385_v61 = vpop.f32.mrf.mxu0 }
 0x250   : > { %1556 = vmatmul.f32.gmra.mxu2 %v602_v3  ;;  %v4938_v58 = vadd.f32 %v1376_v50, %v1264_v38  ;;  %v4947_v50 = vpop.f32.mrf.mxu1  ;;  %v604_v3 = vld [vmem:[#allocation2 + $0xc0] sm:$0xff]  ;;  %v2360_v38 = vld [vmem:[%s6681_s4 + $0xf8] sm:$0xff] }
 0x251   : > { %1669 = vmatmul.f32.gmra.mxu3 %v634_v8  ;;  %2586 = vmatpush.msrb.mxu2 %v2360_v38  ;;  %v638_v38 = vld [vmem:[#allocation2 + $0xd9] sm:$0xff] }
 0x252   : > { %6724 = vst [vmem:[#allocation12_spill] sm:$0xff] %v4938_v58  ;;  %1788 = vmatmul.f32.gmra.mxu0 %v4603_v55  ;;  %v6727_v55 = vld [vmem:[#allocation7_spill] sm:$0xff] }
 0x253   : > { %v1153_v57 = vpop.f32.mrf.mxu2  ;;  %2492 = vmatmul.f32.gmra.mxu1 %v4950_v12  ;;  %v680_v58 = vld [vmem:[#allocation2 + $0x152] sm:$0xff] }
 0x254   : > { %v1266_v16 = vpop.f32.mrf.mxu3  ;;  %v1154_v56 = vadd.f32 %v1153_v57, %v6725_v37  ;;  %v2376_v57 = vld [vmem:[%s6681_s4 + $0x178] sm:$0xff] }
 0x255   : > { %2699 = vmatpush.msrb.mxu3 %v2376_v57 }
 0x256   : > { %v1267_v27 = vadd.f32 %v1266_v16, %v1154_v56 }
 0x257   : > { %v1388_v35 = vpop.f32.mrf.mxu0 }
 0x258   : > { %1559 = vmatmul.f32.gmra.mxu2 %v603_v47  ;;  %v4942_v13 = vadd.f32 %v1379_v36, %v1267_v27  ;;  %v636_v36 = vld [vmem:[#allocation2 + $0xc1] sm:$0xff]  ;;  %v6730_v27 = vld [vmem:[#allocation6_spill] sm:$0xff] }
 0x259   : > { %1672 = vmatmul.f32.gmra.mxu3 %v635_v18  ;;  %v4964_v18 = vpop.f32.mrf.mxu1 }
 0x25a   : > { %6726 = vst [vmem:[#allocation4_spill] sm:$0xff] %v4942_v13  ;;  %1791 = vmatmul.f32.gmra.mxu0 %v6727_v55  ;;  %v605_v55 = vld [vmem:[#allocation2 + $0xc8] sm:$0xff] }
 0x25b   : > { %v1156_v26 = vpop.f32.mrf.mxu2 }
 0x25c   : > { %v1269_v5 = vpop.f32.mrf.mxu3  ;;  %v1157_v23 = vadd.f32 %v1156_v26, %v6728_v53  ;;  %v637_v26 = vld [vmem:[#allocation2 + $0xc9] sm:$0xff] }
 0x25e   : > { %v1270_v8 = vadd.f32 %v1269_v5, %v1157_v23 }
 0x25f   : > { %v1391_v16 = vpop.f32.mrf.mxu0 }
 0x260   : > { %1562 = vmatmul.f32.gmra.mxu2 %v604_v3  ;;  %v4960_v37 = vadd.f32 %v1382_v20, %v1270_v8  ;;  %v6732_v3 = vld [vmem:[#allocation8_spill] sm:$0xff]  ;;  %v606_v8 = vld [vmem:[#allocation2 + $0xd8] sm:$0xff] }
 0x261   : > { %1675 = vmatmul.f32.gmra.mxu3 %v636_v36  ;;  %v4971_v57 = vpop.f32.mrf.mxu1 }
 0x262   : > { %6729 = vst [vmem:[#allocation7_spill] sm:$0xff] %v4960_v37  ;;  %1794 = vmatmul.f32.gmra.mxu0 %v4631_v0 }
 0x263   : > { %v1159_v56 = vpop.f32.mrf.mxu2 }
 0x264   : > { %v1272_v47 = vpop.f32.mrf.mxu3  ;;  %v1160_v63 = vadd.f32 %v1159_v56, %v6730_v27 }
 0x266   : > { %v1273_v5 = vadd.f32 %v1272_v47, %v1160_v63 }
 0x267   : > { %v1394_v53 = vpop.f32.mrf.mxu0 }
 0x268   : > { %1565 = vmatmul.f32.gmra.mxu2 %v605_v55  ;;  %v4967_v23 = vadd.f32 %v1385_v61, %v1273_v5  ;;  %v2392_v61 = vld [vmem:[%s6681_s4 + $0x1f8] sm:$0xff]  ;;  %v6734_v55 = vld [vmem:[#allocation9_spill] sm:$0xff]  ;;  %v607_v5 = vld [vmem:[#allocation2 + $0xe0] sm:$0xff] }
 0x269   : > { %1678 = vmatmul.f32.gmra.mxu3 %v637_v26  ;;  %2812 = vmatpush.msrb.mxu0 %v2392_v61  ;;  %v6736_v61 = vld [vmem:[#allocation10_spill] sm:$0xff] }
 0x26a   : > { %6731 = vst [vmem:[#allocation5_spill] sm:$0xff] %v4967_v23  ;;  %1797 = vmatmul.f32.gmra.mxu0 %v4644_v15  ;;  %v2408_v15 = vld [vmem:[%s6681_s4 + $0x278] sm:$0xff] }
 0x26b   : > { %v1162_v20 = vpop.f32.mrf.mxu2  ;;  %2925 = vmatpush.msrb.mxu1 %v2408_v15 }
 0x26c   : > { %v1275_v0 = vpop.f32.mrf.mxu3  ;;  %v1163_v36 = vadd.f32 %v1162_v20, %v6732_v3  ;;  %v639_v20 = vld [vmem:[#allocation2 + $0xe1] sm:$0xff] }
 0x26e   : > { %v1276_v37 = vadd.f32 %v1275_v0, %v1163_v36  ;;  %v4983_v0 = vpop.f32.mrf.mxu1  ;;  %v2359_v36 = vld [vmem:[%s6681_s4 + $0xf0] sm:$0xff] }
 0x26f   : > { %v1753_v56 = vpop.f32.mrf.mxu0  ;;  %2587 = vmatpush.msrb.mxu2 %v2359_v36 }
 0x270   : > { %1568 = vmatmul.f32.gmra.mxu2 %v606_v8  ;;  %v4973_v47 = vadd.f32 %v1388_v35, %v1276_v37 }
 0x271   : > { %1681 = vmatmul.f32.gmra.mxu3 %v638_v38 }
 0x272   : > { %6733 = vst [vmem:[#allocation6_spill] sm:$0xff] %v4973_v47  ;;  %1800 = vmatmul.f32.gmra.mxu0 %v4658_v21  ;;  %v2375_v21 = vld [vmem:[%s6681_s4 + $0x170] sm:$0xff] }
 0x273   : > { %v1165_v27 = vpop.f32.mrf.mxu2  ;;  %2700 = vmatpush.msrb.mxu3 %v2375_v21 }
 0x274   : > { %v1278_v63 = vpop.f32.mrf.mxu3  ;;  %v1166_v26 = vadd.f32 %v1165_v27, %v6734_v55  ;;  %v608_v27 = vld [vmem:[#allocation2 + $0xf0] sm:$0xff] }
 0x276   : > { %v1279_v35 = vadd.f32 %v1278_v63, %v1166_v26  ;;  %v640_v63 = vld [vmem:[#allocation2 + $0xf1] sm:$0xff] }
 0x277   : > { %v1756_v37 = vpop.f32.mrf.mxu0 }
 0x278   : > { %1571 = vmatmul.f32.gmra.mxu2 %v607_v5  ;;  %v4985_v3 = vadd.f32 %v1391_v16, %v1279_v35  ;;  %v2391_v5 = vld [vmem:[%s6681_s4 + $0x1f0] sm:$0xff] }
 0x279   : > { %1684 = vmatmul.f32.gmra.mxu3 %v639_v20  ;;  %2813 = vmatpush.msrb.mxu0 %v2391_v5  ;;  %v5003_v20 = vpop.f32.mrf.mxu1 }
 0x27a   : > { %6735 = vst [vmem:[#allocation8_spill] sm:$0xff] %v4985_v3  ;;  %1803 = vmatmul.f32.gmra.mxu0 %v4672_v52  ;;  %v2407_v52 = vld [vmem:[%s6681_s4 + $0x270] sm:$0xff] }
 0x27b   : > { %v1168_v8 = vpop.f32.mrf.mxu2  ;;  %2926 = vmatpush.msrb.mxu1 %v2407_v52 }
 0x27c   : > { %v1281_v38 = vpop.f32.mrf.mxu3  ;;  %v1169_v15 = vadd.f32 %v1168_v8, %v6736_v61  ;;  %v641_v8 = vld [vmem:[#allocation2 + $0xf9] sm:$0xff] }
 0x27d   : > { %v5010_v61 = vld [vmem:[%s6679_s2] ss:$0 sm:$0xff] }
 0x27e   : > { %v1282_v16 = vadd.f32 %v1281_v38, %v1169_v15 }
 0x27f   : > { %v1759_v55 = vpop.f32.mrf.mxu0 }
 0x280   : > { %1574 = vmatmul.f32.gmra.mxu2 %v608_v27  ;;  %v4995_v26 = vadd.f32 %v1394_v53, %v1282_v16  ;;  %v609_v53 = vld [vmem:[#allocation2 + $0xf8] sm:$0xff] }
 0x281   : > { %1687 = vmatmul.f32.gmra.mxu3 %v640_v63  ;;  %v5017_v63 = vld [vmem:[%s6680_s3] ss:$0 sm:$0xff]  ;;  %v5027_v52 = vpop.f32.mrf.mxu1 }
 0x282   : > { %6737 = vst [vmem:[#allocation9_spill] sm:$0xff] %v4995_v26  ;;  %1806 = vmatmul.f32.gmra.mxu0 %v4688_v39  ;;  %v2374_v39 = vld [vmem:[%s6681_s4 + $0x168] sm:$0xff] }
 0x283   : > { %v1527_v35 = vpop.f32.mrf.mxu2  ;;  %2701 = vmatpush.msrb.mxu3 %v2374_v39 }
 0x284   : > { %v1640_v36 = vpop.f32.mrf.mxu3  ;;  %v1528_v21 = vadd.f32 %v1527_v35, %v4680_v49  ;;  %v2358_v49 = vld [vmem:[%s6681_s4 + $0xe8] sm:$0xff] }
 0x285   : > { %2588 = vmatpush.msrb.mxu2 %v2358_v49 }
 0x286   : > { %v1641_v38 = vadd.f32 %v1640_v36, %v1528_v21  ;;  %v610_v21 = vld [vmem:[#allocation2 + $0x108] sm:$0xff] }
 0x287   : > { %v5012_v15 = vpop.f32.mrf.mxu0 }
 0x288   : > { %v1754_v27 = vadd.f32 %v1753_v56, %v1641_v38  ;;  %1577 = vmatmul.f32.gmra.mxu2 %v609_v53  ;;  %v642_v53 = vld [vmem:[#allocation2 + $0x109] sm:$0xff] }
 0x289   : > { %1690 = vmatmul.f32.gmra.mxu3 %v641_v8 }
 0x28a   : > { %v1853_v16 = vmul.f32 %v5010_v61, %v1754_v27  ;;  %1809 = vmatmul.f32.gmra.mxu0 %v4704_v59  ;;  %v2390_v27 = vld [vmem:[%s6681_s4 + $0x1e8] sm:$0xff] }
 0x28b   : > { %v1530_v56 = vpop.f32.mrf.mxu2  ;;  %2814 = vmatpush.msrb.mxu0 %v2390_v27 }
 0x28c   : > { %v1643_v5 = vpop.f32.mrf.mxu3  ;;  %v5030_v35 = vadd.f32 %v5017_v63, %v1853_v16  ;;  %v1531_v36 = vadd.f32 %v1530_v56, %v4696_v24  ;;  %v2406_v24 = vld [vmem:[%s6681_s4 + $0x268] sm:$0xff] }
 0x28d   : > { %2927 = vmatpush.msrb.mxu1 %v2406_v24 }
 0x28e   : > { %v6686_v8 = vmax.f32 %v5030_v35, 0.0  ;;  %v1644_v38 = vadd.f32 %v1643_v5, %v1531_v36  ;;  %v611_v36 = vld [vmem:[#allocation2 + $0x110] sm:$0xff] }
 0x28f   : > { %v5034_v49 = vpop.f32.mrf.mxu0 }
 0x290   : > { %2008 = vst [vmem:[#allocation3 + $0x19] sm:$0xff] %v6686_v8  ;;  %v1757_v59 = vadd.f32 %v1756_v37, %v1644_v38  ;;  %1580 = vmatmul.f32.gmra.mxu2 %v610_v21  ;;  %v643_v21 = vld [vmem:[#allocation2 + $0x111] sm:$0xff] }
 0x291   : > { %1693 = vmatmul.f32.gmra.mxu3 %v642_v53  ;;  %v5050_v53 = vpop.f32.mrf.mxu1 }
 0x292   : > { %v1854_v39 = vmul.f32 %v5010_v61, %v1757_v59  ;;  %1812 = vmatmul.f32.gmra.mxu0 %v4721_v31  ;;  %v2373_v59 = vld [vmem:[%s6681_s4 + $0x160] sm:$0xff] }
 0x293   : > { %v1533_v16 = vpop.f32.mrf.mxu2  ;;  %2702 = vmatpush.msrb.mxu3 %v2373_v59  ;;  %v2405_v59 = vld [vmem:[%s6681_s4 + $0x260] sm:$0xff] }
 0x294   : > { %v1646_v56 = vpop.f32.mrf.mxu3  ;;  %v5047_v37 = vadd.f32 %v5017_v63, %v1854_v39  ;;  %v1534_v5 = vadd.f32 %v1533_v16, %v4713_v40  ;;  %v2357_v40 = vld [vmem:[%s6681_s4 + $0xe0] sm:$0xff]  ;;  %2928 = vmatpush.msrb.mxu1 %v2405_v59 }
 0x295   : > { %2589 = vmatpush.msrb.mxu2 %v2357_v40 }
 0x296   : > { %v6687_v38 = vmax.f32 %v5047_v37, 0.0  ;;  %v1647_v8 = vadd.f32 %v1646_v56, %v1534_v5  ;;  %v612_v5 = vld [vmem:[#allocation2 + $0x120] sm:$0xff] }
 0x297   : > { %v5053_v27 = vld [vmem:[#allocation3 + $0x18] sm:$0xff]  ;;  %v5055_v24 = vpop.f32.mrf.mxu0 }
 0x298   : > { %2009 = vst [vmem:[#allocation3 + $0x21] sm:$0xff] %v6687_v38  ;;  %v1760_v31 = vadd.f32 %v1759_v55, %v1647_v8  ;;  %1583 = vmatmul.f32.gmra.mxu2 %v611_v36  ;;  %2495 = vmatmul.f32.gmra.mxu1 %v5053_v27  ;;  %v644_v36 = vld [vmem:[#allocation2 + $0x121] sm:$0xff] }
 0x299   : > { %1696 = vmatmul.f32.gmra.mxu3 %v643_v21  ;;  %v5077_v3 = vpop.f32.mrf.mxu1 }
 0x29a   : > { %v1855_v39 = vmul.f32 %v5010_v61, %v1760_v31  ;;  %1815 = vmatmul.f32.gmra.mxu0 %v4738_v54  ;;  %v678_v31 = vld [vmem:[#allocation2 + $0x13a] sm:$0xff] }
 0x29b   : > { %v1536_v16 = vpop.f32.mrf.mxu2 }
 0x29c   : > { %v1649_v55 = vpop.f32.mrf.mxu3  ;;  %v5069_v8 = vadd.f32 %v5017_v63, %v1855_v39  ;;  %v1537_v56 = vadd.f32 %v1536_v16, %v4730_v44  ;;  %v2389_v44 = vld [vmem:[%s6681_s4 + $0x1e0] sm:$0xff] }
 0x29d   : > { %2815 = vmatpush.msrb.mxu0 %v2389_v44  ;;  %v679_v44 = vld [vmem:[#allocation2 + $0x142] sm:$0xff] }
 0x29e   : > { %v6688_v21 = vmax.f32 %v5069_v8, 0.0  ;;  %v1650_v38 = vadd.f32 %v1649_v55, %v1537_v56  ;;  %v613_v56 = vld [vmem:[#allocation2 + $0x128] sm:$0xff] }
 0x29f   : > { %v5073_v26 = vld [vmem:[#allocation3 + $0x20] sm:$0xff]  ;;  %v5075_v40 = vpop.f32.mrf.mxu0 }
 0x2a0   : > { %2010 = vst [vmem:[#allocation3 + $0x31] sm:$0xff] %v6688_v21  ;;  %v1763_v54 = vadd.f32 %v5012_v15, %v1650_v38  ;;  %1586 = vmatmul.f32.gmra.mxu2 %v612_v5  ;;  %2498 = vmatmul.f32.gmra.mxu1 %v5073_v26  ;;  %v645_v5 = vld [vmem:[#allocation2 + $0x129] sm:$0xff] }
 0x2a1   : > { %1699 = vmatmul.f32.gmra.mxu3 %v644_v36  ;;  %v5109_v59 = vpop.f32.mrf.mxu1 }
 0x2a2   : > { %v1856_v39 = vmul.f32 %v5010_v61, %v1763_v54  ;;  %1818 = vmatmul.f32.gmra.mxu0 %v678_v31  ;;  %v2372_v54 = vld [vmem:[%s6681_s4 + $0x158] sm:$0xff]  ;;  %6738 = vst [vmem:[#allocation10_spill] sm:$0xff] %v5109_v59 }
 0x2a3   : > { %v1539_v16 = vpop.f32.mrf.mxu2  ;;  %2703 = vmatpush.msrb.mxu3 %v2372_v54 }
 0x2a4   : > { %v1652_v55 = vpop.f32.mrf.mxu3  ;;  %v5091_v15 = vadd.f32 %v5017_v63, %v1856_v39  ;;  %v1540_v38 = vadd.f32 %v1539_v16, %v4747_v29  ;;  %v2356_v29 = vld [vmem:[%s6681_s4 + $0xd8] sm:$0xff] }
 0x2a5   : > { %2590 = vmatpush.msrb.mxu2 %v2356_v29 }
 0x2a6   : > { %v6689_v36 = vmax.f32 %v5091_v15, 0.0  ;;  %v1653_v21 = vadd.f32 %v1652_v55, %v1540_v38  ;;  %v614_v38 = vld [vmem:[#allocation2 + $0x138] sm:$0xff] }
 0x2a7   : > { %v5095_v47 = vld [vmem:[#allocation3 + $0x30] sm:$0xff]  ;;  %v5097_v23 = vpop.f32.mrf.mxu0 }
 0x2a8   : > { %2011 = vst [vmem:[#allocation3 + $0x39] sm:$0xff] %v6689_v36  ;;  %v1766_v31 = vadd.f32 %v5034_v49, %v1653_v21  ;;  %1589 = vmatmul.f32.gmra.mxu2 %v613_v56  ;;  %2501 = vmatmul.f32.gmra.mxu1 %v5095_v47  ;;  %v646_v56 = vld [vmem:[#allocation2 + $0x139] sm:$0xff] }
 0x2a9   : > { %1702 = vmatmul.f32.gmra.mxu3 %v645_v5 }
 0x2aa   : > { %v1857_v39 = vmul.f32 %v5010_v61, %v1766_v31  ;;  %1821 = vmatmul.f32.gmra.mxu0 %v679_v44  ;;  %v2404_v31 = vld [vmem:[%s6681_s4 + $0x258] sm:$0xff] }
 0x2ab   : > { %v1542_v49 = vpop.f32.mrf.mxu2  ;;  %2929 = vmatpush.msrb.mxu1 %v2404_v31  ;;  %v2371_v31 = vld [vmem:[%s6681_s4 + $0x150] sm:$0xff] }
 0x2ac   : > { %v1655_v21 = vpop.f32.mrf.mxu3  ;;  %v5113_v16 = vadd.f32 %v5017_v63, %v1857_v39  ;;  %v1543_v55 = vadd.f32 %v1542_v49, %v4764_v6  ;;  %v2388_v6 = vld [vmem:[%s6681_s4 + $0x1d8] sm:$0xff]  ;;  %2704 = vmatpush.msrb.mxu3 %v2371_v31  ;;  %v2403_v31 = vld [vmem:[%s6681_s4 + $0x250] sm:$0xff] }
 0x2ad   : > { %2816 = vmatpush.msrb.mxu0 %v2388_v6  ;;  %2930 = vmatpush.msrb.mxu1 %v2403_v31  ;;  %v2370_v31 = vld [vmem:[%s6681_s4 + $0x148] sm:$0xff] }
 0x2ae   : > { %v6690_v5 = vmax.f32 %v5113_v16, 0.0  ;;  %v1656_v36 = vadd.f32 %v1655_v21, %v1543_v55  ;;  %v615_v55 = vld [vmem:[#allocation2 + $0x140] sm:$0xff]  ;;  %2705 = vmatpush.msrb.mxu3 %v2370_v31 }
 0x2af   : > { %v5117_v13 = vld [vmem:[#allocation3 + $0x38] sm:$0xff]  ;;  %v5119_v29 = vpop.f32.mrf.mxu0 }
 0x2b0   : > { %2012 = vst [vmem:[#allocation3 + $0x49] sm:$0xff] %v6690_v5  ;;  %v1769_v44 = vadd.f32 %v5055_v24, %v1656_v36  ;;  %1592 = vmatmul.f32.gmra.mxu2 %v614_v38  ;;  %2504 = vmatmul.f32.gmra.mxu1 %v5117_v13  ;;  %v5132_v24 = vpop.f32.mrf.mxu1  ;;  %v647_v38 = vld [vmem:[#allocation2 + $0x141] sm:$0xff] }
 0x2b1   : > { %1705 = vmatmul.f32.gmra.mxu3 %v646_v56  ;;  %6739 = vst [vmem:[#allocation13_spill] sm:$0xff] %v5132_v24 }
 0x2b2   : > { %v1858_v54 = vmul.f32 %v5010_v61, %v1769_v44  ;;  %1824 = vmatmul.f32.gmra.mxu0 %v680_v58  ;;  %v681_v58 = vld [vmem:[#allocation2 + $0x15a] sm:$0xff] }
 0x2b3   : > { %v1545_v39 = vpop.f32.mrf.mxu2 }
 0x2b4   : > { %v1658_v49 = vpop.f32.mrf.mxu3  ;;  %v5135_v36 = vadd.f32 %v5017_v63, %v1858_v54  ;;  %v1546_v21 = vadd.f32 %v1545_v39, %v4781_v10  ;;  %v2355_v10 = vld [vmem:[%s6681_s4 + $0xd0] sm:$0xff] }
 0x2b5   : > { %2591 = vmatpush.msrb.mxu2 %v2355_v10 }
 0x2b6   : > { %v6691_v56 = vmax.f32 %v5135_v36, 0.0  ;;  %v1659_v5 = vadd.f32 %v1658_v49, %v1546_v21  ;;  %v616_v21 = vld [vmem:[#allocation2 + $0x150] sm:$0xff] }
 0x2b7   : > { %v5139_v30 = vld [vmem:[#allocation3 + $0x48] sm:$0xff]  ;;  %v5141_v6 = vpop.f32.mrf.mxu0 }
 0x2b8   : > { %2013 = vst [vmem:[#allocation3 + $0x51] sm:$0xff] %v6691_v56  ;;  %v1772_v44 = vadd.f32 %v5075_v40, %v1659_v5  ;;  %1595 = vmatmul.f32.gmra.mxu2 %v615_v55  ;;  %2507 = vmatmul.f32.gmra.mxu1 %v5139_v30  ;;  %v648_v55 = vld [vmem:[#allocation2 + $0x151] sm:$0xff] }
 0x2b9   : > { %1708 = vmatmul.f32.gmra.mxu3 %v647_v38  ;;  %v5158_v38 = vpop.f32.mrf.mxu1 }
 0x2ba   : > { %v1859_v54 = vmul.f32 %v5010_v61, %v1772_v44  ;;  %1827 = vmatmul.f32.gmra.mxu0 %v681_v58  ;;  %6741 = vst [vmem:[#allocation15_spill] sm:$0xff] %v5158_v38  ;;  %v682_v58 = vld [vmem:[#allocation2 + $0x16a] sm:$0xff] }
 0x2bb   : > { %v1548_v39 = vpop.f32.mrf.mxu2 }
 0x2bc   : > { %v1661_v49 = vpop.f32.mrf.mxu3  ;;  %v5155_v40 = vadd.f32 %v5017_v63, %v1859_v54  ;;  %v1549_v5 = vadd.f32 %v1548_v39, %v4798_v32  ;;  %v2387_v32 = vld [vmem:[%s6681_s4 + $0x1d0] sm:$0xff]  ;;  %v1439_v54 = vadd.f32 %v4889_v45, %v4811_v2 }
 0x2bd   : > { %2817 = vmatpush.msrb.mxu0 %v2387_v32  ;;  %v683_v2 = vld [vmem:[#allocation2 + $0x172] sm:$0xff] }
 0x2be   : > { %6740 = vst [vmem:[#allocation14_spill] sm:$0xff] %v5155_v40  ;;  %v6692_v56 = vmax.f32 %v5155_v40, 0.0  ;;  %v1662_v24 = vadd.f32 %v1661_v49, %v1549_v5 }
 0x2bf   : > { %v5161_v59 = vld [vmem:[#allocation3 + $0x50] sm:$0xff]  ;;  %v5163_v10 = vpop.f32.mrf.mxu0 }
 0x2c0   : > { %2014 = vst [vmem:[#allocation3 + $0x61] sm:$0xff] %v6692_v56  ;;  %v1775_v44 = vadd.f32 %v5097_v23, %v1662_v24  ;;  %1598 = vmatmul.f32.gmra.mxu2 %v616_v21  ;;  %2510 = vmatmul.f32.gmra.mxu1 %v5161_v59  ;;  %v617_v21 = vld [vmem:[#allocation2 + $0x158] sm:$0xff] }
 0x2c1   : > { %1711 = vmatmul.f32.gmra.mxu3 %v648_v55  ;;  %v649_v55 = vld [vmem:[#allocation2 + $0x159] sm:$0xff]  ;;  %v5186_v45 = vpop.f32.mrf.mxu1 }
 0x2c2   : > { %v1860_v39 = vmul.f32 %v5010_v61, %v1775_v44  ;;  %1830 = vmatmul.f32.gmra.mxu0 %v682_v58  ;;  %v2354_v44 = vld [vmem:[%s6681_s4 + $0xc8] sm:$0xff] }
 0x2c3   : > { %v1551_v23 = vpop.f32.mrf.mxu2  ;;  %2592 = vmatpush.msrb.mxu2 %v2354_v44 }
 0x2c4   : > { %v1664_v24 = vpop.f32.mrf.mxu3  ;;  %v5179_v49 = vadd.f32 %v5017_v63, %v1860_v39  ;;  %v1552_v5 = vadd.f32 %v1551_v23, %v1439_v54  ;;  %v1442_v54 = vadd.f32 %v4898_v60, %v4828_v11 }
 0x2c6   : > { %v6694_v56 = vmax.f32 %v5179_v49, 0.0  ;;  %v1665_v38 = vadd.f32 %v1664_v24, %v1552_v5  ;;  %v618_v5 = vld [vmem:[#allocation2 + $0x168] sm:$0xff] }
 0x2c7   : > { %v5182_v40 = vld [vmem:[#allocation3 + $0x60] sm:$0xff]  ;;  %v5184_v32 = vpop.f32.mrf.mxu0 }
 0x2c8   : > { %2015 = vst [vmem:[#allocation3 + $0x69] sm:$0xff] %v6694_v56  ;;  %v1778_v58 = vadd.f32 %v5119_v29, %v1665_v38  ;;  %1601 = vmatmul.f32.gmra.mxu2 %v617_v21  ;;  %2513 = vmatmul.f32.gmra.mxu1 %v5182_v40  ;;  %v650_v21 = vld [vmem:[#allocation2 + $0x169] sm:$0xff] }
 0x2c9   : > { %1714 = vmatmul.f32.gmra.mxu3 %v649_v55  ;;  %v2386_v55 = vld [vmem:[%s6681_s4 + $0x1c8] sm:$0xff] }
 0x2ca   : > { %v1861_v39 = vmul.f32 %v5010_v61, %v1778_v58  ;;  %1833 = vmatmul.f32.gmra.mxu0 %v683_v2  ;;  %v684_v2 = vld [vmem:[#allocation2 + $0x182] sm:$0xff] }
 0x2cb   : > { %v1554_v29 = vpop.f32.mrf.mxu2  ;;  %2818 = vmatpush.msrb.mxu0 %v2386_v55  ;;  %v2353_v58 = vld [vmem:[%s6681_s4 + $0xc0] sm:$0xff] }
 0x2cc   : > { %v1667_v38 = vpop.f32.mrf.mxu3  ;;  %v5202_v23 = vadd.f32 %v5017_v63, %v1861_v39  ;;  %v1555_v24 = vadd.f32 %v1554_v29, %v1442_v54  ;;  %v2402_v54 = vld [vmem:[%s6681_s4 + $0x248] sm:$0xff]  ;;  %v2369_v39 = vld [vmem:[%s6681_s4 + $0x140] sm:$0xff]  ;;  %2593 = vmatpush.msrb.mxu2 %v2353_v58 }
 0x2cd   : > { %v2385_v29 = vld [vmem:[%s6681_s4 + $0x1c0] sm:$0xff]  ;;  %2931 = vmatpush.msrb.mxu1 %v2402_v54  ;;  %2706 = vmatpush.msrb.mxu3 %v2369_v39  ;;  %v2383_v54 = vld [vmem:[%s6681_s4 + $0x1b0] sm:$0xff] }
 0x2ce   : > { %v6695_v44 = vmax.f32 %v5202_v23, 0.0  ;;  %v1668_v56 = vadd.f32 %v1667_v38, %v1555_v24  ;;  %v5233_v38 = vpop.f32.mrf.mxu1  ;;  %2819 = vmatpush.msrb.mxu0 %v2385_v29  ;;  %v651_v39 = vld [vmem:[#allocation2 + $0x171] sm:$0xff] }
 0x2cf   : > { %v5208_v11 = vld [vmem:[#allocation3 + $0x68] sm:$0xff]  ;;  %v5210_v60 = vpop.f32.mrf.mxu0  ;;  %6742 = vst [vmem:[#allocation16_spill] sm:$0xff] %v5233_v38 }
 0x2d0   : > { %2016 = vst [vmem:[#allocation3 + $0x79] sm:$0xff] %v6695_v44  ;;  %v1781_v31 = vadd.f32 %v5141_v6, %v1668_v56  ;;  %1604 = vmatmul.f32.gmra.mxu2 %v618_v5  ;;  %2516 = vmatmul.f32.gmra.mxu1 %v5208_v11  ;;  %v2352_v56 = vld [vmem:[%s6681_s4 + $0xb8] sm:$0xff]  ;;  %v1445_v6 = vadd.f32 %v4903_v22, %v4842_v9  ;;  %v2351_v9 = vld [vmem:[%s6681_s4 + $0xb0] sm:$0xff] }
 0x2d1   : > { %1717 = vmatmul.f32.gmra.mxu3 %v650_v21  ;;  %v2368_v5 = vld [vmem:[%s6681_s4 + $0x138] sm:$0xff]  ;;  %2594 = vmatpush.msrb.mxu2 %v2352_v56  ;;  %v619_v44 = vld [vmem:[#allocation2 + $0x170] sm:$0xff]  ;;  %v2350_v56 = vld [vmem:[%s6681_s4 + $0xa8] sm:$0xff] }
 0x2d2   : > { %v1862_v24 = vmul.f32 %v5010_v61, %v1781_v31  ;;  %1836 = vmatmul.f32.gmra.mxu0 %v684_v2  ;;  %v2384_v21 = vld [vmem:[%s6681_s4 + $0x1b8] sm:$0xff]  ;;  %v2367_v31 = vld [vmem:[%s6681_s4 + $0x130] sm:$0xff]  ;;  %2707 = vmatpush.msrb.mxu3 %v2368_v5  ;;  %v2366_v5 = vld [vmem:[%s6681_s4 + $0x128] sm:$0xff] }
 0x2d3   : > { %v1557_v55 = vpop.f32.mrf.mxu2  ;;  %2820 = vmatpush.msrb.mxu0 %v2384_v21  ;;  %2595 = vmatpush.msrb.mxu2 %v2351_v9  ;;  %v2349_v9 = vld [vmem:[%s6681_s4 + $0xa0] sm:$0xff] }
 0x2d4   : > { %v1670_v58 = vpop.f32.mrf.mxu3  ;;  %v5246_v22 = vadd.f32 %v5017_v63, %v1862_v24  ;;  %v1558_v2 = vadd.f32 %v1557_v55, %v1445_v6  ;;  %v685_v55 = vld [vmem:[#allocation2 + $0x18a] sm:$0xff]  ;;  %2708 = vmatpush.msrb.mxu3 %v2367_v31  ;;  %v2348_v31 = vld [vmem:[%s6681_s4 + $0x98] sm:$0xff] }
 0x2d5   : > { %2821 = vmatpush.msrb.mxu0 %v2383_v54  ;;  %2596 = vmatpush.msrb.mxu2 %v2350_v56 }
 0x2d6   : > { %6743 = vst [vmem:[#allocation17_spill] sm:$0xff] %v5246_v22  ;;  %v6696_v29 = vmax.f32 %v5246_v22, 0.0  ;;  %v1671_v38 = vadd.f32 %v1670_v58, %v1558_v2  ;;  %v2382_v58 = vld [vmem:[%s6681_s4 + $0x1a8] sm:$0xff]  ;;  %v2365_v2 = vld [vmem:[%s6681_s4 + $0x120] sm:$0xff]  ;;  %2709 = vmatpush.msrb.mxu3 %v2366_v5  ;;  %v2380_v5 = vld [vmem:[%s6681_s4 + $0x198] sm:$0xff] }
 0x2d7   : > { %v5258_v6 = vld [vmem:[#allocation3 + $0x78] sm:$0xff]  ;;  %v5260_v24 = vpop.f32.mrf.mxu0  ;;  %2822 = vmatpush.msrb.mxu0 %v2382_v58  ;;  %2597 = vmatpush.msrb.mxu2 %v2349_v9  ;;  %v620_v58 = vld [vmem:[#allocation2 + $0x180] sm:$0xff] }
 0x2d8   : > { %2017 = vst [vmem:[#allocation3 + $0x81] sm:$0xff] %v6696_v29  ;;  %v1784_v21 = vadd.f32 %v5163_v10, %v1671_v38  ;;  %1607 = vmatmul.f32.gmra.mxu2 %v619_v44  ;;  %2519 = vmatmul.f32.gmra.mxu1 %v5258_v6  ;;  %v1448_v10 = vadd.f32 %v4913_v34, %v4854_v33  ;;  %v2381_v38 = vld [vmem:[%s6681_s4 + $0x1a0] sm:$0xff]  ;;  %v2364_v33 = vld [vmem:[%s6681_s4 + $0x118] sm:$0xff]  ;;  %v5290_v34 = vpop.f32.mrf.mxu1 }
 0x2d9   : > { %1720 = vmatmul.f32.gmra.mxu3 %v651_v39  ;;  %6744 = vst [vmem:[#allocation18_spill] sm:$0xff] %v5290_v34  ;;  %v652_v9 = vld [vmem:[#allocation2 + $0x181] sm:$0xff]  ;;  %2823 = vmatpush.msrb.mxu0 %v2381_v38 }
 0x2da   : > { %v1863_v44 = vmul.f32 %v5010_v61, %v1784_v21  ;;  %1839 = vmatmul.f32.gmra.mxu0 %v685_v55  ;;  %2710 = vmatpush.msrb.mxu3 %v2365_v2  ;;  %v2347_v21 = vld [vmem:[%s6681_s4 + $0x90] sm:$0xff]  ;;  %v687_v22 = vld [vmem:[#allocation2 + $0x1a2] sm:$0xff] }
 0x2db   : > { %v1560_v54 = vpop.f32.mrf.mxu2  ;;  %2598 = vmatpush.msrb.mxu2 %v2348_v31  ;;  %v2363_v2 = vld [vmem:[%s6681_s4 + $0x110] sm:$0xff]  ;;  %2824 = vmatpush.msrb.mxu0 %v2380_v5  ;;  %v2401_v31 = vld [vmem:[%s6681_s4 + $0x240] sm:$0xff]  ;;  %v2378_v5 = vld [vmem:[%s6681_s4 + $0x188] sm:$0xff] }
 0x2dc   : > { %v1673_v39 = vpop.f32.mrf.mxu3  ;;  %v5293_v56 = vadd.f32 %v5017_v63, %v1863_v44  ;;  %v1561_v55 = vadd.f32 %v1560_v54, %v1448_v10  ;;  %2711 = vmatpush.msrb.mxu3 %v2364_v33  ;;  %v686_v54 = vld [vmem:[#allocation2 + $0x19a] sm:$0xff]  ;;  %v2346_v33 = vld [vmem:[%s6681_s4 + $0x88] sm:$0xff]  ;;  %2932 = vmatpush.msrb.mxu1 %v2401_v31 }
 0x2dd   : > { %2599 = vmatpush.msrb.mxu2 %v2347_v21  ;;  %v2345_v21 = vld [vmem:[%s6681_s4 + $0x80] sm:$0xff]  ;;  %v653_v31 = vld [vmem:[#allocation2 + $0x189] sm:$0xff] }
 0x2de   : > { %6745 = vst [vmem:[#allocation19_spill] sm:$0xff] %v5293_v56  ;;  %v6697_v29 = vmax.f32 %v5293_v56, 0.0  ;;  %v1674_v34 = vadd.f32 %v1673_v39, %v1561_v55  ;;  %v2379_v39 = vld [vmem:[%s6681_s4 + $0x190] sm:$0xff]  ;;  %2712 = vmatpush.msrb.mxu3 %v2363_v2 }
 0x2df   : > { %v5305_v10 = vld [vmem:[#allocation3 + $0x80] sm:$0xff]  ;;  %v5307_v44 = vpop.f32.mrf.mxu0  ;;  %2825 = vmatpush.msrb.mxu0 %v2379_v39  ;;  %2600 = vmatpush.msrb.mxu2 %v2346_v33 }
 0x2e0   : > { %2018 = vst [vmem:[#allocation3 + $0x91] sm:$0xff] %v6697_v29  ;;  %v1787_v38 = vadd.f32 %v5184_v32, %v1674_v34  ;;  %1610 = vmatmul.f32.gmra.mxu2 %v620_v58  ;;  %2522 = vmatmul.f32.gmra.mxu1 %v5305_v10  ;;  %v2362_v32 = vld [vmem:[%s6681_s4 + $0x108] sm:$0xff]  ;;  %v1451_v34 = vadd.f32 %v4921_v46, %v4859_v41  ;;  %v2361_v41 = vld [vmem:[%s6681_s4 + $0x100] sm:$0xff]  ;;  %v5343_v29 = vpop.f32.mrf.mxu1 }
 0x2e1   : > { %1723 = vmatmul.f32.gmra.mxu3 %v652_v9  ;;  %2826 = vmatpush.msrb.mxu0 %v2378_v5 }
 0x2e2   : > { %v1864_v55 = vmul.f32 %v5010_v61, %v1787_v38  ;;  %1842 = vmatmul.f32.gmra.mxu0 %v686_v54  ;;  %2713 = vmatpush.msrb.mxu3 %v2362_v32  ;;  %v2377_v54 = vld [vmem:[%s6681_s4 + $0x180] sm:$0xff]  ;;  %v621_v38 = vld [vmem:[#allocation2 + $0x188] sm:$0xff] }
 0x2e3   : > { %v1563_v58 = vpop.f32.mrf.mxu2  ;;  %2601 = vmatpush.msrb.mxu2 %v2345_v21  ;;  %2827 = vmatpush.msrb.mxu0 %v2377_v54 }
 0x2e4   : > { %v1676_v9 = vpop.f32.mrf.mxu3  ;;  %v5338_v46 = vadd.f32 %v5017_v63, %v1864_v55  ;;  %v1564_v2 = vadd.f32 %v1563_v58, %v1451_v34  ;;  %2714 = vmatpush.msrb.mxu3 %v2361_v41  ;;  %v1454_v34 = vadd.f32 %v4927_v42, %v4867_v17  ;;  %v2400_v42 = vld [vmem:[%s6681_s4 + $0x238] sm:$0xff] }
 0x2e5   : > { %2933 = vmatpush.msrb.mxu1 %v2400_v42 }
 0x2e6   : > { %v1932_v39 = vmax.f32 %v5338_v46, 0.0  ;;  %v1677_v33 = vadd.f32 %v1676_v9, %v1564_v2  ;;  %v654_v2 = vld [vmem:[#allocation2 + $0x199] sm:$0xff] }
 0x2e7   : > { %v5346_v56 = vld [vmem:[#allocation3 + $0x90] sm:$0xff]  ;;  %v1798_v55 = vpop.f32.mrf.mxu0  ;;  %v2472_v46 = vld [vmem:[%s6681_s4 + $0x478] sm:$0xff] }
 0x2e8   : > { %2019 = vst [vmem:[#allocation3 + $0x99] sm:$0xff] %v1932_v39  ;;  %v1790_v32 = vadd.f32 %v5210_v60, %v1677_v33  ;;  %1613 = vmatmul.f32.gmra.mxu2 %v621_v38  ;;  %2525 = vmatmul.f32.gmra.mxu1 %v5346_v56  ;;  %v5361_v33 = vpop.f32.mrf.mxu1 }
 0x2e9   : > { %1726 = vmatmul.f32.gmra.mxu3 %v653_v31 }
 0x2ea   : > { %v1865_v5 = vmul.f32 %v5010_v61, %v1790_v32  ;;  %1845 = vmatmul.f32.gmra.mxu0 %v687_v22  ;;  %v1457_v22 = vadd.f32 %v4936_v4, %v4871_v28  ;;  %v1460_v4 = vadd.f32 %v4947_v50, %v4878_v62 }
 0x2eb   : > { %v1566_v21 = vpop.f32.mrf.mxu2 }
 0x2ec   : > { %v1679_v58 = vpop.f32.mrf.mxu3  ;;  %v5356_v9 = vadd.f32 %v5017_v63, %v1865_v5  ;;  %v1567_v41 = vadd.f32 %v1566_v21, %v1454_v34 }
 0x2ee   : > { %v6700_v54 = vmax.f32 %v5356_v9, 0.0  ;;  %v1680_v60 = vadd.f32 %v1679_v58, %v1567_v41  ;;  %v655_v58 = vld [vmem:[#allocation2 + $0x1a1] sm:$0xff] }
 0x2ef   : > { %v5359_v38 = vld [vmem:[#allocation3 + $0x98] sm:$0xff]  ;;  %v1801_v31 = vpop.f32.mrf.mxu0 }
 0x2f0   : > { %2020 = vst [vmem:[#allocation3 + $0xa9] sm:$0xff] %v6700_v54  ;;  %v1793_v17 = vadd.f32 %v5260_v24, %v1680_v60  ;;  %1616 = vmatmul.f32.gmra.mxu2 %v4950_v12  ;;  %2528 = vmatmul.f32.gmra.mxu1 %v5359_v38 }
 0x2f1   : > { %1729 = vmatmul.f32.gmra.mxu3 %v654_v2 }
 0x2f2   : > { %v1866_v32 = vmul.f32 %v5010_v61, %v1793_v17  ;;  %2828 = vmatmul.f32.vlgmr.msrb.gmra.mxu0 %v5053_v27  ;;  %v5388_v27 = vpop.f32.mrf.mxu1 }
 0x2f3   : > { %v1569_v34 = vpop.f32.mrf.mxu2 }
 0x2f4   : > { %v1682_v5 = vpop.f32.mrf.mxu3  ;;  %v5376_v24 = vadd.f32 %v5017_v63, %v1866_v32  ;;  %v1570_v21 = vadd.f32 %v1569_v34, %v1457_v22  ;;  %v2072_v34 = vld [vmem:[#allocation3 + $0x1] sm:$0xff] }
 0x2f6   : > { %v6714_v41 = vmax.f32 %v5376_v24, 0.0  ;;  %v1683_v2 = vadd.f32 %v1682_v5, %v1570_v21 }
 0x2f7   : > { %v5379_v60 = vld [vmem:[#allocation3 + $0xa8] sm:$0xff]  ;;  %v1804_v54 = vpop.f32.mrf.mxu0 }
 0x2f8   : > { %2021 = vst [vmem:[#allocation3 + $0xb1] sm:$0xff] %v6714_v41  ;;  %v1796_v28 = vadd.f32 %v5307_v44, %v1683_v2  ;;  %1619 = vmatmul.f32.gmra.mxu2 %v4950_v12  ;;  %2531 = vmatmul.f32.gmra.mxu1 %v5379_v60  ;;  %v2104_v12 = vld [vmem:[#allocation3 + $0x2] sm:$0xff]  ;;  %v1463_v2 = vadd.f32 %v4964_v18, %v4881_v14  ;;  %v2117_v41 = vld [vmem:[#allocation3 + $0x9a] sm:$0xff] }
 0x2f9   : > { %1732 = vmatmul.f32.gmra.mxu3 %v655_v58 }
 0x2fa   : > { %v1867_v17 = vmul.f32 %v5010_v61, %v1796_v28  ;;  %2831 = vmatmul.f32.gmra.mxu0 %v5073_v26  ;;  %v2399_v26 = vld [vmem:[%s6681_s4 + $0x230] sm:$0xff] }
 0x2fb   : > { %v1572_v42 = vpop.f32.mrf.mxu2  ;;  %2934 = vmatpush.msrb.mxu1 %v2399_v26 }
 0x2fc   : > { %v1685_v22 = vpop.f32.mrf.mxu3  ;;  %v5393_v32 = vadd.f32 %v5017_v63, %v1867_v17  ;;  %v1573_v44 = vadd.f32 %v1572_v42, %v1460_v4  ;;  %v5407_v4 = vpop.f32.mrf.mxu1 }
 0x2fe   : > { %v6701_v5 = vmax.f32 %v5393_v32, 0.0  ;;  %v1686_v21 = vadd.f32 %v1685_v22, %v1573_v44  ;;  %v2073_v44 = vld [vmem:[#allocation3 + $0x9] sm:$0xff] }
 0x2ff   : > { %v5396_v58 = vld [vmem:[#allocation3 + $0xb0] sm:$0xff]  ;;  %v1807_v62 = vpop.f32.mrf.mxu0 }
 0x300   : > { %2022 = vst [vmem:[#allocation3 + $0xc1] sm:$0xff] %v6701_v5  ;;  %v1799_v50 = vadd.f32 %v1798_v55, %v1686_v21  ;;  %2602 = vmatmul.f32.vlgmr.msrb.gmra.mxu2 %v2072_v34  ;;  %2534 = vmatmul.f32.gmra.mxu1 %v5396_v58  ;;  %v2105_v34 = vld [vmem:[#allocation3 + $0xa] sm:$0xff] }
 0x301   : > { %2715 = vmatmul.f32.vlgmr.msrb.gmra.mxu3 %v2104_v12 }
 0x302   : > { %v1868_v28 = vmul.f32 %v5010_v61, %v1799_v50  ;;  %2834 = vmatmul.f32.gmra.mxu0 %v5095_v47  ;;  %v1466_v47 = vadd.f32 %v4971_v57, %v4887_v1  ;;  %v2398_v57 = vld [vmem:[%s6681_s4 + $0x228] sm:$0xff] }
 0x303   : > { %v1575_v17 = vpop.f32.mrf.mxu2  ;;  %2935 = vmatpush.msrb.mxu1 %v2398_v57 }
 0x304   : > { %v1688_v55 = vpop.f32.mrf.mxu3  ;;  %v5411_v42 = vadd.f32 %v5017_v63, %v1868_v28  ;;  %v1576_v22 = vadd.f32 %v1575_v17, %v1463_v2 }
 0x306   : > { %v6713_v12 = vmax.f32 %v5411_v42, 0.0  ;;  %v1689_v21 = vadd.f32 %v1688_v55, %v1576_v22  ;;  %v5426_v55 = vpop.f32.mrf.mxu1 }
 0x307   : > { %v5414_v5 = vld [vmem:[#allocation3 + $0xc0] sm:$0xff]  ;;  %v1810_v14 = vpop.f32.mrf.mxu0 }
 0x308   : > { %2023 = vst [vmem:[#allocation3 + $0xc9] sm:$0xff] %v6713_v12  ;;  %v1802_v18 = vadd.f32 %v1801_v31, %v1689_v21  ;;  %2605 = vmatmul.f32.gmra.mxu2 %v2073_v44  ;;  %2537 = vmatmul.f32.gmra.mxu1 %v5414_v5 }
 0x309   : > { %2718 = vmatmul.f32.gmra.mxu3 %v2105_v34  ;;  %v2106_v34 = vld [vmem:[#allocation3 + $0x1a] sm:$0xff] }
 0x30a   : > { %v1869_v50 = vmul.f32 %v5010_v61, %v1802_v18  ;;  %2837 = vmatmul.f32.gmra.mxu0 %v5117_v13  ;;  %v6746_v13 = vmax.f32 %v5030_v35, 0.0  ;;  %v1469_v18 = vadd.f32 %v4983_v0, %v4892_v48  ;;  %v6747_v0 = vmax.f32 %v5047_v37, 0.0 }
 0x30b   : > { %v1578_v26 = vpop.f32.mrf.mxu2 }
 0x30c   : > { %v1691_v2 = vpop.f32.mrf.mxu3  ;;  %v5424_v28 = vadd.f32 %v5017_v63, %v1869_v50  ;;  %v1579_v17 = vadd.f32 %v1578_v26, %v1466_v47 }
 0x30e   : > { %v6711_v31 = vmax.f32 %v5424_v28, 0.0  ;;  %v1692_v22 = vadd.f32 %v1691_v2, %v1579_v17 }
 0x30f   : > { %v5429_v44 = vld [vmem:[#allocation3 + $0xc8] sm:$0xff]  ;;  %v1813_v21 = vpop.f32.mrf.mxu0 }
 0x310   : > { %2024 = vst [vmem:[#allocation3 + $0xd9] sm:$0xff] %v6711_v31  ;;  %v1805_v1 = vadd.f32 %v1804_v54, %v1692_v22  ;;  %2608 = vmatmul.f32.gmra.mxu2 %v6746_v13  ;;  %2540 = vmatmul.f32.gmra.mxu1 %v5429_v44  ;;  %v2107_v13 = vld [vmem:[#allocation3 + $0x22] sm:$0xff] }
 0x311   : > { %2721 = vmatmul.f32.gmra.mxu3 %v2106_v34 }
 0x312   : > { %v1870_v47 = vmul.f32 %v5010_v61, %v1805_v1  ;;  %2840 = vmatmul.f32.gmra.mxu0 %v5139_v30  ;;  %v1472_v1 = vadd.f32 %v5003_v20, %v4900_v43  ;;  %v6748_v20 = vmax.f32 %v5069_v8, 0.0 }
 0x313   : > { %v1581_v50 = vpop.f32.mrf.mxu2 }
 0x314   : > { %v1694_v54 = vpop.f32.mrf.mxu3  ;;  %v5444_v35 = vadd.f32 %v5017_v63, %v1870_v47  ;;  %v1582_v26 = vadd.f32 %v1581_v50, %v1469_v18 }
 0x315   : > { %v5447_v22 = vpop.f32.mrf.mxu1 }
 0x316   : > { %v6709_v2 = vmax.f32 %v5444_v35, 0.0  ;;  %v1695_v17 = vadd.f32 %v1694_v54, %v1582_v26 }
 0x317   : > { %v5449_v34 = vld [vmem:[#allocation3 + $0xd8] sm:$0xff]  ;;  %v1816_v48 = vpop.f32.mrf.mxu0 }
 0x318   : > { %2025 = vst [vmem:[#allocation3 + $0xe1] sm:$0xff] %v6709_v2  ;;  %v1808_v30 = vadd.f32 %v1807_v62, %v1695_v17  ;;  %2611 = vmatmul.f32.gmra.mxu2 %v6747_v0  ;;  %2543 = vmatmul.f32.gmra.mxu1 %v5449_v34 }
 0x319   : > { %2724 = vmatmul.f32.gmra.mxu3 %v2107_v13  ;;  %v2108_v13 = vld [vmem:[#allocation3 + $0x32] sm:$0xff] }
 0x31a   : > { %v1871_v57 = vmul.f32 %v5010_v61, %v1808_v30  ;;  %2843 = vmatmul.f32.gmra.mxu0 %v5161_v59  ;;  %v2397_v59 = vld [vmem:[%s6681_s4 + $0x220] sm:$0xff]  ;;  %v1475_v30 = vadd.f32 %v5027_v52, %v4905_v25 }
 0x31b   : > { %v1584_v18 = vpop.f32.mrf.mxu2  ;;  %2936 = vmatpush.msrb.mxu1 %v2397_v59 }
 0x31c   : > { %v1697_v47 = vpop.f32.mrf.mxu3  ;;  %v5461_v50 = vadd.f32 %v5017_v63, %v1871_v57  ;;  %v1585_v54 = vadd.f32 %v1584_v18, %v1472_v1 }
 0x31d   : > { %v5464_v26 = vpop.f32.mrf.mxu1 }
 0x31e   : > { %v6707_v62 = vmax.f32 %v5461_v50, 0.0  ;;  %v1698_v37 = vadd.f32 %v1697_v47, %v1585_v54 }
 0x31f   : > { %v5466_v17 = vld [vmem:[#allocation3 + $0xe0] sm:$0xff]  ;;  %v1819_v0 = vpop.f32.mrf.mxu0 }
 0x320   : > { %2026 = vst [vmem:[#allocation3 + $0xf1] sm:$0xff] %v6707_v62  ;;  %v1811_v43 = vadd.f32 %v1810_v14, %v1698_v37  ;;  %2614 = vmatmul.f32.gmra.mxu2 %v6748_v20  ;;  %2546 = vmatmul.f32.gmra.mxu1 %v5466_v17  ;;  %v2109_v20 = vld [vmem:[#allocation3 + $0x3a] sm:$0xff] }
 0x321   : > { %2727 = vmatmul.f32.gmra.mxu3 %v2108_v13 }
 0x322   : > { %v1872_v1 = vmul.f32 %v5010_v61, %v1811_v43  ;;  %2846 = vmatmul.f32.gmra.mxu0 %v5182_v40  ;;  %v6749_v40 = vmax.f32 %v5091_v15, 0.0  ;;  %v1478_v43 = vadd.f32 %v5050_v53, %v4911_v7  ;;  %v6750_v53 = vmax.f32 %v5113_v16, 0.0 }
 0x323   : > { %v1587_v57 = vpop.f32.mrf.mxu2 }
 0x324   : > { %v1700_v14 = vpop.f32.mrf.mxu3  ;;  %v5481_v8 = vadd.f32 %v5017_v63, %v1872_v1  ;;  %v1588_v18 = vadd.f32 %v1587_v57, %v1475_v30 }
 0x325   : > { %v5484_v37 = vpop.f32.mrf.mxu1 }
 0x326   : > { %v6705_v47 = vmax.f32 %v5481_v8, 0.0  ;;  %v1701_v54 = vadd.f32 %v1700_v14, %v1588_v18 }
 0x327   : > { %v5486_v13 = vld [vmem:[#allocation3 + $0xf0] sm:$0xff]  ;;  %v1822_v25 = vpop.f32.mrf.mxu0 }
 0x328   : > { %2027 = vst [vmem:[#allocation3 + $0xf9] sm:$0xff] %v6705_v47  ;;  %v1814_v52 = vadd.f32 %v1813_v21, %v1701_v54  ;;  %2617 = vmatmul.f32.gmra.mxu2 %v6749_v40  ;;  %2549 = vmatmul.f32.gmra.mxu1 %v5486_v13  ;;  %v2113_v47 = vld [vmem:[#allocation3 + $0x6a] sm:$0xff] }
 0x329   : > { %2730 = vmatmul.f32.gmra.mxu3 %v2109_v20  ;;  %v2110_v20 = vld [vmem:[#allocation3 + $0x4a] sm:$0xff] }
 0x32a   : > { %v1873_v59 = vmul.f32 %v5010_v61, %v1814_v52  ;;  %2849 = vmatmul.f32.gmra.mxu0 %v5208_v11  ;;  %v2396_v11 = vld [vmem:[%s6681_s4 + $0x218] sm:$0xff]  ;;  %v1481_v52 = vadd.f32 %v5077_v3, %v4916_v19 }
 0x32b   : > { %v1590_v30 = vpop.f32.mrf.mxu2  ;;  %2937 = vmatpush.msrb.mxu1 %v2396_v11 }
 0x32c   : > { %v1703_v1 = vpop.f32.mrf.mxu3  ;;  %v5498_v57 = vadd.f32 %v5017_v63, %v1873_v59  ;;  %v1591_v14 = vadd.f32 %v1590_v30, %v1478_v43 }
 0x32d   : > { %v5501_v18 = vpop.f32.mrf.mxu1 }
 0x32e   : > { %v6704_v21 = vmax.f32 %v5498_v57, 0.0  ;;  %v1704_v15 = vadd.f32 %v1703_v1, %v1591_v14 }
 0x32f   : > { %v5503_v54 = vld [vmem:[#allocation3 + $0xf8] sm:$0xff]  ;;  %v1825_v40 = vpop.f32.mrf.mxu0 }
 0x330   : > { %2028 = vst [vmem:[#allocation3 + $0x109] sm:$0xff] %v6704_v21  ;;  %v1817_v7 = vadd.f32 %v1816_v48, %v1704_v15  ;;  %2620 = vmatmul.f32.gmra.mxu2 %v6750_v53  ;;  %2552 = vmatmul.f32.gmra.mxu1 %v5503_v54  ;;  %v2111_v53 = vld [vmem:[#allocation3 + $0x52] sm:$0xff] }
 0x331   : > { %2733 = vmatmul.f32.gmra.mxu3 %v2110_v20 }
 0x332   : > { %v1874_v43 = vmul.f32 %v5010_v61, %v1817_v7  ;;  %2852 = vmatmul.f32.gmra.mxu0 %v5258_v6  ;;  %v6751_v61 = vmax.f32 %v5135_v36, 0.0  ;;  %v5535_v7 = vld [vmem:[%s6679_s2] ss:$0 sm:$0xff] }
 0x333   : > { %v1593_v59 = vpop.f32.mrf.mxu2  ;;  %v5542_v36 = vld [vmem:[%s6680_s3] ss:$0 sm:$0xff] }
 0x334   : > { %v1706_v48 = vpop.f32.mrf.mxu3  ;;  %v5518_v16 = vadd.f32 %v5017_v63, %v1874_v43  ;;  %v1594_v30 = vadd.f32 %v1593_v59, %v1481_v52  ;;  %v6752_v63 = vld [vmem:[#allocation10_spill] sm:$0xff] }
 0x335   : > { %v5521_v15 = vpop.f32.mrf.mxu1  ;;  %v1484_v6 = vadd.f32 %v6752_v63, %v4924_v51 }
 0x336   : > { %v6703_v1 = vmax.f32 %v5518_v16, 0.0  ;;  %v1707_v14 = vadd.f32 %v1706_v48, %v1594_v30 }
 0x337   : > { %v5523_v20 = vld [vmem:[#allocation3 + $0x108] sm:$0xff]  ;;  %v1828_v19 = vpop.f32.mrf.mxu0 }
 0x338   : > { %2029 = vst [vmem:[#allocation3 + $0x111] sm:$0xff] %v6703_v1  ;;  %v1820_v3 = vadd.f32 %v1819_v0, %v1707_v14  ;;  %2623 = vmatmul.f32.gmra.mxu2 %v6751_v61  ;;  %2555 = vmatmul.f32.gmra.mxu1 %v5523_v20  ;;  %v6753_v61 = vld [vmem:[#allocation14_spill] sm:$0xff] }
 0x339   : > { %2736 = vmatmul.f32.gmra.mxu3 %v2111_v53  ;;  %v2112_v53 = vld [vmem:[#allocation3 + $0x62] sm:$0xff]  ;;  %v6754_v63 = vmax.f32 %v6753_v61, 0.0 }
 0x33a   : > { %v1875_v11 = vmul.f32 %v5535_v7, %v1820_v3  ;;  %2855 = vmatmul.f32.gmra.mxu0 %v5305_v10 }
 0x33b   : > { %v1596_v52 = vpop.f32.mrf.mxu2 }
 0x33c   : > { %v1709_v0 = vpop.f32.mrf.mxu3  ;;  %v5545_v43 = vadd.f32 %v5542_v36, %v1875_v11  ;;  %v1597_v51 = vadd.f32 %v1596_v52, %v1484_v6  ;;  %v2395_v6 = vld [vmem:[%s6681_s4 + $0x210] sm:$0xff]  ;;  %v6755_v11 = vld [vmem:[#allocation11_spill] sm:$0xff]  ;;  %v6756_v52 = vld [vmem:[#allocation13_spill] sm:$0xff] }
 0x33d   : > { %v5548_v30 = vpop.f32.mrf.mxu1  ;;  %2938 = vmatpush.msrb.mxu1 %v2395_v6  ;;  %v6759_v6 = vld [vmem:[#allocation15_spill] sm:$0xff] }
 0x33e   : > { %v6702_v59 = vmax.f32 %v5545_v43, 0.0  ;;  %v1710_v48 = vadd.f32 %v1709_v0, %v1597_v51  ;;  %v1487_v0 = vadd.f32 %v6756_v52, %v6755_v11 }
 0x33f   : > { %v5550_v14 = vld [vmem:[#allocation3 + $0x110] sm:$0xff]  ;;  %v1831_v10 = vpop.f32.mrf.mxu0 }
 0x340   : > { %2030 = vst [vmem:[#allocation3 + $0x121] sm:$0xff] %v6702_v59  ;;  %v1823_v3 = vadd.f32 %v1822_v25, %v1710_v48  ;;  %2626 = vmatmul.f32.gmra.mxu2 %v6754_v63  ;;  %2558 = vmatmul.f32.gmra.mxu1 %v5550_v14 }
 0x341   : > { %2739 = vmatmul.f32.gmra.mxu3 %v2112_v53 }
 0x342   : > { %v1876_v51 = vmul.f32 %v5535_v7, %v1823_v3  ;;  %2858 = vmatmul.f32.gmra.mxu0 %v5346_v56  ;;  %v6757_v3 = vmax.f32 %v5179_v49, 0.0 }
 0x343   : > { %v1599_v59 = vpop.f32.mrf.mxu2 }
 0x344   : > { %v1712_v25 = vpop.f32.mrf.mxu3  ;;  %v5565_v48 = vadd.f32 %v5542_v36, %v1876_v51  ;;  %v1600_v53 = vadd.f32 %v1599_v59, %v1487_v0  ;;  %v6758_v59 = vld [vmem:[#allocation12_spill] sm:$0xff] }
 0x345   : > { %v5568_v1 = vpop.f32.mrf.mxu1  ;;  %v1490_v52 = vadd.f32 %v6759_v6, %v6758_v59  ;;  %v2394_v59 = vld [vmem:[%s6681_s4 + $0x208] sm:$0xff] }
 0x346   : > { %v6706_v61 = vmax.f32 %v5565_v48, 0.0  ;;  %v1713_v63 = vadd.f32 %v1712_v25, %v1600_v53  ;;  %2939 = vmatpush.msrb.mxu1 %v2394_v59 }
 0x347   : > { %v5570_v21 = vld [vmem:[#allocation3 + $0x120] sm:$0xff]  ;;  %v1834_v11 = vpop.f32.mrf.mxu0 }
 0x348   : > { %2031 = vst [vmem:[#allocation3 + $0x129] sm:$0xff] %v6706_v61  ;;  %v1826_v56 = vadd.f32 %v1825_v40, %v1713_v63  ;;  %2629 = vmatmul.f32.gmra.mxu2 %v6757_v3  ;;  %2561 = vmatmul.f32.gmra.mxu1 %v5570_v21  ;;  %v2114_v3 = vld [vmem:[#allocation3 + $0x7a] sm:$0xff] }
 0x349   : > { %2742 = vmatmul.f32.gmra.mxu3 %v2113_v47 }
 0x34a   : > { %v1877_v0 = vmul.f32 %v5535_v7, %v1826_v56  ;;  %2861 = vmatmul.f32.gmra.mxu0 %v5359_v38  ;;  %v6760_v38 = vmax.f32 %v5202_v23, 0.0 }
 0x34b   : > { %v1602_v51 = vpop.f32.mrf.mxu2 }
 0x34c   : > { %v1715_v25 = vpop.f32.mrf.mxu3  ;;  %v5582_v53 = vadd.f32 %v5542_v36, %v1877_v0  ;;  %v1603_v61 = vadd.f32 %v1602_v51, %v1490_v52 }
 0x34d   : > { %v5585_v63 = vpop.f32.mrf.mxu1 }
 0x34e   : > { %v6708_v40 = vmax.f32 %v5582_v53, 0.0  ;;  %v1716_v49 = vadd.f32 %v1715_v25, %v1603_v61  ;;  %v6761_v61 = vld [vmem:[#allocation4_spill] sm:$0xff] }
 0x34f   : > { %v5587_v47 = vld [vmem:[#allocation3 + $0x128] sm:$0xff]  ;;  %v1837_v62 = vpop.f32.mrf.mxu0  ;;  %v1493_v6 = vadd.f32 %v5186_v45, %v6761_v61 }
 0x350   : > { %2032 = vst [vmem:[#allocation3 + $0x139] sm:$0xff] %v6708_v40  ;;  %v1829_v56 = vadd.f32 %v1828_v19, %v1716_v49  ;;  %2632 = vmatmul.f32.gmra.mxu2 %v6760_v38  ;;  %2564 = vmatmul.f32.gmra.mxu1 %v5587_v47  ;;  %v2115_v40 = vld [vmem:[#allocation3 + $0x82] sm:$0xff] }
 0x351   : > { %2745 = vmatmul.f32.gmra.mxu3 %v2114_v3  ;;  %v6764_v61 = vld [vmem:[#allocation7_spill] sm:$0xff] }
 0x352   : > { %v1878_v52 = vmul.f32 %v5535_v7, %v1829_v56  ;;  %2864 = vmatmul.f32.gmra.mxu0 %v5379_v60  ;;  %v6762_v56 = vld [vmem:[#allocation17_spill] sm:$0xff] }
 0x353   : > { %v1605_v0 = vpop.f32.mrf.mxu2  ;;  %v6763_v59 = vmax.f32 %v6762_v56, 0.0 }
 0x354   : > { %v1718_v19 = vpop.f32.mrf.mxu3  ;;  %v5602_v23 = vadd.f32 %v5542_v36, %v1878_v52  ;;  %v1606_v51 = vadd.f32 %v1605_v0, %v1493_v6  ;;  %v6765_v6 = vld [vmem:[#allocation16_spill] sm:$0xff] }
 0x355   : > { %v5605_v3 = vpop.f32.mrf.mxu1  ;;  %v1496_v52 = vadd.f32 %v6765_v6, %v6764_v61  ;;  %v2393_v6 = vld [vmem:[%s6681_s4 + $0x200] sm:$0xff] }
 0x356   : > { %v6710_v25 = vmax.f32 %v5602_v23, 0.0  ;;  %v1719_v49 = vadd.f32 %v1718_v19, %v1606_v51  ;;  %2940 = vmatpush.msrb.mxu1 %v2393_v6  ;;  %v2440_v6 = vld [vmem:[%s6681_s4 + $0x378] sm:$0xff] }
 0x357   : > { %v5607_v38 = vld [vmem:[#allocation3 + $0x138] sm:$0xff]  ;;  %v5609_v45 = vpop.f32.mrf.mxu0  ;;  %3151 = vmatpush.msra.mxu3 %v2440_v6  ;;  %v2118_v6 = vld [vmem:[#allocation3 + $0xaa] sm:$0xff] }
 0x358   : > { %2033 = vst [vmem:[#allocation3 + $0x141] sm:$0xff] %v6710_v25  ;;  %v1832_v60 = vadd.f32 %v1831_v10, %v1719_v49  ;;  %2635 = vmatmul.f32.gmra.mxu2 %v6763_v59  ;;  %2567 = vmatmul.f32.gmra.mxu1 %v5607_v38  ;;  %v2116_v59 = vld [vmem:[#allocation3 + $0x92] sm:$0xff] }
 0x359   : > { %2748 = vmatmul.f32.gmra.mxu3 %v2115_v40  ;;  %3377 = vmatpush.msra.mxu1 %v2472_v46 }
 0x35a   : > { %v1879_v0 = vmul.f32 %v5535_v7, %v1832_v60  ;;  %2867 = vmatmul.f32.gmra.mxu0 %v5396_v58  ;;  %v6766_v60 = vld [vmem:[#allocation19_spill] sm:$0xff] }
 0x35b   : > { %v1608_v19 = vpop.f32.mrf.mxu2  ;;  %v6767_v61 = vmax.f32 %v6766_v60, 0.0 }
 0x35c   : > { %v1721_v51 = vpop.f32.mrf.mxu3  ;;  %v5621_v2 = vadd.f32 %v5542_v36, %v1879_v0  ;;  %v1609_v25 = vadd.f32 %v1608_v19, %v1496_v52  ;;  %v6769_v52 = vld [vmem:[#allocation18_spill] sm:$0xff] }
 0x35d   : > { %v5624_v56 = vpop.f32.mrf.mxu1 }
 0x35e   : > { %v6712_v10 = vmax.f32 %v5621_v2, 0.0  ;;  %v1722_v49 = vadd.f32 %v1721_v51, %v1609_v25  ;;  %v6768_v25 = vld [vmem:[#allocation5_spill] sm:$0xff] }
 0x35f   : > { %v5626_v40 = vld [vmem:[#allocation3 + $0x140] sm:$0xff]  ;;  %v5628_v31 = vpop.f32.mrf.mxu0  ;;  %v1499_v0 = vadd.f32 %v6769_v52, %v6768_v25  ;;  %v2456_v52 = vld [vmem:[%s6681_s4 + $0x3f8] sm:$0xff] }
 0x360   : > { %2034 = vst [vmem:[#allocation3 + $0x151] sm:$0xff] %v6712_v10  ;;  %v1835_v58 = vadd.f32 %v1834_v11, %v1722_v49  ;;  %2638 = vmatmul.f32.gmra.mxu2 %v6767_v61  ;;  %2570 = vmatmul.f32.gmra.mxu1 %v5626_v40 }
 0x361   : > { %2751 = vmatmul.f32.gmra.mxu3 %v2116_v59  ;;  %3264 = vmatpush.msra.mxu0 %v2456_v52 }
 0x362   : > { %v1880_v19 = vmul.f32 %v5535_v7, %v1835_v58  ;;  %2870 = vmatmul.f32.gmra.mxu0 %v5414_v5  ;;  %v2424_v58 = vld [vmem:[%s6681_s4 + $0x2f8] sm:$0xff] }
 0x363   : > { %v1611_v51 = vpop.f32.mrf.mxu2  ;;  %3038 = vmatpush.msra.mxu2 %v2424_v58 }
 0x364   : > { %v1724_v11 = vpop.f32.mrf.mxu3  ;;  %v5643_v49 = vadd.f32 %v5542_v36, %v1880_v19  ;;  %v1612_v59 = vadd.f32 %v1611_v51, %v1499_v0 }
 0x365   : > { %v5646_v10 = vpop.f32.mrf.mxu1 }
 0x366   : > { %v1948_v60 = vmax.f32 %v5643_v49, 0.0  ;;  %v1725_v61 = vadd.f32 %v1724_v11, %v1612_v59 }
 0x367   : > { %v5648_v12 = vld [vmem:[#allocation3 + $0x150] sm:$0xff]  ;;  %v5650_v25 = vpop.f32.mrf.mxu0 }
 0x368   : > { %2035 = vst [vmem:[#allocation3 + $0x159] sm:$0xff] %v1948_v60  ;;  %v1838_v5 = vadd.f32 %v1837_v62, %v1725_v61  ;;  %2641 = vmatmul.f32.gmra.mxu2 %v1932_v39  ;;  %2573 = vmatmul.f32.gmra.mxu1 %v5648_v12  ;;  %v6770_v39 = vld [vmem:[#allocation6_spill] sm:$0xff] }
 0x369   : > { %2754 = vmatmul.f32.gmra.mxu3 %v2117_v41  ;;  %v1502_v41 = vadd.f32 %v5343_v29, %v6770_v39  ;;  %v2423_v29 = vld [vmem:[%s6681_s4 + $0x2f0] sm:$0xff]  ;;  %v6771_v39 = vmax.f32 %v5356_v9, 0.0 }
 0x36a   : > { %v1881_v62 = vmul.f32 %v5535_v7, %v1838_v5  ;;  %2873 = vmatmul.f32.gmra.mxu0 %v5429_v44  ;;  %v2439_v44 = vld [vmem:[%s6681_s4 + $0x370] sm:$0xff]  ;;  %3039 = vmatpush.msra.mxu2 %v2423_v29 }
 0x36b   : > { %v1614_v0 = vpop.f32.mrf.mxu2  ;;  %3152 = vmatpush.msra.mxu3 %v2439_v44 }
 0x36c   : > { %v1727_v19 = vpop.f32.mrf.mxu3  ;;  %v5674_v51 = vadd.f32 %v5542_v36, %v1881_v62  ;;  %v1615_v11 = vadd.f32 %v1614_v0, %v1502_v41  ;;  %v6772_v41 = vld [vmem:[#allocation8_spill] sm:$0xff] }
 0x36d   : > { %v5677_v58 = vpop.f32.mrf.mxu1  ;;  %v1505_v62 = vadd.f32 %v5361_v33, %v6772_v41  ;;  %v6773_v41 = vmax.f32 %v5376_v24, 0.0 }
 0x36e   : > { %v1949_v59 = vmax.f32 %v5674_v51, 0.0  ;;  %v1728_v61 = vadd.f32 %v1727_v19, %v1615_v11 }
 0x36f   : > { %v5685_v5 = vld [vmem:[#allocation3 + $0x158] sm:$0xff]  ;;  %v5687_v52 = vpop.f32.mrf.mxu0 }
 0x370   : > { %2036 = vst [vmem:[#allocation3 + $0x169] sm:$0xff] %v1949_v59  ;;  %v1841_v46 = vadd.f32 %v5609_v45, %v1728_v61  ;;  %2644 = vmatmul.f32.gmra.mxu2 %v6771_v39  ;;  %2576 = vmatmul.f32.gmra.mxu1 %v5685_v5 }
 0x371   : > { %2757 = vmatmul.f32.gmra.mxu3 %v2118_v6  ;;  %v2455_v6 = vld [vmem:[%s6681_s4 + $0x3f0] sm:$0xff] }
 0x372   : > { %v1882_v0 = vmul.f32 %v5535_v7, %v1841_v46  ;;  %2876 = vmatmul.f32.gmra.mxu0 %v5449_v34  ;;  %v2119_v46 = vld [vmem:[#allocation3 + $0xb2] sm:$0xff] }
 0x373   : > { %v1617_v19 = vpop.f32.mrf.mxu2  ;;  %3265 = vmatpush.msra.mxu0 %v2455_v6 }
 0x374   : > { %v1730_v11 = vpop.f32.mrf.mxu3  ;;  %v5700_v29 = vadd.f32 %v5542_v36, %v1882_v0  ;;  %v1618_v44 = vadd.f32 %v1617_v19, %v1505_v62  ;;  %v2471_v62 = vld [vmem:[%s6681_s4 + $0x470] sm:$0xff]  ;;  %v6774_v0 = vld [vmem:[#allocation9_spill] sm:$0xff] }
 0x375   : > { %v5703_v61 = vpop.f32.mrf.mxu1  ;;  %v1508_v19 = vadd.f32 %v5388_v27, %v6774_v0  ;;  %3378 = vmatpush.msra.mxu1 %v2471_v62  ;;  %v2438_v27 = vld [vmem:[%s6681_s4 + $0x368] sm:$0xff] }
 0x376   : > { %v6715_v45 = vmax.f32 %v5700_v29, 0.0  ;;  %v1731_v9 = vadd.f32 %v1730_v11, %v1618_v44  ;;  %3153 = vmatpush.msra.mxu3 %v2438_v27 }
 0x377   : > { %v5708_v33 = vld [vmem:[#allocation3 + $0x168] sm:$0xff]  ;;  %v5710_v39 = vpop.f32.mrf.mxu0 }
 0x378   : > { %2037 = vst [vmem:[#allocation3 + $0x171] sm:$0xff] %v6715_v45  ;;  %v1844_v34 = vadd.f32 %v5628_v31, %v1731_v9  ;;  %2647 = vmatmul.f32.gmra.mxu2 %v6773_v41  ;;  %2579 = vmatmul.f32.gmra.mxu1 %v5708_v33  ;;  %v2422_v45 = vld [vmem:[%s6681_s4 + $0x2e8] sm:$0xff] }
 0x379   : > { %2760 = vmatmul.f32.gmra.mxu3 %v2119_v46  ;;  %3040 = vmatpush.msra.mxu2 %v2422_v45 }
 0x37a   : > { %v1883_v11 = vmul.f32 %v5535_v7, %v1844_v34  ;;  %2879 = vmatmul.f32.gmra.mxu0 %v5466_v17  ;;  %v2120_v17 = vld [vmem:[#allocation3 + $0xc2] sm:$0xff] }
 0x37b   : > { %v1620_v44 = vpop.f32.mrf.mxu2 }
 0x37c   : > { %v1733_v31 = vpop.f32.mrf.mxu3  ;;  %v1919_v24 = vadd.f32 %v5542_v36, %v1883_v11  ;;  %v1621_v9 = vadd.f32 %v1620_v44, %v1508_v19  ;;  %v6775_v19 = vmax.f32 %v5393_v32, 0.0  ;;  %v2454_v32 = vld [vmem:[%s6681_s4 + $0x3e8] sm:$0xff] }
 0x37d   : > { %v5726_v41 = vpop.f32.mrf.mxu1  ;;  %3266 = vmatpush.msra.mxu0 %v2454_v32 }
 0x37e   : > { %v1951_v6 = vmax.f32 %v1919_v24, 0.0  ;;  %v1734_v46 = vadd.f32 %v1733_v31, %v1621_v9 }
 0x37f   : > { %v5734_v34 = vld [vmem:[#allocation3 + $0x170] sm:$0xff]  ;;  %v2835_v62 = vpop.f32.mrf.mxu0 }
 0x380   : > { %2038 = vst [vmem:[#allocation3 + $0x181] sm:$0xff] %v1951_v6  ;;  %v1847_v0 = vadd.f32 %v5650_v25, %v1734_v46  ;;  %2650 = vmatmul.f32.gmra.mxu2 %v6775_v19  ;;  %2582 = vmatmul.f32.gmra.mxu1 %v5734_v34  ;;  %v2121_v25 = vld [vmem:[#allocation3 + $0xca] sm:$0xff] }
 0x381   : > { %2763 = vmatmul.f32.gmra.mxu3 %v2120_v17 }
 0x382   : > { %v1884_v11 = vmul.f32 %v5535_v7, %v1847_v0  ;;  %2882 = vmatmul.f32.gmra.mxu0 %v5486_v13  ;;  %v6776_v13 = vmax.f32 %v5411_v42, 0.0  ;;  %v2168_v7 = vld [vmem:[#allocation3 + $0x19] sm:$0xff] }
 0x383   : > { %v2603_v44 = vpop.f32.mrf.mxu2 }
 0x384   : > { %v2716_v31 = vpop.f32.mrf.mxu3  ;;  %v1920_v24 = vadd.f32 %v5542_v36, %v1884_v11  ;;  %v2604_v45 = vadd.f32 %v2603_v44, %v5407_v4  ;;  %v2470_v4 = vld [vmem:[%s6681_s4 + $0x468] sm:$0xff]  ;;  %v2437_v44 = vld [vmem:[%s6681_s4 + $0x360] sm:$0xff] }
 0x385   : > { %v5744_v27 = vpop.f32.mrf.mxu1  ;;  %3379 = vmatpush.msra.mxu1 %v2470_v4  ;;  %3154 = vmatpush.msra.mxu3 %v2437_v44  ;;  %v2436_v44 = vld [vmem:[%s6681_s4 + $0x358] sm:$0xff] }
 0x386   : > { %v1952_v9 = vmax.f32 %v1920_v24, 0.0  ;;  %v2717_v6 = vadd.f32 %v2716_v31, %v2604_v45  ;;  %v2122_v31 = vld [vmem:[#allocation3 + $0xda] sm:$0xff] }
 0x387   : > { %v2838_v46 = vpop.f32.mrf.mxu0  ;;  %3155 = vmatpush.msra.mxu3 %v2436_v44  ;;  %v2126_v44 = vld [vmem:[#allocation3 + $0x10a] sm:$0xff] }
 0x388   : > { %2039 = vst [vmem:[#allocation3 + $0x189] sm:$0xff] %v1952_v9  ;;  %2653 = vmatmul.f32.gmra.mxu2 %v6776_v13  ;;  %v5752_v36 = vadd.f32 %v5687_v52, %v2717_v6  ;;  %2941 = vmatmul.f32.vlgmr.msrb.gmra.mxu1 %v2168_v7  ;;  %v2421_v52 = vld [vmem:[%s6681_s4 + $0x2e0] sm:$0xff]  ;;  %v2123_v7 = vld [vmem:[#allocation3 + $0xe2] sm:$0xff] }
 0x389   : > { %2766 = vmatmul.f32.gmra.mxu3 %v2121_v25  ;;  %3041 = vmatpush.msra.mxu2 %v2421_v52 }
 0x38a   : > { %2885 = vmatmul.f32.gmra.mxu0 %v5503_v54  ;;  %v6777_v54 = vmax.f32 %v5424_v28, 0.0  ;;  %v2453_v28 = vld [vmem:[%s6681_s4 + $0x3e0] sm:$0xff] }
 0x38b   : > { %v2606_v17 = vpop.f32.mrf.mxu2  ;;  %3267 = vmatpush.msra.mxu0 %v2453_v28 }
 0x38c   : > { %v2719_v0 = vpop.f32.mrf.mxu3  ;;  %v2607_v19 = vadd.f32 %v2606_v17, %v5426_v55  ;;  %v2169_v55 = vld [vmem:[#allocation3 + $0x21] sm:$0xff]  ;;  %v5781_v17 = vld [vmem:[#allocation3 + $0x31] sm:$0xff] }
 0x38d   : > { %v5759_v42 = vpop.f32.mrf.mxu1 }
 0x38e   : > { %v2720_v11 = vadd.f32 %v2719_v0, %v2607_v19 }
 0x38f   : > { %v2841_v24 = vpop.f32.mrf.mxu0 }
 0x390   : > { %2656 = vmatmul.f32.gmra.mxu2 %v6777_v54  ;;  %v5770_v45 = vadd.f32 %v5710_v39, %v2720_v11  ;;  %2944 = vmatmul.f32.gmra.mxu1 %v2169_v55  ;;  %v6778_v39 = vmax.f32 %v5444_v35, 0.0 }
 0x391   : > { %2769 = vmatmul.f32.gmra.mxu3 %v2122_v31  ;;  %v2124_v31 = vld [vmem:[#allocation3 + $0xf2] sm:$0xff] }
 0x392   : > { %2888 = vmatmul.f32.gmra.mxu0 %v5523_v20 }
 0x393   : > { %v2609_v9 = vpop.f32.mrf.mxu2 }
 0x394   : > { %v2722_v6 = vpop.f32.mrf.mxu3  ;;  %v2610_v32 = vadd.f32 %v2609_v9, %v5447_v22  ;;  %v2469_v22 = vld [vmem:[%s6681_s4 + $0x460] sm:$0xff] }
 0x395   : > { %v5774_v13 = vpop.f32.mrf.mxu1  ;;  %3380 = vmatpush.msra.mxu1 %v2469_v22  ;;  %v5815_v22 = vld [vmem:[#allocation3 + $0x49] sm:$0xff] }
 0x396   : > { %v2723_v25 = vadd.f32 %v2722_v6, %v2610_v32 }
 0x397   : > { %v2844_v4 = vpop.f32.mrf.mxu0 }
 0x398   : > { %2659 = vmatmul.f32.gmra.mxu2 %v6778_v39  ;;  %v5783_v20 = vadd.f32 %v2835_v62, %v2723_v25  ;;  %2947 = vmatmul.f32.gmra.mxu1 %v5781_v17  ;;  %v2420_v62 = vld [vmem:[%s6681_s4 + $0x2d8] sm:$0xff] }
 0x399   : > { %2772 = vmatmul.f32.gmra.mxu3 %v2123_v7  ;;  %3042 = vmatpush.msra.mxu2 %v2420_v62  ;;  %v2125_v7 = vld [vmem:[#allocation3 + $0xfa] sm:$0xff] }
 0x39a   : > { %2891 = vmatmul.f32.gmra.mxu0 %v5550_v14  ;;  %v6779_v14 = vmax.f32 %v5461_v50, 0.0  ;;  %v2452_v50 = vld [vmem:[%s6681_s4 + $0x3d8] sm:$0xff]  ;;  %v2435_v62 = vld [vmem:[%s6681_s4 + $0x350] sm:$0xff] }
 0x39b   : > { %v2612_v0 = vpop.f32.mrf.mxu2  ;;  %3268 = vmatpush.msra.mxu0 %v2452_v50  ;;  %3156 = vmatpush.msra.mxu3 %v2435_v62  ;;  %v2128_v62 = vld [vmem:[#allocation3 + $0x122] sm:$0xff] }
 0x39c   : > { %v2725_v19 = vpop.f32.mrf.mxu3  ;;  %v2613_v11 = vadd.f32 %v2612_v0, %v5464_v26  ;;  %v5801_v26 = vld [vmem:[#allocation3 + $0x39] sm:$0xff] }
 0x39d   : > { %v5791_v52 = vpop.f32.mrf.mxu1 }
 0x39e   : > { %v2726_v35 = vadd.f32 %v2725_v19, %v2613_v11 }
 0x39f   : > { %v2847_v54 = vpop.f32.mrf.mxu0 }
 0x3a0   : > { %2662 = vmatmul.f32.gmra.mxu2 %v6779_v14  ;;  %v5803_v55 = vadd.f32 %v2838_v46, %v2726_v35  ;;  %2950 = vmatmul.f32.gmra.mxu1 %v5801_v26  ;;  %v6780_v46 = vmax.f32 %v5481_v8, 0.0 }
 0x3a1   : > { %2775 = vmatmul.f32.gmra.mxu3 %v2124_v31 }
 0x3a2   : > { %2894 = vmatmul.f32.gmra.mxu0 %v5570_v21 }
 0x3a3   : > { %v2615_v9 = vpop.f32.mrf.mxu2 }
 0x3a4   : > { %v2728_v6 = vpop.f32.mrf.mxu3  ;;  %v2616_v32 = vadd.f32 %v2615_v9, %v5484_v37  ;;  %v2468_v37 = vld [vmem:[%s6681_s4 + $0x458] sm:$0xff] }
 0x3a5   : > { %v5808_v28 = vpop.f32.mrf.mxu1  ;;  %3381 = vmatpush.msra.mxu1 %v2468_v37  ;;  %v5849_v37 = vld [vmem:[#allocation3 + $0x61] sm:$0xff] }
 0x3a6   : > { %v2729_v25 = vadd.f32 %v2728_v6, %v2616_v32 }
 0x3a7   : > { %v2850_v39 = vpop.f32.mrf.mxu0 }
 0x3a8   : > { %2665 = vmatmul.f32.gmra.mxu2 %v6780_v46  ;;  %v5817_v21 = vadd.f32 %v2841_v24, %v2729_v25  ;;  %2953 = vmatmul.f32.gmra.mxu1 %v5815_v22  ;;  %v2419_v24 = vld [vmem:[%s6681_s4 + $0x2d0] sm:$0xff] }
 0x3a9   : > { %2778 = vmatmul.f32.gmra.mxu3 %v2125_v7  ;;  %3043 = vmatpush.msra.mxu2 %v2419_v24  ;;  %v2127_v7 = vld [vmem:[#allocation3 + $0x112] sm:$0xff] }
 0x3aa   : > { %2897 = vmatmul.f32.gmra.mxu0 %v5587_v47  ;;  %v6781_v47 = vmax.f32 %v5498_v57, 0.0  ;;  %v2451_v57 = vld [vmem:[%s6681_s4 + $0x3d0] sm:$0xff]  ;;  %v2434_v24 = vld [vmem:[%s6681_s4 + $0x348] sm:$0xff] }
 0x3ab   : > { %v2618_v0 = vpop.f32.mrf.mxu2  ;;  %3269 = vmatpush.msra.mxu0 %v2451_v57  ;;  %3157 = vmatpush.msra.mxu3 %v2434_v24  ;;  %v2130_v24 = vld [vmem:[#allocation3 + $0x13a] sm:$0xff] }
 0x3ac   : > { %v2731_v19 = vpop.f32.mrf.mxu3  ;;  %v2619_v11 = vadd.f32 %v2618_v0, %v5501_v18  ;;  %v5835_v18 = vld [vmem:[#allocation3 + $0x51] sm:$0xff] }
 0x3ad   : > { %v5825_v35 = vpop.f32.mrf.mxu1 }
 0x3ae   : > { %v2732_v8 = vadd.f32 %v2731_v19, %v2619_v11 }
 0x3af   : > { %v2853_v31 = vpop.f32.mrf.mxu0 }
 0x3b0   : > { %2668 = vmatmul.f32.gmra.mxu2 %v6781_v47  ;;  %v5837_v14 = vadd.f32 %v2844_v4, %v2732_v8  ;;  %2956 = vmatmul.f32.gmra.mxu1 %v5835_v18  ;;  %v6782_v4 = vmax.f32 %v5518_v16, 0.0 }
 0x3b1   : > { %2781 = vmatmul.f32.gmra.mxu3 %v2126_v44 }
 0x3b2   : > { %2900 = vmatmul.f32.gmra.mxu0 %v5607_v38 }
 0x3b3   : > { %v2621_v9 = vpop.f32.mrf.mxu2 }
 0x3b4   : > { %v2734_v6 = vpop.f32.mrf.mxu3  ;;  %v2622_v32 = vadd.f32 %v2621_v9, %v5521_v15  ;;  %v2467_v15 = vld [vmem:[%s6681_s4 + $0x450] sm:$0xff] }
 0x3b5   : > { %v5842_v50 = vpop.f32.mrf.mxu1  ;;  %3382 = vmatpush.msra.mxu1 %v2467_v15 }
 0x3b6   : > { %v2735_v25 = vadd.f32 %v2734_v6, %v2622_v32 }
 0x3b7   : > { %v2856_v46 = vpop.f32.mrf.mxu0 }
 0x3b8   : > { %2671 = vmatmul.f32.gmra.mxu2 %v6782_v4  ;;  %v5851_v38 = vadd.f32 %v2847_v54, %v2735_v25  ;;  %2959 = vmatmul.f32.gmra.mxu1 %v5849_v37  ;;  %v2418_v54 = vld [vmem:[%s6681_s4 + $0x2c8] sm:$0xff] }
 0x3b9   : > { %2784 = vmatmul.f32.gmra.mxu3 %v2127_v7  ;;  %3044 = vmatpush.msra.mxu2 %v2418_v54  ;;  %v2129_v7 = vld [vmem:[#allocation3 + $0x12a] sm:$0xff] }
 0x3ba   : > { %2903 = vmatmul.f32.gmra.mxu0 %v5626_v40  ;;  %v6783_v40 = vmax.f32 %v5545_v43, 0.0  ;;  %v2450_v43 = vld [vmem:[%s6681_s4 + $0x3c8] sm:$0xff]  ;;  %v2433_v54 = vld [vmem:[%s6681_s4 + $0x340] sm:$0xff] }
 0x3bb   : > { %v2624_v0 = vpop.f32.mrf.mxu2  ;;  %3270 = vmatpush.msra.mxu0 %v2450_v43  ;;  %3158 = vmatpush.msra.mxu3 %v2433_v54  ;;  %v2430_v54 = vld [vmem:[%s6681_s4 + $0x328] sm:$0xff] }
 0x3bc   : > { %v2737_v19 = vpop.f32.mrf.mxu3  ;;  %v2625_v11 = vadd.f32 %v2624_v0, %v5548_v30  ;;  %v5871_v30 = vld [vmem:[#allocation3 + $0x69] sm:$0xff] }
 0x3bd   : > { %v5859_v8 = vpop.f32.mrf.mxu1 }
 0x3be   : > { %v2738_v16 = vadd.f32 %v2737_v19, %v2625_v11 }
 0x3bf   : > { %v5867_v44 = vpop.f32.mrf.mxu0 }
 0x3c0   : > { %2674 = vmatmul.f32.gmra.mxu2 %v6783_v40  ;;  %v5873_v47 = vadd.f32 %v2850_v39, %v2738_v16  ;;  %2962 = vmatmul.f32.gmra.mxu1 %v5871_v30  ;;  %v6784_v39 = vmax.f32 %v5565_v48, 0.0  ;;  %v5912_v40 = vld [vmem:[#allocation3 + $0x81] sm:$0xff] }
 0x3c1   : > { %2787 = vmatmul.f32.gmra.mxu3 %v2128_v62 }
 0x3c2   : > { %2906 = vmatmul.f32.gmra.mxu0 %v5648_v12  ;;  %v5887_v12 = vld [vmem:[#allocation3 + $0x79] sm:$0xff] }
 0x3c3   : > { %v2627_v9 = vpop.f32.mrf.mxu2 }
 0x3c4   : > { %v2740_v6 = vpop.f32.mrf.mxu3  ;;  %v2628_v32 = vadd.f32 %v2627_v9, %v5568_v1  ;;  %v2466_v1 = vld [vmem:[%s6681_s4 + $0x448] sm:$0xff] }
 0x3c5   : > { %v5878_v57 = vpop.f32.mrf.mxu1  ;;  %3383 = vmatpush.msra.mxu1 %v2466_v1  ;;  %v2415_v1 = vld [vmem:[%s6681_s4 + $0x2b0] sm:$0xff] }
 0x3c6   : > { %v2741_v25 = vadd.f32 %v2740_v6, %v2628_v32  ;;  %v2416_v6 = vld [vmem:[%s6681_s4 + $0x2b8] sm:$0xff] }
 0x3c7   : > { %v5883_v4 = vpop.f32.mrf.mxu0  ;;  %v2432_v32 = vld [vmem:[%s6681_s4 + $0x338] sm:$0xff] }
 0x3c8   : > { %2677 = vmatmul.f32.gmra.mxu2 %v6784_v39  ;;  %v5889_v15 = vadd.f32 %v2853_v31, %v2741_v25  ;;  %2965 = vmatmul.f32.gmra.mxu1 %v5887_v12  ;;  %v2417_v31 = vld [vmem:[%s6681_s4 + $0x2c0] sm:$0xff] }
 0x3c9   : > { %2790 = vmatmul.f32.gmra.mxu3 %v2129_v7  ;;  %3045 = vmatpush.msra.mxu2 %v2417_v31  ;;  %v5946_v31 = vld [vmem:[#allocation3 + $0x91] sm:$0xff] }
 0x3ca   : > { %2909 = vmatmul.f32.gmra.mxu0 %v5685_v5  ;;  %v2449_v5 = vld [vmem:[%s6681_s4 + $0x3c0] sm:$0xff]  ;;  %3159 = vmatpush.msra.mxu3 %v2432_v32 }
 0x3cb   : > { %v2630_v0 = vpop.f32.mrf.mxu2  ;;  %3271 = vmatpush.msra.mxu0 %v2449_v5  ;;  %3046 = vmatpush.msra.mxu2 %v2416_v6  ;;  %v2446_v5 = vld [vmem:[%s6681_s4 + $0x3a8] sm:$0xff]  ;;  %v2429_v6 = vld [vmem:[%s6681_s4 + $0x320] sm:$0xff] }
 0x3cc   : > { %v2743_v19 = vpop.f32.mrf.mxu3  ;;  %v2631_v11 = vadd.f32 %v2630_v0, %v5585_v63  ;;  %v6785_v63 = vmax.f32 %v5582_v53, 0.0  ;;  %v2448_v53 = vld [vmem:[%s6681_s4 + $0x3b8] sm:$0xff]  ;;  %v2431_v0 = vld [vmem:[%s6681_s4 + $0x330] sm:$0xff] }
 0x3cd   : > { %v5897_v16 = vpop.f32.mrf.mxu1  ;;  %3272 = vmatpush.msra.mxu0 %v2448_v53  ;;  %3047 = vmatpush.msra.mxu2 %v2415_v1 }
 0x3ce   : > { %v2744_v48 = vadd.f32 %v2743_v19, %v2631_v11  ;;  %v2131_v19 = vld [vmem:[#allocation3 + $0x142] sm:$0xff]  ;;  %3160 = vmatpush.msra.mxu3 %v2431_v0  ;;  %v2132_v0 = vld [vmem:[#allocation3 + $0x152] sm:$0xff] }
 0x3cf   : > { %v5908_v62 = vpop.f32.mrf.mxu0 }
 0x3d0   : > { %2680 = vmatmul.f32.gmra.mxu2 %v6785_v63  ;;  %v5914_v9 = vadd.f32 %v2856_v46, %v2744_v48  ;;  %2968 = vmatmul.f32.gmra.mxu1 %v5912_v40  ;;  %v6786_v48 = vmax.f32 %v5602_v23, 0.0  ;;  %v2413_v23 = vld [vmem:[%s6681_s4 + $0x2a0] sm:$0xff] }
 0x3d1   : > { %2793 = vmatmul.f32.gmra.mxu3 %v2130_v24  ;;  %v2465_v63 = vld [vmem:[%s6681_s4 + $0x440] sm:$0xff] }
 0x3d2   : > { %2912 = vmatmul.f32.gmra.mxu0 %v5708_v33  ;;  %v2447_v33 = vld [vmem:[%s6681_s4 + $0x3b0] sm:$0xff]  ;;  %3161 = vmatpush.msra.mxu3 %v2430_v54 }
 0x3d3   : > { %v2633_v46 = vpop.f32.mrf.mxu2  ;;  %3273 = vmatpush.msra.mxu0 %v2447_v33  ;;  %3384 = vmatpush.msra.mxu1 %v2465_v63  ;;  %v2443_v54 = vld [vmem:[%s6681_s4 + $0x390] sm:$0xff] }
 0x3d4   : > { %v2746_v25 = vpop.f32.mrf.mxu3  ;;  %v2634_v43 = vadd.f32 %v2633_v46, %v5605_v3  ;;  %v2414_v3 = vld [vmem:[%s6681_s4 + $0x2a8] sm:$0xff]  ;;  %v2412_v46 = vld [vmem:[%s6681_s4 + $0x298] sm:$0xff]  ;;  %3162 = vmatpush.msra.mxu3 %v2429_v6  ;;  %v2166_v63 = vld [vmem:[#allocation3 + $0x180] sm:$0xff] }
 0x3d5   : > { %v5928_v39 = vpop.f32.mrf.mxu1  ;;  %3048 = vmatpush.msra.mxu2 %v2414_v3  ;;  %3274 = vmatpush.msra.mxu0 %v2446_v5  ;;  %v6787_v3 = vmax.f32 %v5621_v2, 0.0  ;;  %v2410_v5 = vld [vmem:[%s6681_s4 + $0x288] sm:$0xff] }
 0x3d6   : > { %v2747_v7 = vadd.f32 %v2746_v25, %v2634_v43  ;;  %v2444_v43 = vld [vmem:[%s6681_s4 + $0x398] sm:$0xff]  ;;  %v2426_v2 = vld [vmem:[%s6681_s4 + $0x308] sm:$0xff] }
 0x3d7   : > { %v5939_v11 = vpop.f32.mrf.mxu0  ;;  %3049 = vmatpush.msra.mxu2 %v2413_v23  ;;  %v2442_v6 = vld [vmem:[%s6681_s4 + $0x388] sm:$0xff] }
 0x3d8   : > { %2683 = vmatmul.f32.gmra.mxu2 %v6786_v48  ;;  %v5955_v24 = vadd.f32 %v5867_v44, %v2747_v7  ;;  %2971 = vmatmul.f32.gmra.mxu1 %v5946_v31  ;;  %v2445_v44 = vld [vmem:[%s6681_s4 + $0x3a0] sm:$0xff]  ;;  %v5993_v48 = vld [vmem:[#allocation3 + $0x99] sm:$0xff] }
 0x3d9   : > { %2796 = vmatmul.f32.gmra.mxu3 %v2131_v19  ;;  %3275 = vmatpush.msra.mxu0 %v2445_v44  ;;  %v2427_v19 = vld [vmem:[%s6681_s4 + $0x310] sm:$0xff]  ;;  %v2409_v44 = vld [vmem:[%s6681_s4 + $0x280] sm:$0xff] }
 0x3da   : > { %2915 = vmatmul.f32.gmra.mxu0 %v5734_v34  ;;  %v2428_v34 = vld [vmem:[%s6681_s4 + $0x318] sm:$0xff]  ;;  %3050 = vmatpush.msra.mxu2 %v2412_v46 }
 0x3db   : > { %v2636_v32 = vpop.f32.mrf.mxu2  ;;  %3163 = vmatpush.msra.mxu3 %v2428_v34  ;;  %3276 = vmatpush.msra.mxu0 %v2444_v43 }
 0x3dc   : > { %v2749_v53 = vpop.f32.mrf.mxu3  ;;  %v2637_v25 = vadd.f32 %v2636_v32, %v5624_v56  ;;  %v2411_v56 = vld [vmem:[%s6681_s4 + $0x290] sm:$0xff] }
 0x3dd   : > { %v5981_v1 = vpop.f32.mrf.mxu1  ;;  %3051 = vmatpush.msra.mxu2 %v2411_v56  ;;  %3164 = vmatpush.msra.mxu3 %v2427_v19  ;;  %v2167_v19 = vld [vmem:[#allocation3 + $0x188] sm:$0xff] }
 0x3de   : > { %v2750_v7 = vadd.f32 %v2749_v53, %v2637_v25  ;;  %3277 = vmatpush.msra.mxu0 %v2443_v54  ;;  %v2425_v53 = vld [vmem:[%s6681_s4 + $0x300] sm:$0xff] }
 0x3df   : > { %v5986_v33 = vpop.f32.mrf.mxu0  ;;  %3052 = vmatpush.msra.mxu2 %v2410_v5  ;;  %3165 = vmatpush.msra.mxu3 %v2426_v2  ;;  %v2441_v25 = vld [vmem:[%s6681_s4 + $0x380] sm:$0xff] }
 0x3e0   : > { %2686 = vmatmul.f32.gmra.mxu2 %v6787_v3  ;;  %v6002_v23 = vadd.f32 %v5883_v4, %v2750_v7  ;;  %2974 = vmatmul.f32.gmra.mxu1 %v5993_v48  ;;  %v2133_v7 = vld [vmem:[#allocation3 + $0x15a] sm:$0xff]  ;;  %v2464_v3 = vld [vmem:[%s6681_s4 + $0x438] sm:$0xff] }
 0x3e1   : > { %2799 = vmatmul.f32.gmra.mxu3 %v2132_v0  ;;  %3278 = vmatpush.msra.mxu0 %v2442_v6  ;;  %v6025_v0 = vld [vmem:[#allocation3 + $0xa9] sm:$0xff] }
 0x3e2   : > { %6788 = vst [vmem:[#allocation10_spill] sm:$0xff] %v6002_v23  ;;  %2918 = vmatmul.f32.gmra.mxu0 %v2166_v63  ;;  %3053 = vmatpush.msra.mxu2 %v2409_v44  ;;  %v2134_v2 = vld [vmem:[#allocation3 + $0x16a] sm:$0xff] }
 0x3e3   : > { %v2639_v4 = vpop.f32.mrf.mxu2  ;;  %3166 = vmatpush.msra.mxu3 %v2425_v53  ;;  %3279 = vmatpush.msra.mxu0 %v2441_v25  ;;  %v2135_v25 = vld [vmem:[#allocation3 + $0x172] sm:$0xff]  ;;  %v6234_v23 = vld [vmem:[#allocation3 + $0x169] sm:$0xff] }
 0x3e4   : > { %v2752_v32 = vpop.f32.mrf.mxu3  ;;  %v2640_v46 = vadd.f32 %v2639_v4, %v5646_v10  ;;  %3385 = vmatpush.msra.mxu1 %v2464_v3 }
 0x3e5   : > { %v6021_v43 = vpop.f32.mrf.mxu1 }
 0x3e6   : > { %v2753_v34 = vadd.f32 %v2752_v32, %v2640_v46 }
 0x3e7   : > { %v2874_v56 = vpop.f32.mrf.mxu0 }
 0x3e8   : > { %2689 = vmatmul.f32.gmra.mxu2 %v1948_v60  ;;  %v6028_v10 = vadd.f32 %v5908_v62, %v2753_v34  ;;  %2977 = vmatmul.f32.gmra.mxu1 %v6025_v0  ;;  %v6039_v62 = vld [vmem:[#allocation3 + $0xb1] sm:$0xff]  ;;  %v6051_v34 = vld [vmem:[#allocation3 + $0xc1] sm:$0xff] }
 0x3e9   : > { %2802 = vmatmul.f32.gmra.mxu3 %v2133_v7 }
 0x3ea   : > { %6789 = vst [vmem:[#allocation14_spill] sm:$0xff] %v6028_v10  ;;  %2921 = vmatmul.f32.gmra.mxu0 %v2167_v19  ;;  %v6207_v10 = vld [vmem:[#allocation3 + $0x151] sm:$0xff] }
 0x3eb   : > { %v2642_v54 = vpop.f32.mrf.mxu2 }
 0x3ec   : > { %v2755_v5 = vpop.f32.mrf.mxu3  ;;  %v2643_v49 = vadd.f32 %v2642_v54, %v5677_v58  ;;  %v2200_v54 = vld [vmem:[#allocation3 + $0x1a] sm:$0xff] }
 0x3ed   : > { %v6035_v63 = vpop.f32.mrf.mxu1 }
 0x3ee   : > { %v2756_v60 = vadd.f32 %v2755_v5, %v2643_v49  ;;  %v2233_v5 = vld [vmem:[#allocation3 + $0x30] sm:$0xff] }
 0x3ef   : > { %v2877_v6 = vpop.f32.mrf.mxu0  ;;  %v6064_v49 = vld [vmem:[#allocation3 + $0xc9] sm:$0xff] }
 0x3f0   : > { %2692 = vmatmul.f32.gmra.mxu2 %v1949_v59  ;;  %v6042_v44 = vadd.f32 %v5939_v11, %v2756_v60  ;;  %2980 = vmatmul.f32.gmra.mxu1 %v6039_v62  ;;  %v6791_v59 = vmax.f32 %v5700_v29, 0.0 }
 0x3f1   : > { %2805 = vmatmul.f32.gmra.mxu3 %v2134_v2 }
 0x3f2   : > { %6790 = vst [vmem:[#allocation11_spill] sm:$0xff] %v6042_v44  ;;  %3280 = vmatmul.f32.vlgmr.msra.gmra.mxu0 %v5781_v17  ;;  %v6180_v44 = vld [vmem:[#allocation3 + $0x139] sm:$0xff] }
 0x3f3   : > { %v2645_v4 = vpop.f32.mrf.mxu2 }
 0x3f4   : > { %v2758_v58 = vpop.f32.mrf.mxu3  ;;  %v2646_v32 = vadd.f32 %v2645_v4, %v5703_v61  ;;  %v2463_v61 = vld [vmem:[%s6681_s4 + $0x430] sm:$0xff] }
 0x3f5   : > { %v6047_v46 = vpop.f32.mrf.mxu1  ;;  %3386 = vmatpush.msra.mxu1 %v2463_v61 }
 0x3f6   : > { %v2759_v53 = vadd.f32 %v2758_v58, %v2646_v32  ;;  %v2201_v32 = vld [vmem:[#allocation3 + $0x22] sm:$0xff] }
 0x3f7   : > { %v2880_v51 = vpop.f32.mrf.mxu0 }
 0x3f8   : > { %2695 = vmatmul.f32.gmra.mxu2 %v6791_v59  ;;  %v6054_v11 = vadd.f32 %v5986_v33, %v2759_v53  ;;  %2983 = vmatmul.f32.gmra.mxu1 %v6051_v34  ;;  %v2234_v53 = vld [vmem:[#allocation3 + $0x38] sm:$0xff] }
 0x3f9   : > { %2808 = vmatmul.f32.gmra.mxu3 %v2135_v25  ;;  %v6073_v59 = vld [vmem:[#allocation3 + $0xd9] sm:$0xff] }
 0x3fa   : > { %6792 = vst [vmem:[#allocation13_spill] sm:$0xff] %v6054_v11  ;;  %3283 = vmatmul.f32.gmra.mxu0 %v5801_v26 }
 0x3fb   : > { %v2648_v17 = vpop.f32.mrf.mxu2 }
 0x3fc   : > { %v2761_v7 = vpop.f32.mrf.mxu3  ;;  %v2649_v29 = vadd.f32 %v2648_v17, %v5726_v41 }
 0x3fd   : > { %v6062_v3 = vpop.f32.mrf.mxu1 }
 0x3fe   : > { %v2762_v19 = vadd.f32 %v2761_v7, %v2649_v29 }
 0x3ff   : > { %v2883_v33 = vpop.f32.mrf.mxu0 }
 0x400   : > { %3054 = vmatmul.f32.vlgmr.msra.gmra.mxu2 %v2200_v54  ;;  %v6066_v60 = vadd.f32 %v2874_v56, %v2762_v19  ;;  %2986 = vmatmul.f32.gmra.mxu1 %v6064_v49  ;;  %v6085_v19 = vld [vmem:[#allocation3 + $0x32] sm:$0xff] }
 0x401   : > { %3167 = vmatmul.f32.vlgmr.msra.gmra.mxu3 %v2233_v5  ;;  %v6087_v5 = vld [vmem:[#allocation3 + $0xe1] sm:$0xff] }
 0x402   : > { %6793 = vst [vmem:[#allocation12_spill] sm:$0xff] %v6066_v60  ;;  %3286 = vmatmul.f32.gmra.mxu0 %v5815_v22  ;;  %v2462_v22 = vld [vmem:[%s6681_s4 + $0x428] sm:$0xff]  ;;  %v6153_v60 = vld [vmem:[#allocation3 + $0x121] sm:$0xff] }
 0x403   : > { %v2651_v26 = vpop.f32.mrf.mxu2  ;;  %3387 = vmatpush.msra.mxu1 %v2462_v22 }
 0x404   : > { %v2764_v2 = vpop.f32.mrf.mxu3  ;;  %v2652_v41 = vadd.f32 %v2651_v26, %v5744_v27 }
 0x405   : > { %v6071_v58 = vpop.f32.mrf.mxu1 }
 0x406   : > { %v2765_v4 = vadd.f32 %v2764_v2, %v2652_v41 }
 0x407   : > { %v2886_v25 = vpop.f32.mrf.mxu0 }
 0x408   : > { %3057 = vmatmul.f32.gmra.mxu2 %v2201_v32  ;;  %v6075_v56 = vadd.f32 %v2877_v6, %v2765_v4  ;;  %2989 = vmatmul.f32.gmra.mxu1 %v6073_v59  ;;  %v2235_v6 = vld [vmem:[#allocation3 + $0x48] sm:$0xff]  ;;  %v6097_v32 = vld [vmem:[#allocation3 + $0x3a] sm:$0xff] }
 0x409   : > { %3170 = vmatmul.f32.gmra.mxu3 %v2234_v53  ;;  %v2236_v53 = vld [vmem:[#allocation3 + $0x50] sm:$0xff] }
 0x40a   : > { %6794 = vst [vmem:[#allocation15_spill] sm:$0xff] %v6075_v56  ;;  %3289 = vmatmul.f32.gmra.mxu0 %v5835_v18 }
 0x40b   : > { %v2654_v27 = vpop.f32.mrf.mxu2 }
 0x40c   : > { %v2767_v61 = vpop.f32.mrf.mxu3  ;;  %v2655_v17 = vadd.f32 %v2654_v27, %v5759_v42  ;;  %v6099_v27 = vld [vmem:[#allocation3 + $0xf1] sm:$0xff] }
 0x40d   : > { %v6083_v29 = vpop.f32.mrf.mxu1 }
 0x40e   : > { %v2768_v7 = vadd.f32 %v2767_v61, %v2655_v17 }
 0x40f   : > { %v2889_v54 = vpop.f32.mrf.mxu0 }
 0x410   : > { %3060 = vmatmul.f32.gmra.mxu2 %v6085_v19  ;;  %v6090_v26 = vadd.f32 %v2880_v51, %v2768_v7  ;;  %2992 = vmatmul.f32.gmra.mxu1 %v6087_v5 }
 0x411   : > { %3173 = vmatmul.f32.gmra.mxu3 %v2235_v6 }
 0x412   : > { %6795 = vst [vmem:[#allocation4_spill] sm:$0xff] %v6090_v26  ;;  %3292 = vmatmul.f32.gmra.mxu0 %v5849_v37  ;;  %v6126_v26 = vld [vmem:[#allocation3 + $0x109] sm:$0xff] }
 0x413   : > { %v2657_v18 = vpop.f32.mrf.mxu2 }
 0x414   : > { %v2770_v42 = vpop.f32.mrf.mxu3  ;;  %v2658_v2 = vadd.f32 %v2657_v18, %v5774_v13  ;;  %v2461_v13 = vld [vmem:[%s6681_s4 + $0x420] sm:$0xff] }
 0x415   : > { %v6095_v4 = vpop.f32.mrf.mxu1  ;;  %3388 = vmatpush.msra.mxu1 %v2461_v13  ;;  %v6112_v18 = vld [vmem:[#allocation3 + $0x4a] sm:$0xff] }
 0x416   : > { %v2771_v41 = vadd.f32 %v2770_v42, %v2658_v2  ;;  %v6114_v2 = vld [vmem:[#allocation3 + $0xf9] sm:$0xff] }
 0x417   : > { %v2892_v22 = vpop.f32.mrf.mxu0 }
 0x418   : > { %3063 = vmatmul.f32.gmra.mxu2 %v6097_v32  ;;  %v6102_v51 = vadd.f32 %v2883_v33, %v2771_v41  ;;  %2995 = vmatmul.f32.gmra.mxu1 %v6099_v27  ;;  %v2237_v33 = vld [vmem:[#allocation3 + $0x60] sm:$0xff] }
 0x419   : > { %3176 = vmatmul.f32.gmra.mxu3 %v2236_v53 }
 0x41a   : > { %6796 = vst [vmem:[#allocation17_spill] sm:$0xff] %v6102_v51  ;;  %3295 = vmatmul.f32.gmra.mxu0 %v5871_v30 }
 0x41b   : > { %v2660_v37 = vpop.f32.mrf.mxu2 }
 0x41c   : > { %v2773_v61 = vpop.f32.mrf.mxu3  ;;  %v2661_v17 = vadd.f32 %v2660_v37, %v5791_v52 }
 0x41d   : > { %v6110_v6 = vpop.f32.mrf.mxu1 }
 0x41e   : > { %v2774_v7 = vadd.f32 %v2773_v61, %v2661_v17  ;;  %v6124_v61 = vld [vmem:[#allocation3 + $0x52] sm:$0xff]  ;;  %v2238_v17 = vld [vmem:[#allocation3 + $0x68] sm:$0xff] }
 0x41f   : > { %v2895_v42 = vpop.f32.mrf.mxu0 }
 0x420   : > { %3066 = vmatmul.f32.gmra.mxu2 %v6112_v18  ;;  %v6117_v41 = vadd.f32 %v2886_v25, %v2774_v7  ;;  %2998 = vmatmul.f32.gmra.mxu1 %v6114_v2 }
 0x421   : > { %3179 = vmatmul.f32.gmra.mxu3 %v2237_v33 }
 0x422   : > { %6797 = vst [vmem:[#allocation7_spill] sm:$0xff] %v6117_v41  ;;  %3298 = vmatmul.f32.gmra.mxu0 %v5887_v12  ;;  %v2240_v41 = vld [vmem:[#allocation3 + $0x80] sm:$0xff] }
 0x423   : > { %v2663_v30 = vpop.f32.mrf.mxu2 }
 0x424   : > { %v2776_v52 = vpop.f32.mrf.mxu3  ;;  %v2664_v53 = vadd.f32 %v2663_v30, %v5808_v28  ;;  %v2460_v28 = vld [vmem:[%s6681_s4 + $0x418] sm:$0xff] }
 0x425   : > { %v6122_v37 = vpop.f32.mrf.mxu1  ;;  %3389 = vmatpush.msra.mxu1 %v2460_v28 }
 0x426   : > { %v2777_v13 = vadd.f32 %v2776_v52, %v2664_v53  ;;  %v6139_v53 = vld [vmem:[#allocation3 + $0x62] sm:$0xff] }
 0x427   : > { %v2898_v51 = vpop.f32.mrf.mxu0 }
 0x428   : > { %3069 = vmatmul.f32.gmra.mxu2 %v6124_v61  ;;  %v6129_v25 = vadd.f32 %v2889_v54, %v2777_v13  ;;  %3001 = vmatmul.f32.gmra.mxu1 %v6126_v26  ;;  %v2239_v54 = vld [vmem:[#allocation3 + $0x78] sm:$0xff] }
 0x429   : > { %3182 = vmatmul.f32.gmra.mxu3 %v2238_v17  ;;  %v6141_v17 = vld [vmem:[#allocation3 + $0x111] sm:$0xff] }
 0x42a   : > { %6798 = vst [vmem:[#allocation16_spill] sm:$0xff] %v6129_v25  ;;  %3301 = vmatmul.f32.gmra.mxu0 %v5912_v40 }
 0x42b   : > { %v2666_v12 = vpop.f32.mrf.mxu2 }
 0x42c   : > { %v2779_v7 = vpop.f32.mrf.mxu3  ;;  %v2667_v33 = vadd.f32 %v2666_v12, %v5825_v35 }
 0x42d   : > { %v6137_v52 = vpop.f32.mrf.mxu1 }
 0x42e   : > { %v2780_v30 = vadd.f32 %v2779_v7, %v2667_v33  ;;  %v6151_v33 = vld [vmem:[#allocation3 + $0x6a] sm:$0xff] }
 0x42f   : > { %v2901_v13 = vpop.f32.mrf.mxu0 }
 0x430   : > { %3072 = vmatmul.f32.gmra.mxu2 %v6139_v53  ;;  %v6144_v25 = vadd.f32 %v2892_v22, %v2780_v30  ;;  %3004 = vmatmul.f32.gmra.mxu1 %v6141_v17 }
 0x431   : > { %3185 = vmatmul.f32.gmra.mxu3 %v2239_v54 }
 0x432   : > { %6799 = vst [vmem:[#allocation19_spill] sm:$0xff] %v6144_v25  ;;  %3304 = vmatmul.f32.gmra.mxu0 %v5946_v31  ;;  %v2242_v25 = vld [vmem:[#allocation3 + $0x98] sm:$0xff] }
 0x433   : > { %v2669_v40 = vpop.f32.mrf.mxu2 }
 0x434   : > { %v2782_v35 = vpop.f32.mrf.mxu3  ;;  %v2670_v28 = vadd.f32 %v2669_v40, %v5842_v50  ;;  %v2459_v50 = vld [vmem:[%s6681_s4 + $0x410] sm:$0xff] }
 0x435   : > { %v6149_v7 = vpop.f32.mrf.mxu1  ;;  %3390 = vmatpush.msra.mxu1 %v2459_v50 }
 0x436   : > { %v2783_v12 = vadd.f32 %v2782_v35, %v2670_v28  ;;  %v6166_v28 = vld [vmem:[#allocation3 + $0x7a] sm:$0xff] }
 0x437   : > { %v2904_v56 = vpop.f32.mrf.mxu0 }
 0x438   : > { %3075 = vmatmul.f32.gmra.mxu2 %v6151_v33  ;;  %v6156_v22 = vadd.f32 %v2895_v42, %v2783_v12  ;;  %3007 = vmatmul.f32.gmra.mxu1 %v6153_v60  ;;  %v2241_v42 = vld [vmem:[#allocation3 + $0x90] sm:$0xff] }
 0x439   : > { %3188 = vmatmul.f32.gmra.mxu3 %v2240_v41  ;;  %v6168_v12 = vld [vmem:[#allocation3 + $0x129] sm:$0xff] }
 0x43a   : > { %6800 = vst [vmem:[#allocation5_spill] sm:$0xff] %v6156_v22  ;;  %3307 = vmatmul.f32.gmra.mxu0 %v5993_v48 }
 0x43b   : > { %v2672_v31 = vpop.f32.mrf.mxu2 }
 0x43c   : > { %v2785_v30 = vpop.f32.mrf.mxu3  ;;  %v2673_v54 = vadd.f32 %v2672_v31, %v5859_v8 }
 0x43d   : > { %v6164_v35 = vpop.f32.mrf.mxu1 }
 0x43e   : > { %v2786_v40 = vadd.f32 %v2785_v30, %v2673_v54  ;;  %v6178_v54 = vld [vmem:[#allocation3 + $0x82] sm:$0xff] }
 0x43f   : > { %v2907_v41 = vpop.f32.mrf.mxu0 }
 0x440   : > { %3078 = vmatmul.f32.gmra.mxu2 %v6166_v28  ;;  %v6171_v22 = vadd.f32 %v2898_v51, %v2786_v40  ;;  %3010 = vmatmul.f32.gmra.mxu1 %v6168_v12 }
 0x441   : > { %3191 = vmatmul.f32.gmra.mxu3 %v2241_v42 }
 0x442   : > { %6801 = vst [vmem:[#allocation18_spill] sm:$0xff] %v6171_v22  ;;  %3310 = vmatmul.f32.gmra.mxu0 %v6025_v0  ;;  %v2244_v22 = vld [vmem:[#allocation3 + $0xb0] sm:$0xff] }
 0x443   : > { %v2675_v48 = vpop.f32.mrf.mxu2 }
 0x444   : > { %v2788_v8 = vpop.f32.mrf.mxu3  ;;  %v2676_v50 = vadd.f32 %v2675_v48, %v5878_v57  ;;  %v2458_v57 = vld [vmem:[%s6681_s4 + $0x408] sm:$0xff] }
 0x445   : > { %v6176_v30 = vpop.f32.mrf.mxu1  ;;  %3391 = vmatpush.msra.mxu1 %v2458_v57 }
 0x446   : > { %v2789_v31 = vadd.f32 %v2788_v8, %v2676_v50  ;;  %v6193_v50 = vld [vmem:[#allocation3 + $0x92] sm:$0xff] }
 0x447   : > { %v2910_v11 = vpop.f32.mrf.mxu0 }
 0x448   : > { %3081 = vmatmul.f32.gmra.mxu2 %v6178_v54  ;;  %v6183_v51 = vadd.f32 %v2901_v13, %v2789_v31  ;;  %3013 = vmatmul.f32.gmra.mxu1 %v6180_v44  ;;  %v6195_v13 = vld [vmem:[#allocation3 + $0x141] sm:$0xff] }
 0x449   : > { %3194 = vmatmul.f32.gmra.mxu3 %v2242_v25  ;;  %v2243_v25 = vld [vmem:[#allocation3 + $0xa8] sm:$0xff] }
 0x44a   : > { %6802 = vst [vmem:[#allocation6_spill] sm:$0xff] %v6183_v51  ;;  %3313 = vmatmul.f32.gmra.mxu0 %v6039_v62 }
 0x44b   : > { %v2678_v0 = vpop.f32.mrf.mxu2 }
 0x44c   : > { %v2791_v40 = vpop.f32.mrf.mxu3  ;;  %v2679_v42 = vadd.f32 %v2678_v0, %v5897_v16 }
 0x44d   : > { %v6191_v8 = vpop.f32.mrf.mxu1 }
 0x44e   : > { %v2792_v48 = vadd.f32 %v2791_v40, %v2679_v42  ;;  %v6205_v42 = vld [vmem:[#allocation3 + $0x9a] sm:$0xff] }
 0x44f   : > { %v2913_v31 = vpop.f32.mrf.mxu0 }
 0x450   : > { %3084 = vmatmul.f32.gmra.mxu2 %v6193_v50  ;;  %v6198_v51 = vadd.f32 %v2904_v56, %v2792_v48  ;;  %3016 = vmatmul.f32.gmra.mxu1 %v6195_v13 }
 0x451   : > { %3197 = vmatmul.f32.gmra.mxu3 %v2243_v25 }
 0x452   : > { %6803 = vst [vmem:[#allocation8_spill] sm:$0xff] %v6198_v51  ;;  %3316 = vmatmul.f32.gmra.mxu0 %v6051_v34  ;;  %v2457_v34 = vld [vmem:[%s6681_s4 + $0x400] sm:$0xff] }
 0x453   : > { %v2681_v62 = vpop.f32.mrf.mxu2  ;;  %3392 = vmatpush.msra.mxu1 %v2457_v34  ;;  %v6232_v51 = vld [vmem:[#allocation3 + $0xb2] sm:$0xff] }
 0x454   : > { %v2794_v16 = vpop.f32.mrf.mxu3  ;;  %v2682_v57 = vadd.f32 %v2681_v62, %v5928_v39 }
 0x455   : > { %v6203_v40 = vpop.f32.mrf.mxu1 }
 0x456   : > { %v2795_v0 = vadd.f32 %v2794_v16, %v2682_v57 }
 0x457   : > { %v2916_v39 = vpop.f32.mrf.mxu0 }
 0x458   : > { %3087 = vmatmul.f32.gmra.mxu2 %v6205_v42  ;;  %v6210_v56 = vadd.f32 %v2907_v41, %v2795_v0  ;;  %3019 = vmatmul.f32.gmra.mxu1 %v6207_v10  ;;  %v2245_v41 = vld [vmem:[#allocation3 + $0xc0] sm:$0xff] }
 0x459   : > { %3200 = vmatmul.f32.gmra.mxu3 %v2244_v22  ;;  %v6220_v22 = vld [vmem:[#allocation3 + $0xaa] sm:$0xff]  ;;  %v6222_v0 = vld [vmem:[#allocation3 + $0x159] sm:$0xff] }
 0x45a   : > { %6804 = vst [vmem:[#allocation9_spill] sm:$0xff] %v6210_v56  ;;  %3319 = vmatmul.f32.gmra.mxu0 %v6064_v49 }
 0x45b   : > { %v2684_v48 = vpop.f32.mrf.mxu2 }
 0x45c   : > { %v2797_v25 = vpop.f32.mrf.mxu3  ;;  %v2685_v62 = vadd.f32 %v2684_v48, %v5981_v1 }
 0x45d   : > { %v6218_v57 = vpop.f32.mrf.mxu1 }
 0x45e   : > { %v2798_v16 = vadd.f32 %v2797_v25, %v2685_v62  ;;  %6805 = vst [vmem:[#allocation20_spill] sm:$0xff] %v6218_v57  ;;  %v2246_v57 = vld [vmem:[#allocation3 + $0xc8] sm:$0xff] }
 0x45f   : > { %v2919_v48 = vpop.f32.mrf.mxu0 }
 0x460   : > { %3090 = vmatmul.f32.gmra.mxu2 %v6220_v22  ;;  %v6225_v56 = vadd.f32 %v2910_v11, %v2798_v16  ;;  %3022 = vmatmul.f32.gmra.mxu1 %v6222_v0 }
 0x461   : > { %3203 = vmatmul.f32.gmra.mxu3 %v2245_v41 }
 0x462   : > { %6806 = vst [vmem:[#allocation21_spill] sm:$0xff] %v6225_v56  ;;  %3322 = vmatmul.f32.gmra.mxu0 %v6073_v59  ;;  %v2247_v56 = vld [vmem:[#allocation3 + $0xd8] sm:$0xff] }
 0x463   : > { %v2687_v49 = vpop.f32.mrf.mxu2 }
 0x464   : > { %v2800_v34 = vpop.f32.mrf.mxu3  ;;  %v2688_v1 = vadd.f32 %v2687_v49, %v6021_v43 }
 0x465   : > { %v6230_v62 = vpop.f32.mrf.mxu1 }
 0x466   : > { %v2801_v25 = vadd.f32 %v2800_v34, %v2688_v1  ;;  %6807 = vst [vmem:[#allocation22_spill] sm:$0xff] %v6230_v62  ;;  %v6244_v1 = vld [vmem:[#allocation3 + $0xc2] sm:$0xff]  ;;  %v6246_v62 = vld [vmem:[#allocation3 + $0x171] sm:$0xff] }
 0x467   : > { %v2922_v34 = vpop.f32.mrf.mxu0 }
 0x468   : > { %3093 = vmatmul.f32.gmra.mxu2 %v6232_v51  ;;  %v6237_v11 = vadd.f32 %v2913_v31, %v2801_v25  ;;  %3025 = vmatmul.f32.gmra.mxu1 %v6234_v23 }
 0x469   : > { %3206 = vmatmul.f32.gmra.mxu3 %v2246_v57 }
 0x46a   : > { %6808 = vst [vmem:[#allocation23_spill] sm:$0xff] %v6237_v11  ;;  %3325 = vmatmul.f32.gmra.mxu0 %v6087_v5  ;;  %v6258_v11 = vld [vmem:[#allocation3 + $0x181] sm:$0xff] }
 0x46b   : > { %v2690_v59 = vpop.f32.mrf.mxu2 }
 0x46c   : > { %v2803_v43 = vpop.f32.mrf.mxu3  ;;  %v2691_v16 = vadd.f32 %v2690_v59, %v6035_v63 }
 0x46d   : > { %v6242_v49 = vpop.f32.mrf.mxu1 }
 0x46e   : > { %v2804_v41 = vadd.f32 %v2803_v43, %v2691_v16  ;;  %v6256_v43 = vld [vmem:[#allocation3 + $0xca] sm:$0xff]  ;;  %v2248_v16 = vld [vmem:[#allocation3 + $0xe0] sm:$0xff] }
 0x470   : > { %3096 = vmatmul.f32.gmra.mxu2 %v6244_v1  ;;  %v6249_v31 = vadd.f32 %v2916_v39, %v2804_v41  ;;  %3028 = vmatmul.f32.gmra.mxu1 %v6246_v62 }
 0x471   : > { %3209 = vmatmul.f32.gmra.mxu3 %v2247_v56  ;;  %v3281_v56 = vpop.f32.mrf.mxu0 }
 0x472   : > { %6809 = vst [vmem:[#allocation24_spill] sm:$0xff] %v6249_v31  ;;  %3328 = vmatmul.f32.gmra.mxu0 %v6099_v27  ;;  %v2249_v31 = vld [vmem:[#allocation3 + $0xf0] sm:$0xff] }
 0x473   : > { %v2693_v5 = vpop.f32.mrf.mxu2 }
 0x474   : > { %v2806_v63 = vpop.f32.mrf.mxu3  ;;  %v2694_v57 = vadd.f32 %v2693_v5, %v6047_v46 }
 0x475   : > { %v6254_v59 = vpop.f32.mrf.mxu1 }
 0x476   : > { %v2807_v25 = vadd.f32 %v2806_v63, %v2694_v57  ;;  %6810 = vst [vmem:[#allocation25_spill] sm:$0xff] %v6254_v59  ;;  %v6268_v57 = vld [vmem:[#allocation3 + $0xda] sm:$0xff]  ;;  %v6270_v59 = vld [vmem:[#allocation3 + $0x189] sm:$0xff] }
 0x478   : > { %3099 = vmatmul.f32.gmra.mxu2 %v6256_v43  ;;  %v6261_v39 = vadd.f32 %v2919_v48, %v2807_v25  ;;  %3031 = vmatmul.f32.gmra.mxu1 %v6258_v11 }
 0x479   : > { %3212 = vmatmul.f32.gmra.mxu3 %v2248_v16  ;;  %v3284_v25 = vpop.f32.mrf.mxu0 }
 0x47a   : > { %6811 = vst [vmem:[#allocation26_spill] sm:$0xff] %v6261_v39  ;;  %3331 = vmatmul.f32.gmra.mxu0 %v6114_v2  ;;  %v2943_v2 = vadd.f32 %v6071_v58, %v5752_v36  ;;  %v6281_v39 = vld [vmem:[#allocation3 + $0xe2] sm:$0xff]  ;;  %v2946_v36 = vadd.f32 %v6083_v29, %v5770_v45  ;;  %v2949_v45 = vadd.f32 %v6095_v4, %v5783_v20 }
 0x47b   : > { %v2696_v27 = vpop.f32.mrf.mxu2  ;;  %v2952_v20 = vadd.f32 %v6110_v6, %v5803_v55  ;;  %v2955_v55 = vadd.f32 %v6122_v37, %v5817_v21  ;;  %v2958_v21 = vadd.f32 %v6137_v52, %v5837_v14  ;;  %v2961_v14 = vadd.f32 %v6149_v7, %v5851_v38 }
 0x47c   : > { %v2809_v46 = vpop.f32.mrf.mxu3  ;;  %v2697_v41 = vadd.f32 %v2696_v27, %v6062_v3  ;;  %v2964_v38 = vadd.f32 %v6164_v35, %v5873_v47  ;;  %v6367_v35 = vld [vmem:[#allocation3 + $0x142] sm:$0xff] }
 0x47d   : > { %v6266_v63 = vpop.f32.mrf.mxu1 }
 0x47e   : > { %v2810_v5 = vadd.f32 %v2809_v46, %v2697_v41  ;;  %6812 = vst [vmem:[#allocation27_spill] sm:$0xff] %v6266_v63  ;;  %v2250_v63 = vld [vmem:[#allocation3 + $0xf8] sm:$0xff] }
 0x480   : > { %3102 = vmatmul.f32.gmra.mxu2 %v6268_v57  ;;  %v6273_v48 = vadd.f32 %v2922_v34, %v2810_v5  ;;  %3034 = vmatmul.f32.gmra.mxu1 %v6270_v59 }
 0x481   : > { %3215 = vmatmul.f32.gmra.mxu3 %v2249_v31  ;;  %v3287_v5 = vpop.f32.mrf.mxu0 }
 0x482   : > { %3334 = vmatmul.f32.gmra.mxu0 %v6126_v26 }
 0x483   : > { %v3055_v3 = vpop.f32.mrf.mxu2 }
 0x484   : > { %v3168_v16 = vpop.f32.mrf.mxu3  ;;  %v3056_v27 = vadd.f32 %v3055_v3, %v2943_v2 }
 0x485   : > { %v6279_v41 = vpop.f32.mrf.mxu1 }
 0x486   : > { %v3169_v46 = vadd.f32 %v3168_v16, %v3056_v27  ;;  %v6292_v16 = vld [vmem:[#allocation3 + $0xf2] sm:$0xff]  ;;  %v2251_v27 = vld [vmem:[#allocation3 + $0x108] sm:$0xff] }
 0x488   : > { %3105 = vmatmul.f32.gmra.mxu2 %v6281_v39  ;;  %v6284_v34 = vadd.f32 %v3281_v56, %v3169_v46  ;;  %3393 = vmatmul.f32.vlgmr.msra.gmra.mxu1 %v6085_v19 }
 0x489   : > { %3218 = vmatmul.f32.gmra.mxu3 %v2250_v63 }
 0x48a   : > { %3337 = vmatmul.f32.gmra.mxu0 %v6141_v17 }
 0x48b   : > { %v3058_v58 = vpop.f32.mrf.mxu2 }
 0x48c   : > { %v3171_v26 = vpop.f32.mrf.mxu3  ;;  %v3059_v31 = vadd.f32 %v3058_v58, %v2946_v36  ;;  %v3290_v36 = vpop.f32.mrf.mxu0  ;;  %v6303_v58 = vld [vmem:[#allocation3 + $0xfa] sm:$0xff] }
 0x48d   : > { %v6290_v3 = vpop.f32.mrf.mxu1 }
 0x48e   : > { %v3172_v2 = vadd.f32 %v3171_v26, %v3059_v31  ;;  %v2252_v26 = vld [vmem:[#allocation3 + $0x110] sm:$0xff] }
 0x490   : > { %3108 = vmatmul.f32.gmra.mxu2 %v6292_v16  ;;  %v6295_v56 = vadd.f32 %v3284_v25, %v3172_v2  ;;  %3396 = vmatmul.f32.gmra.mxu1 %v6097_v32 }
 0x491   : > { %3221 = vmatmul.f32.gmra.mxu3 %v2251_v27  ;;  %v6314_v27 = vld [vmem:[#allocation3 + $0x10a] sm:$0xff] }
 0x492   : > { %3340 = vmatmul.f32.gmra.mxu0 %v6153_v60 }
 0x493   : > { %v3061_v29 = vpop.f32.mrf.mxu2 }
 0x494   : > { %v3174_v19 = vpop.f32.mrf.mxu3  ;;  %v3062_v17 = vadd.f32 %v3061_v29, %v2949_v45  ;;  %v2253_v45 = vld [vmem:[#allocation3 + $0x120] sm:$0xff]  ;;  %v3293_v29 = vpop.f32.mrf.mxu0 }
 0x495   : > { %v6301_v46 = vpop.f32.mrf.mxu1 }
 0x496   : > { %v3175_v63 = vadd.f32 %v3174_v19, %v3062_v17 }
 0x498   : > { %3111 = vmatmul.f32.gmra.mxu2 %v6303_v58  ;;  %v6306_v25 = vadd.f32 %v3287_v5, %v3175_v63  ;;  %3399 = vmatmul.f32.gmra.mxu1 %v6112_v18  ;;  %v6325_v63 = vld [vmem:[#allocation3 + $0x112] sm:$0xff] }
 0x499   : > { %3224 = vmatmul.f32.gmra.mxu3 %v2252_v26  ;;  %v2254_v26 = vld [vmem:[#allocation3 + $0x128] sm:$0xff] }
 0x49a   : > { %3343 = vmatmul.f32.gmra.mxu0 %v6168_v12 }
 0x49b   : > { %v3064_v60 = vpop.f32.mrf.mxu2 }
 0x49c   : > { %v3177_v4 = vpop.f32.mrf.mxu3  ;;  %v3065_v32 = vadd.f32 %v3064_v60, %v2952_v20 }
 0x49d   : > { %v6312_v2 = vpop.f32.mrf.mxu1 }
 0x49e   : > { %v3178_v31 = vadd.f32 %v3177_v4, %v3065_v32  ;;  %v6336_v32 = vld [vmem:[#allocation3 + $0x122] sm:$0xff] }
 0x4a0   : > { %3114 = vmatmul.f32.gmra.mxu2 %v6314_v27  ;;  %v6317_v5 = vadd.f32 %v3290_v36, %v3178_v31  ;;  %3402 = vmatmul.f32.gmra.mxu1 %v6124_v61  ;;  %v2255_v31 = vld [vmem:[#allocation3 + $0x138] sm:$0xff] }
 0x4a1   : > { %3227 = vmatmul.f32.gmra.mxu3 %v2253_v45 }
 0x4a2   : > { %3346 = vmatmul.f32.gmra.mxu0 %v6180_v44  ;;  %v3296_v44 = vpop.f32.mrf.mxu0 }
 0x4a3   : > { %v3067_v6 = vpop.f32.mrf.mxu2 }
 0x4a4   : > { %v3180_v18 = vpop.f32.mrf.mxu3  ;;  %v3068_v12 = vadd.f32 %v3067_v6, %v2955_v55 }
 0x4a5   : > { %v6323_v17 = vpop.f32.mrf.mxu1 }
 0x4a6   : > { %v3181_v19 = vadd.f32 %v3180_v18, %v3068_v12  ;;  %v6347_v18 = vld [vmem:[#allocation3 + $0x12a] sm:$0xff]  ;;  %v2256_v12 = vld [vmem:[#allocation3 + $0x140] sm:$0xff] }
 0x4a8   : > { %3117 = vmatmul.f32.gmra.mxu2 %v6325_v63  ;;  %v6328_v36 = vadd.f32 %v3293_v29, %v3181_v19  ;;  %3405 = vmatmul.f32.gmra.mxu1 %v6139_v53 }
 0x4a9   : > { %3230 = vmatmul.f32.gmra.mxu3 %v2254_v26 }
 0x4aa   : > { %3349 = vmatmul.f32.gmra.mxu0 %v6195_v13  ;;  %v3299_v29 = vpop.f32.mrf.mxu0 }
 0x4ab   : > { %v3070_v37 = vpop.f32.mrf.mxu2 }
 0x4ac   : > { %v3183_v61 = vpop.f32.mrf.mxu3  ;;  %v3071_v20 = vadd.f32 %v3070_v37, %v2958_v21  ;;  %v6358_v37 = vld [vmem:[#allocation3 + $0x13a] sm:$0xff] }
 0x4ad   : > { %v6334_v4 = vpop.f32.mrf.mxu1 }
 0x4ae   : > { %v3184_v60 = vadd.f32 %v3183_v61, %v3071_v20  ;;  %v2257_v61 = vld [vmem:[#allocation3 + $0x150] sm:$0xff] }
 0x4b0   : > { %3120 = vmatmul.f32.gmra.mxu2 %v6336_v32  ;;  %v6339_v45 = vadd.f32 %v3296_v44, %v3184_v60  ;;  %3408 = vmatmul.f32.gmra.mxu1 %v6151_v33  ;;  %v6374_v60 = vld [vmem:[#allocation3 + $0x152] sm:$0xff] }
 0x4b1   : > { %3233 = vmatmul.f32.gmra.mxu3 %v2255_v31  ;;  %v2259_v31 = vld [vmem:[#allocation3 + $0x168] sm:$0xff] }
 0x4b2   : > { %3352 = vmatmul.f32.gmra.mxu0 %v6207_v10  ;;  %v3302_v44 = vpop.f32.mrf.mxu0 }
 0x4b3   : > { %v3073_v52 = vpop.f32.mrf.mxu2 }
 0x4b4   : > { %v3186_v53 = vpop.f32.mrf.mxu3  ;;  %v3074_v13 = vadd.f32 %v3073_v52, %v2961_v14  ;;  %v2260_v14 = vld [vmem:[#allocation3 + $0x170] sm:$0xff]  ;;  %v2261_v52 = vld [vmem:[#allocation3 + $0x180] sm:$0xff] }
 0x4b5   : > { %v6345_v6 = vpop.f32.mrf.mxu1 }
 0x4b6   : > { %v3187_v55 = vadd.f32 %v3186_v53, %v3074_v13  ;;  %v6394_v53 = vld [vmem:[#allocation3 + $0x172] sm:$0xff]  ;;  %v2262_v13 = vld [vmem:[#allocation3 + $0x188] sm:$0xff] }
 0x4b8   : > { %3123 = vmatmul.f32.gmra.mxu2 %v6347_v18  ;;  %v6350_v19 = vadd.f32 %v3299_v29, %v3187_v55  ;;  %3411 = vmatmul.f32.gmra.mxu1 %v6166_v28  ;;  %v2258_v28 = vld [vmem:[#allocation3 + $0x158] sm:$0xff]  ;;  %v6400_v29 = vld [vmem:[#allocation3 + $0x182] sm:$0xff] }
 0x4b9   : > { %3236 = vmatmul.f32.gmra.mxu3 %v2256_v12  ;;  %v6406_v12 = vld [vmem:[#allocation3 + $0x18a] sm:$0xff] }
 0x4ba   : > { %3355 = vmatmul.f32.gmra.mxu0 %v6222_v0 }
 0x4bb   : > { %v3076_v10 = vpop.f32.mrf.mxu2 }
 0x4bc   : > { %v3077_v7 = vadd.f32 %v3076_v10, %v2964_v38  ;;  %v3189_v33 = vpop.f32.mrf.mxu3  ;;  %v6416_v38 = vld [vmem:[%s6682_s5] ss:$0 sm:$0xff] }
 0x4bd   : > { %v6356_v21 = vpop.f32.mrf.mxu1 }
 0x4be   : > { %v3190_v26 = vadd.f32 %v3189_v33, %v3077_v7  ;;  %v6422_v7 = vld [vmem:[%s6683_s6] ss:$0 sm:$0xff] }
 0x4c0   : > { %3126 = vmatmul.f32.gmra.mxu2 %v6358_v37  ;;  %v6361_v20 = vadd.f32 %v3302_v44, %v3190_v26  ;;  %3414 = vmatmul.f32.gmra.mxu1 %v6178_v54  ;;  %v6381_v54 = vld [vmem:[#allocation3 + $0x15a] sm:$0xff] }
 0x4c1   : > { %3239 = vmatmul.f32.gmra.mxu3 %v2257_v61 }
 0x4c2   : > { %3358 = vmatmul.f32.gmra.mxu0 %v6234_v23 }
 0x4c3   : > { %v6427_v26 = vpop.f32.mrf.mxu2 }
 0x4c5   : > { %v6365_v47 = vpop.f32.mrf.mxu1 }
 0x4c8   : > { %3129 = vmatmul.f32.gmra.mxu2 %v6367_v35  ;;  %3417 = vmatmul.f32.gmra.mxu1 %v6193_v50 }
 0x4c9   : > { %3242 = vmatmul.f32.gmra.mxu3 %v2258_v28 }
 0x4ca   : > { %3361 = vmatmul.f32.gmra.mxu0 %v6246_v62  ;;  %v6388_v62 = vld [vmem:[#allocation3 + $0x16a] sm:$0xff] }
 0x4cd   : > { %v6372_v0 = vpop.f32.mrf.mxu1 }
 0x4d0   : > { %3132 = vmatmul.f32.gmra.mxu2 %v6374_v60  ;;  %3420 = vmatmul.f32.gmra.mxu1 %v6205_v42  ;;  %v2295_v42 = vld [vmem:[#allocation3 + $0x199] sm:$0xff] }
 0x4d1   : > { %3245 = vmatmul.f32.gmra.mxu3 %v2259_v31  ;;  %v6440_v31 = vpop.f32.mrf.mxu3 }
 0x4d2   : > { %3364 = vmatmul.f32.gmra.mxu0 %v6258_v11 }
 0x4d5   : > { %v6379_v23 = vpop.f32.mrf.mxu1 }
 0x4d8   : > { %3135 = vmatmul.f32.gmra.mxu2 %v6381_v54  ;;  %3423 = vmatmul.f32.gmra.mxu1 %v6220_v22  ;;  %v2296_v22 = vld [vmem:[#allocation3 + $0x1a1] sm:$0xff] }
 0x4d9   : > { %3248 = vmatmul.f32.gmra.mxu3 %v2260_v14  ;;  %v3563_v14 = vld [vmem:[#allocation2 + $0x21] sm:$0xff] }
 0x4da   : > { %3367 = vmatmul.f32.gmra.mxu0 %v6270_v59 }
 0x4dd   : > { %v6386_v50 = vpop.f32.mrf.mxu1 }
 0x4e0   : > { %3138 = vmatmul.f32.gmra.mxu2 %v6388_v62  ;;  %3426 = vmatmul.f32.gmra.mxu1 %v6232_v51  ;;  %v3806_v51 = vld [vmem:[#allocation2] sm:$0xff] }
 0x4e1   : > { %3251 = vmatmul.f32.gmra.mxu3 %v2261_v52 }
 0x4e2   : > { %3370 = vmatmul.f32.gmra.mxu0 %v2295_v42  ;;  %v6443_v42 = vpop.f32.mrf.mxu0 }
 0x4e5   : > { %v6392_v11 = vpop.f32.mrf.mxu1 }
 0x4e8   : > { %3141 = vmatmul.f32.gmra.mxu2 %v6394_v53  ;;  %3429 = vmatmul.f32.gmra.mxu1 %v6244_v1 }
 0x4e9   : > { %3254 = vmatmul.f32.gmra.mxu3 %v2262_v13 }
 0x4ea   : > { %3373 = vmatmul.f32.gmra.mxu0 %v2296_v22  ;;  %v6445_v22 = vpop.f32.mrf.mxu2 }
 0x4ed   : > { %v6398_v59 = vpop.f32.mrf.mxu1 }
 0x4f0   : > { %3144 = vmatmul.f32.gmra.mxu2 %v6400_v29  ;;  %3432 = vmatmul.f32.gmra.mxu1 %v6256_v43 }
 0x4f1   : > { %3257 = vmatmul.f32.gmra.mxu3 %v3806_v51 }
 0x4f5   : > { %v6404_v55 = vpop.f32.mrf.mxu1 }
 0x4f8   : > { %3147 = vmatmul.f32.gmra.mxu2 %v6406_v12  ;;  %3435 = vmatmul.f32.gmra.mxu1 %v6268_v57  ;;  %v3562_v57 = vld [vmem:[#allocation2 + $0x19] sm:$0xff] }
 0x4f9   : > { %3260 = vmatmul.f32.gmra.mxu3 %v3806_v51 }
 0x4fd   : > { %v6410_v1 = vpop.f32.mrf.mxu1 }
 0x500   : > { %3438 = vmatmul.f32.gmra.mxu1 %v6281_v39 }
 0x505   : > { %v3394_v43 = vpop.f32.mrf.mxu1 }
 0x506   : > { %v3395_v10 = vadd.f32 %v3394_v43, %v6284_v34 }
 0x508   : > { %v3494_v33 = vmul.f32 %v6416_v38, %v3395_v10  ;;  %3441 = vmatmul.f32.gmra.mxu1 %v6292_v16 }
 0x50a   : > { %v3530_v39 = vadd.f32 %v6422_v7, %v3494_v33 }
 0x50c   : > { %v3594_v44 = vadd.f32 %v3562_v57, %v3530_v39  ;;  %v6452_v57 = vpop.f32.mrf.mxu3 }
 0x50d   : > { %v3397_v34 = vpop.f32.mrf.mxu1 }
 0x50e   : > { %v3626_v61 = vmax.f32 %v3594_v44, 0.0  ;;  %v3398_v28 = vadd.f32 %v3397_v34, %v6295_v56  ;;  %v6454_v34 = vpop.f32.mrf.mxu0 }
 0x510   : > { %3658 = vst [vmem:[%s6434_s27] sm:$0xff] %v3626_v61  ;;  %v3495_v16 = vmul.f32 %v6416_v38, %v3398_v28  ;;  %3444 = vmatmul.f32.gmra.mxu1 %v6303_v58  ;;  %v3564_v58 = vld [vmem:[#allocation2 + $0x31] sm:$0xff] }
 0x512   : > { %v3531_v52 = vadd.f32 %v6422_v7, %v3495_v16  ;;  %v6457_v16 = vpop.f32.mrf.mxu2 }
 0x514   : > { %v3595_v13 = vadd.f32 %v3563_v14, %v3531_v52 }
 0x515   : > { %v3400_v51 = vpop.f32.mrf.mxu1 }
 0x516   : > { %v3627_v43 = vmax.f32 %v3595_v13, 0.0  ;;  %v3401_v56 = vadd.f32 %v3400_v51, %v6306_v25  ;;  %v6463_v13 = vpop.f32.mrf.mxu3 }
 0x518   : > { %3659 = vst [vmem:[%s6434_s27 + $0x8] sm:$0xff] %v3627_v43  ;;  %v3496_v10 = vmul.f32 %v6416_v38, %v3401_v56  ;;  %3447 = vmatmul.f32.gmra.mxu1 %v6314_v27  ;;  %v3565_v27 = vld [vmem:[#allocation2 + $0x39] sm:$0xff] }
 0x51a   : > { %v3532_v33 = vadd.f32 %v6422_v7, %v3496_v10  ;;  %v6466_v10 = vpop.f32.mrf.mxu0 }
 0x51c   : > { %v3596_v39 = vadd.f32 %v3564_v58, %v3532_v33  ;;  %v6471_v58 = vpop.f32.mrf.mxu2 }
 0x51d   : > { %v3403_v44 = vpop.f32.mrf.mxu1 }
 0x51e   : > { %v3628_v61 = vmax.f32 %v3596_v39, 0.0  ;;  %v3404_v28 = vadd.f32 %v3403_v44, %v6317_v5 }
 0x520   : > { %3660 = vst [vmem:[%s6434_s27 + $0x10] sm:$0xff] %v3628_v61  ;;  %v3497_v25 = vmul.f32 %v6416_v38, %v3404_v28  ;;  %3450 = vmatmul.f32.gmra.mxu1 %v6325_v63  ;;  %v3566_v63 = vld [vmem:[#allocation2 + $0x49] sm:$0xff] }
 0x522   : > { %v3533_v14 = vadd.f32 %v6422_v7, %v3497_v25  ;;  %v6475_v25 = vpop.f32.mrf.mxu3 }
 0x524   : > { %v3597_v52 = vadd.f32 %v3565_v27, %v3533_v14  ;;  %v3567_v27 = vld [vmem:[#allocation2 + $0x51] sm:$0xff] }
 0x525   : > { %v3406_v51 = vpop.f32.mrf.mxu1 }
 0x526   : > { %v3629_v43 = vmax.f32 %v3597_v52, 0.0  ;;  %v3407_v56 = vadd.f32 %v3406_v51, %v6328_v36  ;;  %v6483_v52 = vpop.f32.mrf.mxu2 }
 0x528   : > { %3661 = vst [vmem:[%s6434_s27 + $0x18] sm:$0xff] %v3629_v43  ;;  %v3498_v5 = vmul.f32 %v6416_v38, %v3407_v56  ;;  %3453 = vmatmul.f32.gmra.mxu1 %v6336_v32  ;;  %v6480_v32 = vpop.f32.mrf.mxu0 }
 0x52a   : > { %v3534_v33 = vadd.f32 %v6422_v7, %v3498_v5 }
 0x52c   : > { %v3598_v39 = vadd.f32 %v3566_v63, %v3534_v33  ;;  %v6489_v63 = vpop.f32.mrf.mxu3  ;;  %v2967_v33 = vadd.f32 %v6176_v30, %v5889_v15  ;;  %v3569_v15 = vld [vmem:[#allocation2 + $0x69] sm:$0xff]  ;;  %v2970_v30 = vadd.f32 %v6191_v8, %v5914_v9  ;;  %v3570_v8 = vld [vmem:[#allocation2 + $0x79] sm:$0xff] }
 0x52d   : > { %v3409_v44 = vpop.f32.mrf.mxu1 }
 0x52e   : > { %v3630_v61 = vmax.f32 %v3598_v39, 0.0  ;;  %v3410_v28 = vadd.f32 %v3409_v44, %v6339_v45  ;;  %v3080_v44 = vadd.f32 %v6427_v26, %v2967_v33 }
 0x530   : > { %3662 = vst [vmem:[%s6434_s27 + $0x20] sm:$0xff] %v3630_v61  ;;  %v3499_v36 = vmul.f32 %v6416_v38, %v3410_v28  ;;  %3456 = vmatmul.f32.gmra.mxu1 %v6347_v18  ;;  %v3568_v18 = vld [vmem:[#allocation2 + $0x61] sm:$0xff]  ;;  %v6495_v61 = vpop.f32.mrf.mxu0 }
 0x532   : > { %v3535_v14 = vadd.f32 %v6422_v7, %v3499_v36 }
 0x534   : > { %v3599_v51 = vadd.f32 %v3567_v27, %v3535_v14 }
 0x535   : > { %v3412_v43 = vpop.f32.mrf.mxu1 }
 0x536   : > { %v3631_v56 = vmax.f32 %v3599_v51, 0.0  ;;  %v3413_v5 = vadd.f32 %v3412_v43, %v6350_v19  ;;  %v6497_v19 = vpop.f32.mrf.mxu2  ;;  %v6507_v43 = vpop.f32.mrf.mxu3 }
 0x538   : > { %3663 = vst [vmem:[%s6434_s27 + $0x28] sm:$0xff] %v3631_v56  ;;  %v3500_v45 = vmul.f32 %v6416_v38, %v3413_v5  ;;  %3459 = vmatmul.f32.gmra.mxu1 %v6358_v37  ;;  %v3193_v37 = vadd.f32 %v6440_v31, %v3080_v44  ;;  %v3083_v56 = vadd.f32 %v6445_v22, %v2970_v30 }
 0x539   : > { %v2973_v22 = vadd.f32 %v6203_v40, %v5955_v24 }
 0x53a   : > { %v3536_v39 = vadd.f32 %v6422_v7, %v3500_v45  ;;  %v6511_v45 = vpop.f32.mrf.mxu0 }
 0x53b   : > { %v3086_v44 = vadd.f32 %v6457_v16, %v2973_v22  ;;  %v6813_v16 = vld [vmem:[#allocation10_spill] sm:$0xff] }
 0x53c   : > { %v3600_v28 = vadd.f32 %v3568_v18, %v3536_v39  ;;  %v6816_v22 = vld [vmem:[#allocation22_spill] sm:$0xff] }
 0x53d   : > { %v3415_v36 = vpop.f32.mrf.mxu1 }
 0x53e   : > { %v3632_v27 = vmax.f32 %v3600_v28, 0.0  ;;  %v3416_v14 = vadd.f32 %v3415_v36, %v6361_v20  ;;  %v3306_v20 = vadd.f32 %v6443_v42, %v3193_v37  ;;  %v6513_v39 = vpop.f32.mrf.mxu2 }
 0x540   : > { %3664 = vst [vmem:[%s6434_s27 + $0x30] sm:$0xff] %v3632_v27  ;;  %v3501_v51 = vmul.f32 %v6416_v38, %v3416_v14  ;;  %3462 = vmatmul.f32.gmra.mxu1 %v6367_v35  ;;  %v3196_v35 = vadd.f32 %v6452_v57, %v3083_v56  ;;  %v6524_v27 = vpop.f32.mrf.mxu3 }
 0x542   : > { %v3537_v26 = vadd.f32 %v6422_v7, %v3501_v51  ;;  %v3309_v36 = vadd.f32 %v6454_v34, %v3196_v35  ;;  %v3199_v51 = vadd.f32 %v6463_v13, %v3086_v44  ;;  %v6814_v34 = vld [vmem:[#allocation20_spill] sm:$0xff] }
 0x543   : > { %v2976_v30 = vadd.f32 %v6814_v34, %v6813_v16  ;;  %v6817_v16 = vld [vmem:[#allocation11_spill] sm:$0xff] }
 0x544   : > { %v3601_v5 = vadd.f32 %v3569_v15, %v3537_v26  ;;  %v6527_v15 = vpop.f32.mrf.mxu0  ;;  %v3312_v13 = vadd.f32 %v6466_v10, %v3199_v51  ;;  %v2982_v34 = vadd.f32 %v6242_v49, %v6817_v16  ;;  %v3574_v49 = vld [vmem:[#allocation2 + $0xa9] sm:$0xff] }
 0x545   : > { %v3418_v31 = vpop.f32.mrf.mxu1  ;;  %v3089_v56 = vadd.f32 %v6471_v58, %v2976_v30 }
 0x546   : > { %v3633_v18 = vmax.f32 %v3601_v5, 0.0  ;;  %v3419_v33 = vadd.f32 %v3418_v31, %v3306_v20  ;;  %v6532_v40 = vpop.f32.mrf.mxu2 }
 0x548   : > { %3665 = vst [vmem:[%s6434_s27 + $0x38] sm:$0xff] %v3633_v18  ;;  %v3502_v9 = vmul.f32 %v6416_v38, %v3419_v33  ;;  %3465 = vmatmul.f32.gmra.mxu1 %v6374_v60  ;;  %v3571_v60 = vld [vmem:[#allocation2 + $0x81] sm:$0xff]  ;;  %v6539_v33 = vpop.f32.mrf.mxu3 }
 0x54a   : > { %v3538_v42 = vadd.f32 %v6422_v7, %v3502_v9  ;;  %v3572_v9 = vld [vmem:[#allocation2 + $0x91] sm:$0xff] }
 0x54c   : > { %v3602_v28 = vadd.f32 %v3570_v8, %v3538_v42  ;;  %v6815_v8 = vld [vmem:[#allocation14_spill] sm:$0xff]  ;;  %v6547_v42 = vpop.f32.mrf.mxu0 }
 0x54d   : > { %v3421_v57 = vpop.f32.mrf.mxu1  ;;  %v2979_v58 = vadd.f32 %v6816_v22, %v6815_v8 }
 0x54e   : > { %v3634_v14 = vmax.f32 %v3602_v28, 0.0  ;;  %v3422_v37 = vadd.f32 %v3421_v57, %v3309_v36  ;;  %v6550_v44 = vpop.f32.mrf.mxu2 }
 0x54f   : > { %v3092_v28 = vadd.f32 %v6483_v52, %v2979_v58 }
 0x550   : > { %3666 = vst [vmem:[%s6434_s27 + $0x40] sm:$0xff] %v3634_v14  ;;  %v3503_v24 = vmul.f32 %v6416_v38, %v3422_v37  ;;  %3468 = vmatmul.f32.gmra.mxu1 %v6381_v54  ;;  %v3202_v54 = vadd.f32 %v6475_v25, %v3089_v56 }
 0x552   : > { %v3539_v26 = vadd.f32 %v6422_v7, %v3503_v24  ;;  %v3315_v25 = vadd.f32 %v6480_v32, %v3202_v54  ;;  %v3216_v24 = vpop.f32.mrf.mxu3  ;;  %v3095_v32 = vadd.f32 %v6497_v19, %v2982_v34  ;;  %v6819_v19 = vld [vmem:[#allocation25_spill] sm:$0xff] }
 0x554   : > { %v3603_v5 = vadd.f32 %v3571_v60, %v3539_v26  ;;  %v3573_v60 = vld [vmem:[#allocation2 + $0x99] sm:$0xff]  ;;  %v6562_v30 = vpop.f32.mrf.mxu0 }
 0x555   : > { %v3424_v20 = vpop.f32.mrf.mxu1 }
 0x556   : > { %v3635_v31 = vmax.f32 %v3603_v5, 0.0  ;;  %v3425_v18 = vadd.f32 %v3424_v20, %v3312_v13  ;;  %v3106_v56 = vpop.f32.mrf.mxu2 }
 0x558   : > { %3667 = vst [vmem:[%s6434_s27 + $0x48] sm:$0xff] %v3635_v31  ;;  %v3504_v35 = vmul.f32 %v6416_v38, %v3425_v18  ;;  %3471 = vmatmul.f32.gmra.mxu1 %v6388_v62  ;;  %v3205_v62 = vadd.f32 %v6489_v63, %v3092_v28  ;;  %v6818_v18 = vld [vmem:[#allocation13_spill] sm:$0xff] }
 0x559   : > { %v2985_v54 = vadd.f32 %v6819_v19, %v6818_v18 }
 0x55a   : > { %v3540_v10 = vadd.f32 %v6422_v7, %v3504_v35  ;;  %v3318_v63 = vadd.f32 %v6495_v61, %v3205_v62 }
 0x55b   : > { %v3098_v61 = vadd.f32 %v6513_v39, %v2985_v54 }
 0x55c   : > { %v3604_v36 = vadd.f32 %v3572_v9, %v3540_v10  ;;  %v3219_v9 = vpop.f32.mrf.mxu3 }
 0x55d   : > { %v3427_v57 = vpop.f32.mrf.mxu1 }
 0x55e   : > { %v3636_v14 = vmax.f32 %v3604_v36, 0.0  ;;  %v3428_v37 = vadd.f32 %v3427_v57, %v3315_v25  ;;  %v3109_v36 = vpop.f32.mrf.mxu2  ;;  %v3211_v25 = vadd.f32 %v6524_v27, %v3098_v61  ;;  %v3575_v57 = vld [vmem:[#allocation2 + $0xb1] sm:$0xff] }
 0x55f   : > { %v2327_v27 = vld [vmem:[#allocation3 + $0x19a] sm:$0xff] }
 0x560   : > { %3668 = vst [vmem:[%s6434_s27 + $0x50] sm:$0xff] %v3636_v14  ;;  %v3505_v51 = vmul.f32 %v6416_v38, %v3428_v37  ;;  %3474 = vmatmul.f32.gmra.mxu1 %v6394_v53  ;;  %v3208_v53 = vadd.f32 %v6507_v43, %v3095_v32  ;;  %v3332_v43 = vpop.f32.mrf.mxu0  ;;  %v6820_v14 = vld [vmem:[#allocation12_spill] sm:$0xff]  ;;  %v6821_v37 = vld [vmem:[#allocation27_spill] sm:$0xff] }
 0x561   : > { %v2988_v39 = vadd.f32 %v6821_v37, %v6820_v14 }
 0x562   : > { %v3541_v52 = vadd.f32 %v6422_v7, %v3505_v51  ;;  %v3321_v22 = vadd.f32 %v6511_v45, %v3208_v53 }
 0x563   : > { %v3101_v45 = vadd.f32 %v6532_v40, %v2988_v39 }
 0x564   : > { %v3605_v26 = vadd.f32 %v3573_v60, %v3541_v52  ;;  %v3324_v60 = vadd.f32 %v6527_v15, %v3211_v25  ;;  %v3222_v16 = vpop.f32.mrf.mxu3 }
 0x565   : > { %v3430_v5 = vpop.f32.mrf.mxu1 }
 0x566   : > { %v3637_v13 = vmax.f32 %v3605_v26, 0.0  ;;  %v3431_v20 = vadd.f32 %v3430_v5, %v3318_v63  ;;  %v3214_v26 = vadd.f32 %v6539_v33, %v3101_v45  ;;  %v3112_v5 = vpop.f32.mrf.mxu2  ;;  %v2328_v33 = vld [vmem:[#allocation3 + $0x1a2] sm:$0xff] }
 0x567   : > { %v3578_v45 = vld [vmem:[#allocation2 + $0xd9] sm:$0xff] }
 0x568   : > { %3669 = vst [vmem:[%s6434_s27 + $0x58] sm:$0xff] %v3637_v13  ;;  %v3506_v31 = vmul.f32 %v6416_v38, %v3431_v20  ;;  %3477 = vmatmul.f32.gmra.mxu1 %v6400_v29  ;;  %v3335_v63 = vpop.f32.mrf.mxu0  ;;  %v3576_v13 = vld [vmem:[#allocation2 + $0xc1] sm:$0xff]  ;;  %v6822_v20 = vld [vmem:[#allocation15_spill] sm:$0xff] }
 0x569   : > { %v2991_v40 = vadd.f32 %v6279_v41, %v6822_v20  ;;  %v6823_v41 = vld [vmem:[#allocation4_spill] sm:$0xff] }
 0x56a   : > { %v3542_v35 = vadd.f32 %v6422_v7, %v3506_v31  ;;  %v3579_v20 = vld [vmem:[#allocation2 + $0xe1] sm:$0xff] }
 0x56b   : > { %v3104_v53 = vadd.f32 %v6550_v44, %v2991_v40  ;;  %v6825_v40 = vld [vmem:[#allocation7_spill] sm:$0xff] }
 0x56c   : > { %v3606_v8 = vadd.f32 %v3574_v49, %v3542_v35  ;;  %v3327_v49 = vadd.f32 %v6547_v42, %v3214_v26  ;;  %v3225_v35 = vpop.f32.mrf.mxu3 }
 0x56d   : > { %v3433_v58 = vpop.f32.mrf.mxu1  ;;  %v3217_v61 = vadd.f32 %v3216_v24, %v3104_v53 }
 0x56e   : > { %v3638_v10 = vmax.f32 %v3606_v8, 0.0  ;;  %v3434_v28 = vadd.f32 %v3433_v58, %v3321_v22  ;;  %v3577_v22 = vld [vmem:[#allocation2 + $0xc9] sm:$0xff]  ;;  %v2994_v58 = vadd.f32 %v6290_v3, %v6823_v41 }
 0x570   : > { %3670 = vst [vmem:[%s6434_s27 + $0x60] sm:$0xff] %v3638_v10  ;;  %v3507_v29 = vmul.f32 %v6416_v38, %v3434_v28  ;;  %3480 = vmatmul.f32.gmra.mxu1 %v6406_v12  ;;  %v3338_v10 = vpop.f32.mrf.mxu0  ;;  %v3115_v28 = vpop.f32.mrf.mxu2  ;;  %v3107_v42 = vadd.f32 %v3106_v56, %v2994_v58 }
 0x572   : > { %v3543_v62 = vadd.f32 %v6422_v7, %v3507_v29  ;;  %v3330_v29 = vadd.f32 %v6562_v30, %v3217_v61  ;;  %v3220_v37 = vadd.f32 %v3219_v9, %v3107_v42 }
 0x574   : > { %v3607_v51 = vadd.f32 %v3575_v57, %v3543_v62  ;;  %v3228_v62 = vpop.f32.mrf.mxu3 }
 0x575   : > { %v3436_v34 = vpop.f32.mrf.mxu1 }
 0x576   : > { %v3639_v52 = vmax.f32 %v3607_v51, 0.0  ;;  %v3437_v32 = vadd.f32 %v3436_v34, %v3324_v60  ;;  %v6824_v51 = vld [vmem:[#allocation17_spill] sm:$0xff] }
 0x577   : > { %v2997_v3 = vadd.f32 %v6301_v46, %v6824_v51 }
 0x578   : > { %3671 = vst [vmem:[%s6434_s27 + $0x68] sm:$0xff] %v3639_v52  ;;  %v3508_v12 = vmul.f32 %v6416_v38, %v3437_v32  ;;  %3483 = vmatmul.f32.gmra.mxu1 %v2327_v27  ;;  %v3341_v56 = vpop.f32.mrf.mxu0  ;;  %v3333_v52 = vadd.f32 %v3332_v43, %v3220_v37  ;;  %v3118_v30 = vpop.f32.mrf.mxu2  ;;  %v3581_v37 = vld [vmem:[#allocation2 + $0xf9] sm:$0xff] }
 0x579   : > { %v3110_v34 = vadd.f32 %v3109_v36, %v2997_v3 }
 0x57a   : > { %v3544_v15 = vadd.f32 %v6422_v7, %v3508_v12 }
 0x57b   : > { %v3223_v9 = vadd.f32 %v3222_v16, %v3110_v34 }
 0x57c   : > { %v3608_v31 = vadd.f32 %v3576_v13, %v3544_v15  ;;  %v3000_v15 = vadd.f32 %v6312_v2, %v6825_v40  ;;  %v3231_v53 = vpop.f32.mrf.mxu3 }
 0x57d   : > { %v3439_v18 = vpop.f32.mrf.mxu1 }
 0x57e   : > { %v3640_v19 = vmax.f32 %v3608_v31, 0.0  ;;  %v3440_v54 = vadd.f32 %v3439_v18, %v3327_v49  ;;  %v3113_v36 = vadd.f32 %v3112_v5, %v3000_v15  ;;  %v3336_v49 = vadd.f32 %v3335_v63, %v3223_v9 }
 0x580   : > { %3672 = vst [vmem:[%s6434_s27 + $0x70] sm:$0xff] %v3640_v19  ;;  %v3509_v8 = vmul.f32 %v6416_v38, %v3440_v54  ;;  %3486 = vmatmul.f32.gmra.mxu1 %v2328_v33  ;;  %v3344_v18 = vpop.f32.mrf.mxu0  ;;  %v3121_v54 = vpop.f32.mrf.mxu2  ;;  %v3226_v16 = vadd.f32 %v3225_v35, %v3113_v36 }
 0x582   : > { %v3545_v44 = vadd.f32 %v6422_v7, %v3509_v8  ;;  %v3580_v8 = vld [vmem:[#allocation2 + $0xf1] sm:$0xff] }
 0x584   : > { %v3609_v25 = vadd.f32 %v3577_v22, %v3545_v44  ;;  %v6826_v22 = vld [vmem:[#allocation16_spill] sm:$0xff]  ;;  %v3339_v44 = vadd.f32 %v3338_v10, %v3226_v16  ;;  %v3234_v63 = vpop.f32.mrf.mxu3 }
 0x585   : > { %v3442_v57 = vpop.f32.mrf.mxu1  ;;  %v3003_v2 = vadd.f32 %v6323_v17, %v6826_v22 }
 0x586   : > { %v3641_v14 = vmax.f32 %v3609_v25, 0.0  ;;  %v3443_v24 = vadd.f32 %v3442_v57, %v3330_v29 }
 0x587   : > { %v3116_v58 = vadd.f32 %v3115_v28, %v3003_v2 }
 0x588   : > { %3673 = vst [vmem:[%s6434_s27 + $0x78] sm:$0xff] %v3641_v14  ;;  %v3510_v39 = vmul.f32 %v6416_v38, %v3443_v24  ;;  %v3347_v14 = vpop.f32.mrf.mxu0  ;;  %v3124_v24 = vpop.f32.mrf.mxu2 }
 0x589   : > { %v3229_v57 = vadd.f32 %v3228_v62, %v3116_v58 }
 0x58a   : > { %v3546_v60 = vadd.f32 %v6422_v7, %v3510_v39  ;;  %v6827_v39 = vld [vmem:[#allocation19_spill] sm:$0xff] }
 0x58b   : > { %v3006_v17 = vadd.f32 %v6334_v4, %v6827_v39  ;;  %v3342_v10 = vadd.f32 %v3341_v56, %v3229_v57 }
 0x58c   : > { %v3610_v27 = vadd.f32 %v3578_v45, %v3546_v60 }
 0x58d   : > { %v3445_v32 = vpop.f32.mrf.mxu1  ;;  %v3119_v28 = vadd.f32 %v3118_v30, %v3006_v17 }
 0x58e   : > { %v3642_v26 = vmax.f32 %v3610_v27, 0.0  ;;  %v3446_v12 = vadd.f32 %v3445_v32, %v3333_v52  ;;  %v3237_v27 = vpop.f32.mrf.mxu3  ;;  %v3582_v32 = vld [vmem:[#allocation2 + $0x109] sm:$0xff] }
 0x58f   : > { %v3232_v62 = vadd.f32 %v3231_v53, %v3119_v28  ;;  %v3585_v28 = vld [vmem:[#allocation2 + $0x129] sm:$0xff] }
 0x590   : > { %3674 = vst [vmem:[%s6434_s27 + $0x80] sm:$0xff] %v3642_v26  ;;  %v3511_v13 = vmul.f32 %v6416_v38, %v3446_v12  ;;  %v6828_v26 = vld [vmem:[#allocation5_spill] sm:$0xff]  ;;  %v3350_v9 = vpop.f32.mrf.mxu0 }
 0x591   : > { %v3009_v12 = vadd.f32 %v6345_v6, %v6828_v26  ;;  %v3345_v56 = vadd.f32 %v3344_v18, %v3232_v62 }
 0x592   : > { %v3547_v46 = vadd.f32 %v6422_v7, %v3511_v13  ;;  %v3127_v13 = vpop.f32.mrf.mxu2 }
 0x593   : > { %v3122_v30 = vadd.f32 %v3121_v54, %v3009_v12 }
 0x594   : > { %v3611_v31 = vadd.f32 %v3579_v20, %v3547_v46 }
 0x595   : > { %v3448_v43 = vpop.f32.mrf.mxu1  ;;  %v3235_v36 = vadd.f32 %v3234_v63, %v3122_v30  ;;  %v6832_v30 = vld [vmem:[#allocation9_spill] sm:$0xff] }
 0x596   : > { %v3643_v33 = vmax.f32 %v3611_v31, 0.0  ;;  %v3449_v19 = vadd.f32 %v3448_v43, %v3336_v49  ;;  %v3240_v31 = vpop.f32.mrf.mxu3  ;;  %v3583_v49 = vld [vmem:[#allocation2 + $0x111] sm:$0xff] }
 0x597   : > { %v6829_v43 = vld [vmem:[#allocation18_spill] sm:$0xff] }
 0x598   : > { %3675 = vst [vmem:[%s6434_s27 + $0x88] sm:$0xff] %v3643_v33  ;;  %v3512_v61 = vmul.f32 %v6416_v38, %v3449_v19  ;;  %v3012_v6 = vadd.f32 %v6356_v21, %v6829_v43  ;;  %v3353_v16 = vpop.f32.mrf.mxu0 }
 0x59a   : > { %v3548_v41 = vadd.f32 %v6422_v7, %v3512_v61  ;;  %v3125_v19 = vadd.f32 %v3124_v24, %v3012_v6  ;;  %v3348_v61 = vadd.f32 %v3347_v14, %v3235_v36  ;;  %v3130_v18 = vpop.f32.mrf.mxu2  ;;  %v3587_v6 = vld [vmem:[#allocation2 + $0x141] sm:$0xff] }
 0x59c   : > { %v3612_v5 = vadd.f32 %v3580_v8, %v3548_v41  ;;  %v3238_v41 = vadd.f32 %v3237_v27, %v3125_v19 }
 0x59d   : > { %v3451_v42 = vpop.f32.mrf.mxu1 }
 0x59e   : > { %v3644_v25 = vmax.f32 %v3612_v5, 0.0  ;;  %v3452_v29 = vadd.f32 %v3451_v42, %v3339_v44  ;;  %v3584_v5 = vld [vmem:[#allocation2 + $0x121] sm:$0xff]  ;;  %v6830_v44 = vld [vmem:[#allocation6_spill] sm:$0xff]  ;;  %v3243_v42 = vpop.f32.mrf.mxu3  ;;  %v3351_v57 = vadd.f32 %v3350_v9, %v3238_v41 }
 0x59f   : > { %v3015_v63 = vadd.f32 %v6365_v47, %v6830_v44 }
 0x5a0   : > { %3676 = vst [vmem:[%s6434_s27 + $0x90] sm:$0xff] %v3644_v25  ;;  %v3513_v35 = vmul.f32 %v6416_v38, %v3452_v29 }
 0x5a1   : > { %v3128_v25 = vadd.f32 %v3127_v13, %v3015_v63  ;;  %v3586_v13 = vld [vmem:[#allocation2 + $0x139] sm:$0xff]  ;;  %v3588_v63 = vld [vmem:[#allocation2 + $0x151] sm:$0xff] }
 0x5a2   : > { %v3549_v45 = vadd.f32 %v6422_v7, %v3513_v35  ;;  %v3356_v35 = vpop.f32.mrf.mxu0  ;;  %v3133_v39 = vpop.f32.mrf.mxu2 }
 0x5a3   : > { %v3241_v17 = vadd.f32 %v3240_v31, %v3128_v25 }
 0x5a4   : > { %v3613_v51 = vadd.f32 %v3581_v37, %v3549_v45 }
 0x5a5   : > { %v3454_v3 = vpop.f32.mrf.mxu1 }
 0x5a6   : > { %v3645_v60 = vmax.f32 %v3613_v51, 0.0  ;;  %v3455_v34 = vadd.f32 %v3454_v3, %v3342_v10  ;;  %v6831_v51 = vld [vmem:[#allocation8_spill] sm:$0xff]  ;;  %v3246_v27 = vpop.f32.mrf.mxu3 }
 0x5a7   : > { %v3018_v47 = vadd.f32 %v6372_v0, %v6831_v51  ;;  %v3021_v0 = vadd.f32 %v6379_v23, %v6832_v30  ;;  %v6835_v51 = vld [vmem:[#allocation24_spill] sm:$0xff] }
 0x5a8   : > { %3677 = vst [vmem:[%s6434_s27 + $0x98] sm:$0xff] %v3645_v60  ;;  %v3514_v52 = vmul.f32 %v6416_v38, %v3455_v34  ;;  %v3354_v34 = vadd.f32 %v3353_v16, %v3241_v17 }
 0x5a9   : > { %v3131_v3 = vadd.f32 %v3130_v18, %v3018_v47  ;;  %v3030_v47 = vadd.f32 %v6398_v59, %v6835_v51 }
 0x5aa   : > { %v3550_v4 = vadd.f32 %v6422_v7, %v3514_v52  ;;  %v3359_v12 = vpop.f32.mrf.mxu0 }
 0x5ab   : > { %v3244_v26 = vadd.f32 %v3243_v42, %v3131_v3 }
 0x5ac   : > { %v3614_v20 = vadd.f32 %v3582_v32, %v3550_v4  ;;  %v3136_v4 = vpop.f32.mrf.mxu2 }
 0x5ad   : > { %v3457_v40 = vpop.f32.mrf.mxu1 }
 0x5ae   : > { %v3646_v15 = vmax.f32 %v3614_v20, 0.0  ;;  %v3458_v46 = vadd.f32 %v3457_v40, %v3345_v56  ;;  %v3134_v56 = vadd.f32 %v3133_v39, %v3021_v0  ;;  %v3249_v31 = vpop.f32.mrf.mxu3 }
 0x5b0   : > { %3678 = vst [vmem:[%s6434_s27 + $0xa0] sm:$0xff] %v3646_v15  ;;  %v3515_v53 = vmul.f32 %v6416_v38, %v3458_v46  ;;  %v3357_v15 = vadd.f32 %v3356_v35, %v3244_v26 }
 0x5b2   : > { %v3551_v33 = vadd.f32 %v6422_v7, %v3515_v53  ;;  %v3362_v16 = vpop.f32.mrf.mxu0 }
 0x5b4   : > { %v3615_v54 = vadd.f32 %v3583_v49, %v3551_v33  ;;  %v3247_v49 = vadd.f32 %v3246_v27, %v3134_v56  ;;  %v6833_v33 = vld [vmem:[#allocation21_spill] sm:$0xff] }
 0x5b5   : > { %v3460_v8 = vpop.f32.mrf.mxu1  ;;  %v3024_v19 = vadd.f32 %v6386_v50, %v6833_v33 }
 0x5b6   : > { %v3647_v22 = vmax.f32 %v3615_v54, 0.0  ;;  %v3461_v2 = vadd.f32 %v3460_v8, %v3348_v61  ;;  %v3139_v54 = vpop.f32.mrf.mxu2  ;;  %v3360_v8 = vadd.f32 %v3359_v12, %v3247_v49  ;;  %v3252_v44 = vpop.f32.mrf.mxu3 }
 0x5b7   : > { %v3137_v61 = vadd.f32 %v3136_v4, %v3024_v19  ;;  %v3590_v4 = vld [vmem:[#allocation2 + $0x169] sm:$0xff] }
 0x5b8   : > { %3679 = vst [vmem:[%s6434_s27 + $0xa8] sm:$0xff] %v3647_v22  ;;  %v3516_v58 = vmul.f32 %v6416_v38, %v3461_v2 }
 0x5ba   : > { %v3552_v21 = vadd.f32 %v6422_v7, %v3516_v58  ;;  %v3250_v58 = vadd.f32 %v3249_v31, %v3137_v61  ;;  %v3365_v25 = vpop.f32.mrf.mxu0 }
 0x5bc   : > { %v3616_v29 = vadd.f32 %v3584_v5, %v3552_v21  ;;  %v6834_v21 = vld [vmem:[#allocation23_spill] sm:$0xff] }
 0x5bd   : > { %v3463_v14 = vpop.f32.mrf.mxu1  ;;  %v3027_v50 = vadd.f32 %v6392_v11, %v6834_v21 }
 0x5be   : > { %v3648_v24 = vmax.f32 %v3616_v29, 0.0  ;;  %v3464_v37 = vadd.f32 %v3463_v14, %v3351_v57  ;;  %v3363_v14 = vadd.f32 %v3362_v16, %v3250_v58  ;;  %v3142_v35 = vpop.f32.mrf.mxu2  ;;  %v3592_v58 = vld [vmem:[#allocation2 + $0x181] sm:$0xff] }
 0x5bf   : > { %v3140_v29 = vadd.f32 %v3139_v54, %v3027_v50  ;;  %v3143_v3 = vadd.f32 %v3142_v35, %v3030_v47 }
 0x5c0   : > { %3680 = vst [vmem:[%s6434_s27 + $0xb0] sm:$0xff] %v3648_v24  ;;  %v3517_v45 = vmul.f32 %v6416_v38, %v3464_v37 }
 0x5c1   : > { %v3253_v17 = vadd.f32 %v3252_v44, %v3140_v29 }
 0x5c2   : > { %v3553_v10 = vadd.f32 %v6422_v7, %v3517_v45 }
 0x5c4   : > { %v3617_v60 = vadd.f32 %v3585_v28, %v3553_v10  ;;  %v3589_v28 = vld [vmem:[#allocation2 + $0x159] sm:$0xff]  ;;  %v3255_v10 = vpop.f32.mrf.mxu3 }
 0x5c5   : > { %v3466_v62 = vpop.f32.mrf.mxu1  ;;  %v3256_v12 = vadd.f32 %v3255_v10, %v3143_v3 }
 0x5c6   : > { %v3649_v52 = vmax.f32 %v3617_v60, 0.0  ;;  %v3467_v32 = vadd.f32 %v3466_v62, %v3354_v34  ;;  %v3366_v34 = vadd.f32 %v3365_v25, %v3253_v17  ;;  %v3145_v26 = vpop.f32.mrf.mxu2 }
 0x5c8   : > { %3681 = vst [vmem:[%s6434_s27 + $0xb8] sm:$0xff] %v3649_v52  ;;  %v3518_v9 = vmul.f32 %v6416_v38, %v3467_v32  ;;  %v3368_v32 = vpop.f32.mrf.mxu0 }
 0x5ca   : > { %v3554_v20 = vadd.f32 %v6422_v7, %v3518_v9 }
 0x5cc   : > { %v3618_v40 = vadd.f32 %v3586_v13, %v3554_v20  ;;  %v6836_v13 = vld [vmem:[#allocation26_spill] sm:$0xff]  ;;  %v3258_v0 = vpop.f32.mrf.mxu3 }
 0x5cd   : > { %v3469_v46 = vpop.f32.mrf.mxu1  ;;  %v3033_v59 = vadd.f32 %v6404_v55, %v6836_v13  ;;  %v3036_v55 = vadd.f32 %v6410_v1, %v6273_v48 }
 0x5ce   : > { %v3650_v36 = vmax.f32 %v3618_v40, 0.0  ;;  %v3470_v53 = vadd.f32 %v3469_v46, %v3357_v15  ;;  %v3369_v40 = vadd.f32 %v3368_v32, %v3256_v12 }
 0x5cf   : > { %v3146_v20 = vadd.f32 %v3145_v26, %v3033_v59 }
 0x5d0   : > { %3682 = vst [vmem:[%s6434_s27 + $0xc0] sm:$0xff] %v3650_v36  ;;  %v3519_v43 = vmul.f32 %v6416_v38, %v3470_v53  ;;  %v3371_v53 = vpop.f32.mrf.mxu0 }
 0x5d1   : > { %v3259_v31 = vadd.f32 %v3258_v0, %v3146_v20 }
 0x5d2   : > { %v3555_v23 = vadd.f32 %v6422_v7, %v3519_v43  ;;  %v3148_v43 = vpop.f32.mrf.mxu2 }
 0x5d3   : > { %v3372_v19 = vadd.f32 %v3371_v53, %v3259_v31  ;;  %v3149_v16 = vadd.f32 %v3148_v43, %v3036_v55 }
 0x5d4   : > { %v3619_v18 = vadd.f32 %v3587_v6, %v3555_v23  ;;  %v3591_v6 = vld [vmem:[#allocation2 + $0x171] sm:$0xff]  ;;  %v3261_v54 = vpop.f32.mrf.mxu3 }
 0x5d5   : > { %v3472_v22 = vpop.f32.mrf.mxu1 }
 0x5d6   : > { %v3651_v2 = vmax.f32 %v3619_v18, 0.0  ;;  %v3473_v41 = vadd.f32 %v3472_v22, %v3360_v8  ;;  %v3262_v22 = vadd.f32 %v3261_v54, %v3149_v16 }
 0x5d8   : > { %3683 = vst [vmem:[%s6434_s27 + $0xc8] sm:$0xff] %v3651_v2  ;;  %v3520_v5 = vmul.f32 %v6416_v38, %v3473_v41  ;;  %v3374_v41 = vpop.f32.mrf.mxu0 }
 0x5d9   : > { %v3375_v48 = vadd.f32 %v3374_v41, %v3262_v22 }
 0x5da   : > { %v3556_v42 = vadd.f32 %v6422_v7, %v3520_v5 }
 0x5dc   : > { %v3620_v57 = vadd.f32 %v3588_v63, %v3556_v42  ;;  %v3593_v42 = vld [vmem:[#allocation2 + $0x189] sm:$0xff] }
 0x5dd   : > { %v3475_v24 = vpop.f32.mrf.mxu1 }
 0x5de   : > { %v3652_v37 = vmax.f32 %v3620_v57, 0.0  ;;  %v3476_v39 = vadd.f32 %v3475_v24, %v3363_v14 }
 0x5e0   : > { %3684 = vst [vmem:[%s6434_s27 + $0xd0] sm:$0xff] %v3652_v37  ;;  %v3521_v45 = vmul.f32 %v6416_v38, %v3476_v39 }
 0x5e2   : > { %v3557_v11 = vadd.f32 %v6422_v7, %v3521_v45 }
 0x5e4   : > { %v3621_v60 = vadd.f32 %v3589_v28, %v3557_v11 }
 0x5e5   : > { %v3478_v27 = vpop.f32.mrf.mxu1 }
 0x5e6   : > { %v3653_v62 = vmax.f32 %v3621_v60, 0.0  ;;  %v3479_v52 = vadd.f32 %v3478_v27, %v3366_v34 }
 0x5e8   : > { %3685 = vst [vmem:[%s6434_s27 + $0xd8] sm:$0xff] %v3653_v62  ;;  %v3522_v9 = vmul.f32 %v6416_v38, %v3479_v52 }
 0x5ea   : > { %v3558_v30 = vadd.f32 %v6422_v7, %v3522_v9 }
 0x5ec   : > { %v3622_v56 = vadd.f32 %v3590_v4, %v3558_v30 }
 0x5ed   : > { %v3481_v15 = vpop.f32.mrf.mxu1 }
 0x5ee   : > { %v3654_v46 = vmax.f32 %v3622_v56, 0.0  ;;  %v3482_v36 = vadd.f32 %v3481_v15, %v3369_v40 }
 0x5f0   : > { %3686 = vst [vmem:[%s6434_s27 + $0xe0] sm:$0xff] %v3654_v46  ;;  %v3523_v49 = vmul.f32 %v6416_v38, %v3482_v36 }
 0x5f2   : > { %v3559_v33 = vadd.f32 %v6422_v7, %v3523_v49 }
 0x5f4   : > { %v3623_v23 = vadd.f32 %v3591_v6, %v3559_v33 }
 0x5f5   : > { %v3484_v61 = vpop.f32.mrf.mxu1 }
 0x5f6   : > { %v3655_v18 = vmax.f32 %v3623_v23, 0.0  ;;  %v3485_v8 = vadd.f32 %v3484_v61, %v3372_v19 }
 0x5f8   : > { %3687 = vst [vmem:[%s6434_s27 + $0xe8] sm:$0xff] %v3655_v18  ;;  %v3524_v2 = vmul.f32 %v6416_v38, %v3485_v8 }
 0x5fa   : > { %v3560_v5 = vadd.f32 %v6422_v7, %v3524_v2 }
 0x5fc   : > { %v3624_v1 = vadd.f32 %v3592_v58, %v3560_v5 }
 0x5fd   : > { %v3487_v44 = vpop.f32.mrf.mxu1 }
 0x5fe   : > { %v3656_v63 = vmax.f32 %v3624_v1, 0.0  ;;  %v3488_v21 = vadd.f32 %v3487_v44, %v3375_v48 }
 0x600   : > { %3688 = vst [vmem:[%s6434_s27 + $0xf0] sm:$0xff] %v3656_v63  ;;  %v3525_v50 = vmul.f32 %v6416_v38, %v3488_v21 }
 0x602   : > { %v3561_v25 = vadd.f32 %v6422_v7, %v3525_v50 }
 0x604   : > { %v3625_v29 = vadd.f32 %v3593_v42, %v3561_v25 }
 0x606   : > { %v3657_v57 = vmax.f32 %v3625_v29, 0.0 }
 0x608   : > { %3689 = vst [vmem:[%s6434_s27 + $0xf8] sm:$0xff] %v3657_v57 }
 0x609 PF: > { %s17_s24 = sadd.s32 1, %s3813_s24  }
 0x60a   : > { %p14_p4 = scmp.ge.s32.totalorder %s17_s24, 4  }
 0x60c   :  { %16 = sbr.rel (!%p14_p4) target bundleno = 1 (0x1), region = 82 }

</bundles_post_ra>
